<compile_context>
chip_gen: v6e
topology: v6e:2x2x1
jax: 0.10.0
libtpu: 0.0.40
codegen_flags: <defaults>
</compile_context>

<pallas_src>
import functools

import jax
import jax.numpy as jnp
import numpy as np
from jax import lax
from jax.experimental import pallas as pl
from jax.experimental.pallas import tpu as pltpu

START_TAG = "<START>"
STOP_TAG = "<STOP>"


# -----------------------------------------------------------------------------
# Pallas kernel
# -----------------------------------------------------------------------------
def bilstm_crf_kernel(T, E, Hc, TS, start_idx, stop_idx,
                      # inputs
                      sent_ref, emb_ref, w_in_ref, b_in_ref,
                      whh_f_ref, whh_b_ref,
                      h0f_ref, c0f_ref, h0b_ref, c0b_ref,
                      wtag_ref, btag_ref, trans_ref,
                      # outputs
                      score_ref, path_ref,
                      # scratch
                      embcomb_ref, hlstm_ref):
    f32 = jnp.float32
    G = Hc                 # per-gate lane width
    B0 = 4 * Hc            # backward-direction gate-block lane offset

    # ---------------- in-kernel embedding gather ----------------
    # embcomb[t, 0:E]  = embeds[t]       (forward-direction input)
    # embcomb[t, E:2E] = embeds[T-1-t]   (backward-direction input, reversed)
    for t in range(T):
        row = emb_ref[pl.ds(sent_ref[t], 1), :]            # (1, E) dynamic gather
        embcomb_ref[t:t + 1, 0:E] = row
        embcomb_ref[T - 1 - t:T - t, E:2 * E] = row

    # ---------------- hoisted input projection ----------------
    # One lane-dense matmul for all 4 gates of both directions, biases folded:
    # (T, 2E) @ (2E, 8*Hc) -> (T, 8*Hc)  (= one vreg at these sizes).
    xp = (jnp.dot(embcomb_ref[...], w_in_ref[...], preferred_element_type=f32)
          + b_in_ref[...])                                  # (T, 8*Hc) value

    # ---------------- fused bidirectional LSTM recurrence ----------------
    # Per step: 2 MXU dots (one per direction, complementary lane halves),
    # 1 sigmoid + 1 tanh over the full gates row, static 16-lane gate slices.
    # PyTorch gate order: i, f, g, o.
    whh_f = whh_f_ref[...]                                  # (Hc, 8Hc), cols [0:4Hc]
    whh_b = whh_b_ref[...]                                  # (Hc, 8Hc), cols [4Hc:8Hc]
    hf, cf = h0f_ref[...], c0f_ref[...]
    hb, cb = h0b_ref[...], c0b_ref[...]
    for s in range(T):                                      # static unroll (T const)
        tb = T - 1 - s
        gates = (jnp.dot(hf, whh_f, preferred_element_type=f32)
                 + jnp.dot(hb, whh_b, preferred_element_type=f32)
                 + xp[s:s + 1, :])                          # (1, 8Hc)
        sg = jax.nn.sigmoid(gates)
        th = jnp.tanh(gates)
        # forward direction (lanes [0 : 4Hc])
        cf = sg[:, G:2 * G] * cf + sg[:, 0:G] * th[:, 2 * G:3 * G]
        hf = sg[:, 3 * G:4 * G] * jnp.tanh(cf)
        # backward direction (lanes [4Hc : 8Hc])
        cb = (sg[:, B0 + G:B0 + 2 * G] * cb
              + sg[:, B0:B0 + G] * th[:, B0 + 2 * G:B0 + 3 * G])
        hb = sg[:, B0 + 3 * G:B0 + 4 * G] * jnp.tanh(cb)
        hlstm_ref[s:s + 1, 0:Hc] = hf                       # fwd hidden at time s
        hlstm_ref[tb:tb + 1, Hc:2 * Hc] = hb                # bwd hidden at time tb

    # ---------------- hidden2tag: single (T,2Hc)@(2Hc,TS) matmul ------------
    feats = (jnp.dot(hlstm_ref[...], wtag_ref[...], preferred_element_type=f32)
             + btag_ref[...])                               # (T, TS)

    # ---------------- CRF Viterbi decode (unrolled) ----------------
    lane = lax.broadcasted_iota(jnp.int32, (1, TS), 1)
    idx2 = lax.broadcasted_iota(jnp.int32, (TS, TS), 1)
    trans = trans_ref[...]
    fv = jnp.where(lane == start_idx, jnp.float32(0.0), jnp.float32(-10000.0))
    bptrs = []                                              # backpointers stay in vregs
    for t in range(T):
        scores = fv + trans                                 # scores[next, prev]
        vmax = jnp.max(scores, axis=1, keepdims=True)       # (TS, 1)
        # first-occurrence argmax over prev
        bptrs.append(jnp.min(jnp.where(scores >= vmax, idx2, TS), axis=1)
                     .reshape(1, TS).astype(jnp.int32))
        fv = jnp.max(scores, axis=1).reshape(1, TS) + feats[t:t + 1, :]

    terminal = fv + trans[stop_idx:stop_idx + 1, :]         # (1, TS)
    t_max = jnp.max(terminal, axis=1, keepdims=True)        # (1, 1)
    best = jnp.min(jnp.where(terminal >= t_max, lane, TS),
                   axis=1, keepdims=True).astype(jnp.int32)
    score_ref[...] = t_max

    # ---------------- back-pointer trace-back (unrolled, in-register) -------
    tlane = lax.broadcasted_iota(jnp.int32, (1, T), 1)
    path_vec = jnp.zeros((1, T), jnp.int32)
    cur = best
    for s in range(T):
        t = T - 1 - s
        path_vec = jnp.where(tlane == t, cur, path_vec)
        cur = jnp.sum(jnp.where(lane == cur, bptrs[t], 0),
                      axis=1, keepdims=True).astype(jnp.int32)
    path_ref[...] = path_vec


# -----------------------------------------------------------------------------
# Wrapper / glue (weight repacking happens once, outside the kernel)
# -----------------------------------------------------------------------------
def bilstm_crf_forward(params, sentence, *, start_idx, stop_idx):
    emb = params["emb"]
    vocab, E = emb.shape
    T = int(sentence.shape[0])
    Hc = params["h0"].shape[-1]
    TS = params["trans"].shape[0]
    G4 = 4 * Hc

    # fused input-projection weight: block-diagonal (2E, 8Hc), biases folded
    w_in = jnp.zeros((2 * E, 2 * G4), jnp.float32)
    w_in = w_in.at[:E, :G4].set(params["w_ih_f"].T)
    w_in = w_in.at[E:, G4:].set(params["w_ih_b"].T)
    b_in = jnp.concatenate(
        [(params["b_ih_f"] + params["b_hh_f"]).reshape(1, G4),
         (params["b_ih_b"] + params["b_hh_b"]).reshape(1, G4)], axis=1)

    # fused recurrent weights: each direction writes a complementary lane half
    whh_f = jnp.zeros((Hc, 2 * G4), jnp.float32).at[:, :G4].set(params["w_hh_f"].T)
    whh_b = jnp.zeros((Hc, 2 * G4), jnp.float32).at[:, G4:].set(params["w_hh_b"].T)

    h0f, c0f = params["h0"][0], params["c0"][0]             # (1, Hc)
    h0b, c0b = params["h0"][1], params["c0"][1]

    wtag = params["w_tag"].T                                 # (2Hc, TS)
    btag = params["b_tag"].reshape(1, TS)
    trans = params["trans"]
    sent = sentence.astype(jnp.int32)

    kernel = functools.partial(bilstm_crf_kernel, T, E, Hc, TS, start_idx, stop_idx)

    in_specs = ([pl.BlockSpec(memory_space=pltpu.MemorySpace.SMEM)]       # sentence
                + [pl.BlockSpec(memory_space=pltpu.MemorySpace.VMEM)] * 12)

    score, path = pl.pallas_call(
        kernel,
        out_shape=(jax.ShapeDtypeStruct((1, 1), jnp.float32),
                   jax.ShapeDtypeStruct((1, T), jnp.int32)),
        in_specs=in_specs,
        out_specs=(pl.BlockSpec(memory_space=pltpu.MemorySpace.VMEM),
                   pl.BlockSpec(memory_space=pltpu.MemorySpace.VMEM)),
        scratch_shapes=[
            pltpu.VMEM((T, 2 * E), jnp.float32),    # combined fwd / reversed embeds
            pltpu.VMEM((T, 2 * Hc), jnp.float32),   # combined bi-directional hiddens
        ],
    )(sent, emb, w_in, b_in, whh_f, whh_b,
      h0f, c0f, h0b, c0b, wtag, btag, trans)

    return score[0, 0], path[0]


# -----------------------------------------------------------------------------
# Pure-numpy reference (mirrors the torch module's forward())
# -----------------------------------------------------------------------------
def reference_forward(params, sentence, *, start_idx, stop_idx):
    emb = np.asarray(params["emb"])
    embeds = emb[np.asarray(sentence)]
    Hc = params["h0"].shape[-1]
    T = embeds.shape[0]

    def sigmoid(x):
        return 1.0 / (1.0 + np.exp(-x))

    def run_dir(w_ih, w_hh, b_ih, b_hh, h0, c0, reverse):
        w_ih, w_hh = np.asarray(w_ih), np.asarray(w_hh)
        b_ih, b_hh = np.asarray(b_ih), np.asarray(b_hh)
        h = np.asarray(h0).reshape(1, Hc).copy()
        c = np.asarray(c0).reshape(1, Hc).copy()
        outs = [None] * T
        order = range(T - 1, -1, -1) if reverse else range(T)
        for t in order:
            x = embeds[t:t + 1]
            gates = x @ w_ih.T + b_ih + h @ w_hh.T + b_hh
            i = sigmoid(gates[:, :Hc])
            f = sigmoid(gates[:, Hc:2 * Hc])
            g = np.tanh(gates[:, 2 * Hc:3 * Hc])
            o = sigmoid(gates[:, 3 * Hc:])
            c = f * c + i * g
            h = o * np.tanh(c)
            outs[t] = h
        return np.concatenate(outs, axis=0)

    out_f = run_dir(params["w_ih_f"], params["w_hh_f"], params["b_ih_f"],
                    params["b_hh_f"], params["h0"][0], params["c0"][0], False)
    out_b = run_dir(params["w_ih_b"], params["w_hh_b"], params["b_ih_b"],
                    params["b_hh_b"], params["h0"][1], params["c0"][1], True)
    lstm_out = np.concatenate([out_f, out_b], axis=1)
    feats = lstm_out @ np.asarray(params["w_tag"]).T + np.asarray(params["b_tag"])

    trans = np.asarray(params["trans"])
    TS = trans.shape[0]
    fv = np.full((TS,), -10000.0, np.float32)
    fv[start_idx] = 0.0
    bptrs = []
    for feat in feats:
        scores = fv[None, :] + trans
        bptrs.append(scores.argmax(axis=1))
        fv = scores.max(axis=1) + feat
    terminal = fv + trans[stop_idx]
    best = int(terminal.argmax())
    score = float(terminal[best])
    path = [best]
    for bp in reversed(bptrs):
        best = int(bp[best])
        path.append(best)
    start = path.pop()
    assert start == start_idx
    path.reverse()
    return score, path


# -----------------------------------------------------------------------------
# Main
# -----------------------------------------------------------------------------
if __name__ == "__main__":
    tag_to_ix = {"B": 0, "I": 1, "O": 2, START_TAG: 3, STOP_TAG: 4}
    START = tag_to_ix[START_TAG]
    STOP = tag_to_ix[STOP_TAG]

    vocab_size = 20
    embedding_dim = 16
    hidden_dim = 32            # Hc = 16 per direction
    T = 8
    TS = len(tag_to_ix)
    Hc = hidden_dim // 2

    key = jax.random.PRNGKey(0)
    ks = jax.random.split(key, 16)

    def rnd(k, shape, scale=0.1):
        return jax.random.normal(k, shape, jnp.float32) * scale

    trans = jax.random.normal(ks[11], (TS, TS), jnp.float32)
    trans = trans.at[START, :].set(-10000.0)
    trans = trans.at[:, STOP].set(-10000.0)

    params = {
        "emb":    rnd(ks[0], (vocab_size, embedding_dim), 1.0),
        "w_ih_f": rnd(ks[1], (4 * Hc, embedding_dim)),
        "w_hh_f": rnd(ks[2], (4 * Hc, Hc)),
        "b_ih_f": rnd(ks[3], (4 * Hc,)),
        "b_hh_f": rnd(ks[4], (4 * Hc,)),
        "w_ih_b": rnd(ks[5], (4 * Hc, embedding_dim)),
        "w_hh_b": rnd(ks[6], (4 * Hc, Hc)),
        "b_ih_b": rnd(ks[7], (4 * Hc,)),
        "b_hh_b": rnd(ks[8], (4 * Hc,)),
        "w_tag":  rnd(ks[9], (TS, hidden_dim)),
        "b_tag":  rnd(ks[10], (TS,)),
        "trans":  trans,
        # torch module draws init_hidden from randn each forward; here it is a
        # deterministic draw from the PRNG instead.
        "h0": jax.random.normal(ks[12], (2, 1, Hc), jnp.float32),
        "c0": jax.random.normal(ks[13], (2, 1, Hc), jnp.float32),
    }

    sentence = jax.random.randint(ks[14], (T,), 0, vocab_size, jnp.int32)

    score, path = bilstm_crf_forward(params, sentence,
                                     start_idx=START, stop_idx=STOP)
    score = jax.block_until_ready(score)
    path = jax.block_until_ready(path)

    ref_score, ref_path = reference_forward(params, sentence,
                                            start_idx=START, stop_idx=STOP)

    assert list(np.asarray(path)) == ref_path, (list(np.asarray(path)), ref_path)
    assert abs(float(score) - ref_score) < 1e-2, (float(score), ref_score)

    print("KERNEL_OK")
</pallas_src>

<mosaic_0001>
module attributes {stable_mosaic.version = 11 : i64} {
  func.func @bilstm_crf_kernel(%arg0: memref<8xi32, #tpu.memory_space<smem>>, %arg1: memref<20x16xf32, #tpu.memory_space<vmem>>, %arg2: memref<32x128xf32, #tpu.memory_space<vmem>>, %arg3: memref<1x128xf32, #tpu.memory_space<vmem>>, %arg4: memref<16x128xf32, #tpu.memory_space<vmem>>, %arg5: memref<16x128xf32, #tpu.memory_space<vmem>>, %arg6: memref<1x16xf32, #tpu.memory_space<vmem>>, %arg7: memref<1x16xf32, #tpu.memory_space<vmem>>, %arg8: memref<1x16xf32, #tpu.memory_space<vmem>>, %arg9: memref<1x16xf32, #tpu.memory_space<vmem>>, %arg10: memref<32x5xf32, #tpu.memory_space<vmem>>, %arg11: memref<1x5xf32, #tpu.memory_space<vmem>>, %arg12: memref<5x5xf32, #tpu.memory_space<vmem>>, %arg13: memref<1x1xf32, #tpu.memory_space<vmem>>, %arg14: memref<1x8xi32, #tpu.memory_space<vmem>>, %arg15: memref<8x32xf32, #tpu.memory_space<vmem>>, %arg16: memref<8x32xf32, #tpu.memory_space<vmem>>) attributes {dimension_semantics = [], scalar_prefetch = 0 : i64, scratch_operands = 2 : i64, tpu.core_type = #tpu.core_type<tc>} {
    %c0 = arith.constant 0 : index
    %0 = memref.load %arg0[%c0] : memref<8xi32, #tpu.memory_space<smem>>
    %1 = arith.index_cast %0 : i32 to index
    %c0_0 = arith.constant 0 : index
    %2 = vector.load %arg1[%1, %c0_0] : memref<20x16xf32, #tpu.memory_space<vmem>>, vector<1x16xf32>
    %c0_1 = arith.constant 0 : index
    %c0_2 = arith.constant 0 : index
    %3 = vector.load %arg15[%c0_1, %c0_2] : memref<8x32xf32, #tpu.memory_space<vmem>>, vector<1x16xf32>
    tpu.vector_store %arg15[%c0_1, %c0_2], %2 {strides = array<i32>} : memref<8x32xf32, #tpu.memory_space<vmem>>, vector<1x16xf32>,
    %c7 = arith.constant 7 : index
    %c16 = arith.constant 16 : index
    %4 = vector.load %arg15[%c7, %c16] : memref<8x32xf32, #tpu.memory_space<vmem>>, vector<1x16xf32>
    tpu.vector_store %arg15[%c7, %c16], %2 {strides = array<i32>} : memref<8x32xf32, #tpu.memory_space<vmem>>, vector<1x16xf32>,
    %c1 = arith.constant 1 : index
    %5 = memref.load %arg0[%c1] : memref<8xi32, #tpu.memory_space<smem>>
    %6 = arith.index_cast %5 : i32 to index
    %c0_3 = arith.constant 0 : index
    %7 = vector.load %arg1[%6, %c0_3] : memref<20x16xf32, #tpu.memory_space<vmem>>, vector<1x16xf32>
    %c1_4 = arith.constant 1 : index
    %c0_5 = arith.constant 0 : index
    %8 = vector.load %arg15[%c1_4, %c0_5] : memref<8x32xf32, #tpu.memory_space<vmem>>, vector<1x16xf32>
    tpu.vector_store %arg15[%c1_4, %c0_5], %7 {strides = array<i32>} : memref<8x32xf32, #tpu.memory_space<vmem>>, vector<1x16xf32>,
    %c6 = arith.constant 6 : index
    %c16_6 = arith.constant 16 : index
    %9 = vector.load %arg15[%c6, %c16_6] : memref<8x32xf32, #tpu.memory_space<vmem>>, vector<1x16xf32>
    tpu.vector_store %arg15[%c6, %c16_6], %7 {strides = array<i32>} : memref<8x32xf32, #tpu.memory_space<vmem>>, vector<1x16xf32>,
    %c2 = arith.constant 2 : index
    %10 = memref.load %arg0[%c2] : memref<8xi32, #tpu.memory_space<smem>>
    %11 = arith.index_cast %10 : i32 to index
    %c0_7 = arith.constant 0 : index
    %12 = vector.load %arg1[%11, %c0_7] : memref<20x16xf32, #tpu.memory_space<vmem>>, vector<1x16xf32>
    %c2_8 = arith.constant 2 : index
    %c0_9 = arith.constant 0 : index
    %13 = vector.load %arg15[%c2_8, %c0_9] : memref<8x32xf32, #tpu.memory_space<vmem>>, vector<1x16xf32>
    tpu.vector_store %arg15[%c2_8, %c0_9], %12 {strides = array<i32>} : memref<8x32xf32, #tpu.memory_space<vmem>>, vector<1x16xf32>,
    %c5 = arith.constant 5 : index
    %c16_10 = arith.constant 16 : index
    %14 = vector.load %arg15[%c5, %c16_10] : memref<8x32xf32, #tpu.memory_space<vmem>>, vector<1x16xf32>
    tpu.vector_store %arg15[%c5, %c16_10], %12 {strides = array<i32>} : memref<8x32xf32, #tpu.memory_space<vmem>>, vector<1x16xf32>,
    %c3 = arith.constant 3 : index
    %15 = memref.load %arg0[%c3] : memref<8xi32, #tpu.memory_space<smem>>
    %16 = arith.index_cast %15 : i32 to index
    %c0_11 = arith.constant 0 : index
    %17 = vector.load %arg1[%16, %c0_11] : memref<20x16xf32, #tpu.memory_space<vmem>>, vector<1x16xf32>
    %c3_12 = arith.constant 3 : index
    %c0_13 = arith.constant 0 : index
    %18 = vector.load %arg15[%c3_12, %c0_13] : memref<8x32xf32, #tpu.memory_space<vmem>>, vector<1x16xf32>
    tpu.vector_store %arg15[%c3_12, %c0_13], %17 {strides = array<i32>} : memref<8x32xf32, #tpu.memory_space<vmem>>, vector<1x16xf32>,
    %c4 = arith.constant 4 : index
    %c16_14 = arith.constant 16 : index
    %19 = vector.load %arg15[%c4, %c16_14] : memref<8x32xf32, #tpu.memory_space<vmem>>, vector<1x16xf32>
    tpu.vector_store %arg15[%c4, %c16_14], %17 {strides = array<i32>} : memref<8x32xf32, #tpu.memory_space<vmem>>, vector<1x16xf32>,
    %c4_15 = arith.constant 4 : index
    %20 = memref.load %arg0[%c4_15] : memref<8xi32, #tpu.memory_space<smem>>
    %21 = arith.index_cast %20 : i32 to index
    %c0_16 = arith.constant 0 : index
    %22 = vector.load %arg1[%21, %c0_16] : memref<20x16xf32, #tpu.memory_space<vmem>>, vector<1x16xf32>
    %c4_17 = arith.constant 4 : index
    %c0_18 = arith.constant 0 : index
    %23 = vector.load %arg15[%c4_17, %c0_18] : memref<8x32xf32, #tpu.memory_space<vmem>>, vector<1x16xf32>
    tpu.vector_store %arg15[%c4_17, %c0_18], %22 {strides = array<i32>} : memref<8x32xf32, #tpu.memory_space<vmem>>, vector<1x16xf32>,
    %c3_19 = arith.constant 3 : index
    %c16_20 = arith.constant 16 : index
    %24 = vector.load %arg15[%c3_19, %c16_20] : memref<8x32xf32, #tpu.memory_space<vmem>>, vector<1x16xf32>
    tpu.vector_store %arg15[%c3_19, %c16_20], %22 {strides = array<i32>} : memref<8x32xf32, #tpu.memory_space<vmem>>, vector<1x16xf32>,
    %c5_21 = arith.constant 5 : index
    %25 = memref.load %arg0[%c5_21] : memref<8xi32, #tpu.memory_space<smem>>
    %26 = arith.index_cast %25 : i32 to index
    %c0_22 = arith.constant 0 : index
    %27 = vector.load %arg1[%26, %c0_22] : memref<20x16xf32, #tpu.memory_space<vmem>>, vector<1x16xf32>
    %c5_23 = arith.constant 5 : index
    %c0_24 = arith.constant 0 : index
    %28 = vector.load %arg15[%c5_23, %c0_24] : memref<8x32xf32, #tpu.memory_space<vmem>>, vector<1x16xf32>
    tpu.vector_store %arg15[%c5_23, %c0_24], %27 {strides = array<i32>} : memref<8x32xf32, #tpu.memory_space<vmem>>, vector<1x16xf32>,
    %c2_25 = arith.constant 2 : index
    %c16_26 = arith.constant 16 : index
    %29 = vector.load %arg15[%c2_25, %c16_26] : memref<8x32xf32, #tpu.memory_space<vmem>>, vector<1x16xf32>
    tpu.vector_store %arg15[%c2_25, %c16_26], %27 {strides = array<i32>} : memref<8x32xf32, #tpu.memory_space<vmem>>, vector<1x16xf32>,
    %c6_27 = arith.constant 6 : index
    %30 = memref.load %arg0[%c6_27] : memref<8xi32, #tpu.memory_space<smem>>
    %31 = arith.index_cast %30 : i32 to index
    %c0_28 = arith.constant 0 : index
    %32 = vector.load %arg1[%31, %c0_28] : memref<20x16xf32, #tpu.memory_space<vmem>>, vector<1x16xf32>
    %c6_29 = arith.constant 6 : index
    %c0_30 = arith.constant 0 : index
    %33 = vector.load %arg15[%c6_29, %c0_30] : memref<8x32xf32, #tpu.memory_space<vmem>>, vector<1x16xf32>
    tpu.vector_store %arg15[%c6_29, %c0_30], %32 {strides = array<i32>} : memref<8x32xf32, #tpu.memory_space<vmem>>, vector<1x16xf32>,
    %c1_31 = arith.constant 1 : index
    %c16_32 = arith.constant 16 : index
    %34 = vector.load %arg15[%c1_31, %c16_32] : memref<8x32xf32, #tpu.memory_space<vmem>>, vector<1x16xf32>
    tpu.vector_store %arg15[%c1_31, %c16_32], %32 {strides = array<i32>} : memref<8x32xf32, #tpu.memory_space<vmem>>, vector<1x16xf32>,
    %c7_33 = arith.constant 7 : index
    %35 = memref.load %arg0[%c7_33] : memref<8xi32, #tpu.memory_space<smem>>
    %36 = arith.index_cast %35 : i32 to index
    %c0_34 = arith.constant 0 : index
    %37 = vector.load %arg1[%36, %c0_34] : memref<20x16xf32, #tpu.memory_space<vmem>>, vector<1x16xf32>
    %c7_35 = arith.constant 7 : index
    %c0_36 = arith.constant 0 : index
    %38 = vector.load %arg15[%c7_35, %c0_36] : memref<8x32xf32, #tpu.memory_space<vmem>>, vector<1x16xf32>
    tpu.vector_store %arg15[%c7_35, %c0_36], %37 {strides = array<i32>} : memref<8x32xf32, #tpu.memory_space<vmem>>, vector<1x16xf32>,
    %c0_37 = arith.constant 0 : index
    %c16_38 = arith.constant 16 : index
    %39 = vector.load %arg15[%c0_37, %c16_38] : memref<8x32xf32, #tpu.memory_space<vmem>>, vector<1x16xf32>
    tpu.vector_store %arg15[%c0_37, %c16_38], %37 {strides = array<i32>} : memref<8x32xf32, #tpu.memory_space<vmem>>, vector<1x16xf32>,
    %c0_39 = arith.constant 0 : index
    %c0_40 = arith.constant 0 : index
    %40 = vector.load %arg15[%c0_39, %c0_40] : memref<8x32xf32, #tpu.memory_space<vmem>>, vector<8x32xf32>
    %c0_41 = arith.constant 0 : index
    %c0_42 = arith.constant 0 : index
    %41 = vector.load %arg2[%c0_41, %c0_42] : memref<32x128xf32, #tpu.memory_space<vmem>>, vector<32x128xf32>
    %cst = arith.constant dense<0.000000e+00> : vector<8x128xf32>
    %42 = tpu.matmul %40, %41, %cst {dimension_numbers = #tpu.dot_dimension_numbers<[1], [0], [0], [1], [0, 0, 1, 1], [], []>} : vector<8x32xf32>, vector<32x128xf32>, vector<8x128xf32> -> vector<8x128xf32>
    %c0_43 = arith.constant 0 : index
    %c0_44 = arith.constant 0 : index
    %43 = vector.load %arg3[%c0_43, %c0_44] : memref<1x128xf32, #tpu.memory_space<vmem>>, vector<1x128xf32>
    %44 = vector.broadcast %43 : vector<1x128xf32> to vector<8x128xf32>
    %45 = arith.addf %42, %44 : vector<8x128xf32>
    %c0_45 = arith.constant 0 : index
    %c0_46 = arith.constant 0 : index
    %46 = vector.load %arg4[%c0_45, %c0_46] : memref<16x128xf32, #tpu.memory_space<vmem>>, vector<16x128xf32>
    %c0_47 = arith.constant 0 : index
    %c0_48 = arith.constant 0 : index
    %47 = vector.load %arg5[%c0_47, %c0_48] : memref<16x128xf32, #tpu.memory_space<vmem>>, vector<16x128xf32>
    %c0_49 = arith.constant 0 : index
    %c0_50 = arith.constant 0 : index
    %48 = vector.load %arg6[%c0_49, %c0_50] : memref<1x16xf32, #tpu.memory_space<vmem>>, vector<1x16xf32>
    %c0_51 = arith.constant 0 : index
    %c0_52 = arith.constant 0 : index
    %49 = vector.load %arg7[%c0_51, %c0_52] : memref<1x16xf32, #tpu.memory_space<vmem>>, vector<1x16xf32>
    %c0_53 = arith.constant 0 : index
    %c0_54 = arith.constant 0 : index
    %50 = vector.load %arg8[%c0_53, %c0_54] : memref<1x16xf32, #tpu.memory_space<vmem>>, vector<1x16xf32>
    %c0_55 = arith.constant 0 : index
    %c0_56 = arith.constant 0 : index
    %51 = vector.load %arg9[%c0_55, %c0_56] : memref<1x16xf32, #tpu.memory_space<vmem>>, vector<1x16xf32>
    %cst_57 = arith.constant dense<0.000000e+00> : vector<1x128xf32>
    %52 = tpu.matmul %48, %46, %cst_57 {dimension_numbers = #tpu.dot_dimension_numbers<[1], [0], [0], [1], [0, 0, 1, 1], [], []>} : vector<1x16xf32>, vector<16x128xf32>, vector<1x128xf32> -> vector<1x128xf32>
    %cst_58 = arith.constant dense<0.000000e+00> : vector<1x128xf32>
    %53 = tpu.matmul %50, %47, %cst_58 {dimension_numbers = #tpu.dot_dimension_numbers<[1], [0], [0], [1], [0, 0, 1, 1], [], []>} : vector<1x16xf32>, vector<16x128xf32>, vector<1x128xf32> -> vector<1x128xf32>
    %54 = arith.addf %52, %53 : vector<1x128xf32>
    %55 = vector.extract_strided_slice %45 {offsets = [0, 0], sizes = [1, 128], strides = [1, 1]} : vector<8x128xf32> to vector<1x128xf32>
    %56 = arith.addf %54, %55 : vector<1x128xf32>
    %57 = arith.negf %56 : vector<1x128xf32>
    %58 = math.exp %57 : vector<1x128xf32>
    %cst_59 = arith.constant 1.000000e+00 : f32
    %59 = vector.broadcast %cst_59 : f32 to vector<1x128xf32>
    %60 = arith.addf %59, %58 : vector<1x128xf32>
    %61 = arith.divf %59, %60 : vector<1x128xf32>
    %62 = math.tanh %56 : vector<1x128xf32>
    %63 = vector.extract_strided_slice %61 {offsets = [0, 16], sizes = [1, 16], strides = [1, 1]} : vector<1x128xf32> to vector<1x16xf32>
    %64 = arith.mulf %63, %49 : vector<1x16xf32>
    %65 = vector.extract_strided_slice %61 {offsets = [0, 0], sizes = [1, 16], strides = [1, 1]} : vector<1x128xf32> to vector<1x16xf32>
    %66 = vector.extract_strided_slice %62 {offsets = [0, 32], sizes = [1, 16], strides = [1, 1]} : vector<1x128xf32> to vector<1x16xf32>
    %67 = arith.mulf %65, %66 : vector<1x16xf32>
    %68 = arith.addf %64, %67 : vector<1x16xf32>
    %69 = vector.extract_strided_slice %61 {offsets = [0, 48], sizes = [1, 16], strides = [1, 1]} : vector<1x128xf32> to vector<1x16xf32>
    %70 = math.tanh %68 : vector<1x16xf32>
    %71 = arith.mulf %69, %70 : vector<1x16xf32>
    %72 = vector.extract_strided_slice %61 {offsets = [0, 80], sizes = [1, 16], strides = [1, 1]} : vector<1x128xf32> to vector<1x16xf32>
    %73 = arith.mulf %72, %51 : vector<1x16xf32>
    %74 = vector.extract_strided_slice %61 {offsets = [0, 64], sizes = [1, 16], strides = [1, 1]} : vector<1x128xf32> to vector<1x16xf32>
    %75 = vector.extract_strided_slice %62 {offsets = [0, 96], sizes = [1, 16], strides = [1, 1]} : vector<1x128xf32> to vector<1x16xf32>
    %76 = arith.mulf %74, %75 : vector<1x16xf32>
    %77 = arith.addf %73, %76 : vector<1x16xf32>
    %78 = vector.extract_strided_slice %61 {offsets = [0, 112], sizes = [1, 16], strides = [1, 1]} : vector<1x128xf32> to vector<1x16xf32>
    %79 = math.tanh %77 : vector<1x16xf32>
    %80 = arith.mulf %78, %79 : vector<1x16xf32>
    %c0_60 = arith.constant 0 : index
    %c0_61 = arith.constant 0 : index
    %81 = vector.load %arg16[%c0_60, %c0_61] : memref<8x32xf32, #tpu.memory_space<vmem>>, vector<1x16xf32>
    tpu.vector_store %arg16[%c0_60, %c0_61], %71 {strides = array<i32>} : memref<8x32xf32, #tpu.memory_space<vmem>>, vector<1x16xf32>,
    %c7_62 = arith.constant 7 : index
    %c16_63 = arith.constant 16 : index
    %82 = vector.load %arg16[%c7_62, %c16_63] : memref<8x32xf32, #tpu.memory_space<vmem>>, vector<1x16xf32>
    tpu.vector_store %arg16[%c7_62, %c16_63], %80 {strides = array<i32>} : memref<8x32xf32, #tpu.memory_space<vmem>>, vector<1x16xf32>,
    %cst_64 = arith.constant dense<0.000000e+00> : vector<1x128xf32>
    %83 = tpu.matmul %71, %46, %cst_64 {dimension_numbers = #tpu.dot_dimension_numbers<[1], [0], [0], [1], [0, 0, 1, 1], [], []>} : vector<1x16xf32>, vector<16x128xf32>, vector<1x128xf32> -> vector<1x128xf32>
    %cst_65 = arith.constant dense<0.000000e+00> : vector<1x128xf32>
    %84 = tpu.matmul %80, %47, %cst_65 {dimension_numbers = #tpu.dot_dimension_numbers<[1], [0], [0], [1], [0, 0, 1, 1], [], []>} : vector<1x16xf32>, vector<16x128xf32>, vector<1x128xf32> -> vector<1x128xf32>
    %85 = arith.addf %83, %84 : vector<1x128xf32>
    %86 = vector.extract_strided_slice %45 {offsets = [1, 0], sizes = [1, 128], strides = [1, 1]} : vector<8x128xf32> to vector<1x128xf32>
    %87 = arith.addf %85, %86 : vector<1x128xf32>
    %88 = arith.negf %87 : vector<1x128xf32>
    %89 = math.exp %88 : vector<1x128xf32>
    %cst_66 = arith.constant 1.000000e+00 : f32
    %90 = vector.broadcast %cst_66 : f32 to vector<1x128xf32>
    %91 = arith.addf %90, %89 : vector<1x128xf32>
    %92 = arith.divf %90, %91 : vector<1x128xf32>
    %93 = math.tanh %87 : vector<1x128xf32>
    %94 = vector.extract_strided_slice %92 {offsets = [0, 16], sizes = [1, 16], strides = [1, 1]} : vector<1x128xf32> to vector<1x16xf32>
    %95 = arith.mulf %94, %68 : vector<1x16xf32>
    %96 = vector.extract_strided_slice %92 {offsets = [0, 0], sizes = [1, 16], strides = [1, 1]} : vector<1x128xf32> to vector<1x16xf32>
    %97 = vector.extract_strided_slice %93 {offsets = [0, 32], sizes = [1, 16], strides = [1, 1]} : vector<1x128xf32> to vector<1x16xf32>
    %98 = arith.mulf %96, %97 : vector<1x16xf32>
    %99 = arith.addf %95, %98 : vector<1x16xf32>
    %100 = vector.extract_strided_slice %92 {offsets = [0, 48], sizes = [1, 16], strides = [1, 1]} : vector<1x128xf32> to vector<1x16xf32>
    %101 = math.tanh %99 : vector<1x16xf32>
    %102 = arith.mulf %100, %101 : vector<1x16xf32>
    %103 = vector.extract_strided_slice %92 {offsets = [0, 80], sizes = [1, 16], strides = [1, 1]} : vector<1x128xf32> to vector<1x16xf32>
    %104 = arith.mulf %103, %77 : vector<1x16xf32>
    %105 = vector.extract_strided_slice %92 {offsets = [0, 64], sizes = [1, 16], strides = [1, 1]} : vector<1x128xf32> to vector<1x16xf32>
    %106 = vector.extract_strided_slice %93 {offsets = [0, 96], sizes = [1, 16], strides = [1, 1]} : vector<1x128xf32> to vector<1x16xf32>
    %107 = arith.mulf %105, %106 : vector<1x16xf32>
    %108 = arith.addf %104, %107 : vector<1x16xf32>
    %109 = vector.extract_strided_slice %92 {offsets = [0, 112], sizes = [1, 16], strides = [1, 1]} : vector<1x128xf32> to vector<1x16xf32>
    %110 = math.tanh %108 : vector<1x16xf32>
    %111 = arith.mulf %109, %110 : vector<1x16xf32>
    %c1_67 = arith.constant 1 : index
    %c0_68 = arith.constant 0 : index
    %112 = vector.load %arg16[%c1_67, %c0_68] : memref<8x32xf32, #tpu.memory_space<vmem>>, vector<1x16xf32>
    tpu.vector_store %arg16[%c1_67, %c0_68], %102 {strides = array<i32>} : memref<8x32xf32, #tpu.memory_space<vmem>>, vector<1x16xf32>,
    %c6_69 = arith.constant 6 : index
    %c16_70 = arith.constant 16 : index
    %113 = vector.load %arg16[%c6_69, %c16_70] : memref<8x32xf32, #tpu.memory_space<vmem>>, vector<1x16xf32>
    tpu.vector_store %arg16[%c6_69, %c16_70], %111 {strides = array<i32>} : memref<8x32xf32, #tpu.memory_space<vmem>>, vector<1x16xf32>,
    %cst_71 = arith.constant dense<0.000000e+00> : vector<1x128xf32>
    %114 = tpu.matmul %102, %46, %cst_71 {dimension_numbers = #tpu.dot_dimension_numbers<[1], [0], [0], [1], [0, 0, 1, 1], [], []>} : vector<1x16xf32>, vector<16x128xf32>, vector<1x128xf32> -> vector<1x128xf32>
    %cst_72 = arith.constant dense<0.000000e+00> : vector<1x128xf32>
    %115 = tpu.matmul %111, %47, %cst_72 {dimension_numbers = #tpu.dot_dimension_numbers<[1], [0], [0], [1], [0, 0, 1, 1], [], []>} : vector<1x16xf32>, vector<16x128xf32>, vector<1x128xf32> -> vector<1x128xf32>
    %116 = arith.addf %114, %115 : vector<1x128xf32>
    %117 = vector.extract_strided_slice %45 {offsets = [2, 0], sizes = [1, 128], strides = [1, 1]} : vector<8x128xf32> to vector<1x128xf32>
    %118 = arith.addf %116, %117 : vector<1x128xf32>
    %119 = arith.negf %118 : vector<1x128xf32>
    %120 = math.exp %119 : vector<1x128xf32>
    %cst_73 = arith.constant 1.000000e+00 : f32
    %121 = vector.broadcast %cst_73 : f32 to vector<1x128xf32>
    %122 = arith.addf %121, %120 : vector<1x128xf32>
    %123 = arith.divf %121, %122 : vector<1x128xf32>
    %124 = math.tanh %118 : vector<1x128xf32>
    %125 = vector.extract_strided_slice %123 {offsets = [0, 16], sizes = [1, 16], strides = [1, 1]} : vector<1x128xf32> to vector<1x16xf32>
    %126 = arith.mulf %125, %99 : vector<1x16xf32>
    %127 = vector.extract_strided_slice %123 {offsets = [0, 0], sizes = [1, 16], strides = [1, 1]} : vector<1x128xf32> to vector<1x16xf32>
    %128 = vector.extract_strided_slice %124 {offsets = [0, 32], sizes = [1, 16], strides = [1, 1]} : vector<1x128xf32> to vector<1x16xf32>
    %129 = arith.mulf %127, %128 : vector<1x16xf32>
    %130 = arith.addf %126, %129 : vector<1x16xf32>
    %131 = vector.extract_strided_slice %123 {offsets = [0, 48], sizes = [1, 16], strides = [1, 1]} : vector<1x128xf32> to vector<1x16xf32>
    %132 = math.tanh %130 : vector<1x16xf32>
    %133 = arith.mulf %131, %132 : vector<1x16xf32>
    %134 = vector.extract_strided_slice %123 {offsets = [0, 80], sizes = [1, 16], strides = [1, 1]} : vector<1x128xf32> to vector<1x16xf32>
    %135 = arith.mulf %134, %108 : vector<1x16xf32>
    %136 = vector.extract_strided_slice %123 {offsets = [0, 64], sizes = [1, 16], strides = [1, 1]} : vector<1x128xf32> to vector<1x16xf32>
    %137 = vector.extract_strided_slice %124 {offsets = [0, 96], sizes = [1, 16], strides = [1, 1]} : vector<1x128xf32> to vector<1x16xf32>
    %138 = arith.mulf %136, %137 : vector<1x16xf32>
    %139 = arith.addf %135, %138 : vector<1x16xf32>
    %140 = vector.extract_strided_slice %123 {offsets = [0, 112], sizes = [1, 16], strides = [1, 1]} : vector<1x128xf32> to vector<1x16xf32>
    %141 = math.tanh %139 : vector<1x16xf32>
    %142 = arith.mulf %140, %141 : vector<1x16xf32>
    %c2_74 = arith.constant 2 : index
    %c0_75 = arith.constant 0 : index
    %143 = vector.load %arg16[%c2_74, %c0_75] : memref<8x32xf32, #tpu.memory_space<vmem>>, vector<1x16xf32>
    tpu.vector_store %arg16[%c2_74, %c0_75], %133 {strides = array<i32>} : memref<8x32xf32, #tpu.memory_space<vmem>>, vector<1x16xf32>,
    %c5_76 = arith.constant 5 : index
    %c16_77 = arith.constant 16 : index
    %144 = vector.load %arg16[%c5_76, %c16_77] : memref<8x32xf32, #tpu.memory_space<vmem>>, vector<1x16xf32>
    tpu.vector_store %arg16[%c5_76, %c16_77], %142 {strides = array<i32>} : memref<8x32xf32, #tpu.memory_space<vmem>>, vector<1x16xf32>,
    %cst_78 = arith.constant dense<0.000000e+00> : vector<1x128xf32>
    %145 = tpu.matmul %133, %46, %cst_78 {dimension_numbers = #tpu.dot_dimension_numbers<[1], [0], [0], [1], [0, 0, 1, 1], [], []>} : vector<1x16xf32>, vector<16x128xf32>, vector<1x128xf32> -> vector<1x128xf32>
    %cst_79 = arith.constant dense<0.000000e+00> : vector<1x128xf32>
    %146 = tpu.matmul %142, %47, %cst_79 {dimension_numbers = #tpu.dot_dimension_numbers<[1], [0], [0], [1], [0, 0, 1, 1], [], []>} : vector<1x16xf32>, vector<16x128xf32>, vector<1x128xf32> -> vector<1x128xf32>
    %147 = arith.addf %145, %146 : vector<1x128xf32>
    %148 = vector.extract_strided_slice %45 {offsets = [3, 0], sizes = [1, 128], strides = [1, 1]} : vector<8x128xf32> to vector<1x128xf32>
    %149 = arith.addf %147, %148 : vector<1x128xf32>
    %150 = arith.negf %149 : vector<1x128xf32>
    %151 = math.exp %150 : vector<1x128xf32>
    %cst_80 = arith.constant 1.000000e+00 : f32
    %152 = vector.broadcast %cst_80 : f32 to vector<1x128xf32>
    %153 = arith.addf %152, %151 : vector<1x128xf32>
    %154 = arith.divf %152, %153 : vector<1x128xf32>
    %155 = math.tanh %149 : vector<1x128xf32>
    %156 = vector.extract_strided_slice %154 {offsets = [0, 16], sizes = [1, 16], strides = [1, 1]} : vector<1x128xf32> to vector<1x16xf32>
    %157 = arith.mulf %156, %130 : vector<1x16xf32>
    %158 = vector.extract_strided_slice %154 {offsets = [0, 0], sizes = [1, 16], strides = [1, 1]} : vector<1x128xf32> to vector<1x16xf32>
    %159 = vector.extract_strided_slice %155 {offsets = [0, 32], sizes = [1, 16], strides = [1, 1]} : vector<1x128xf32> to vector<1x16xf32>
    %160 = arith.mulf %158, %159 : vector<1x16xf32>
    %161 = arith.addf %157, %160 : vector<1x16xf32>
    %162 = vector.extract_strided_slice %154 {offsets = [0, 48], sizes = [1, 16], strides = [1, 1]} : vector<1x128xf32> to vector<1x16xf32>
    %163 = math.tanh %161 : vector<1x16xf32>
    %164 = arith.mulf %162, %163 : vector<1x16xf32>
    %165 = vector.extract_strided_slice %154 {offsets = [0, 80], sizes = [1, 16], strides = [1, 1]} : vector<1x128xf32> to vector<1x16xf32>
    %166 = arith.mulf %165, %139 : vector<1x16xf32>
    %167 = vector.extract_strided_slice %154 {offsets = [0, 64], sizes = [1, 16], strides = [1, 1]} : vector<1x128xf32> to vector<1x16xf32>
    %168 = vector.extract_strided_slice %155 {offsets = [0, 96], sizes = [1, 16], strides = [1, 1]} : vector<1x128xf32> to vector<1x16xf32>
    %169 = arith.mulf %167, %168 : vector<1x16xf32>
    %170 = arith.addf %166, %169 : vector<1x16xf32>
    %171 = vector.extract_strided_slice %154 {offsets = [0, 112], sizes = [1, 16], strides = [1, 1]} : vector<1x128xf32> to vector<1x16xf32>
    %172 = math.tanh %170 : vector<1x16xf32>
    %173 = arith.mulf %171, %172 : vector<1x16xf32>
    %c3_81 = arith.constant 3 : index
    %c0_82 = arith.constant 0 : index
    %174 = vector.load %arg16[%c3_81, %c0_82] : memref<8x32xf32, #tpu.memory_space<vmem>>, vector<1x16xf32>
    tpu.vector_store %arg16[%c3_81, %c0_82], %164 {strides = array<i32>} : memref<8x32xf32, #tpu.memory_space<vmem>>, vector<1x16xf32>,
    %c4_83 = arith.constant 4 : index
    %c16_84 = arith.constant 16 : index
    %175 = vector.load %arg16[%c4_83, %c16_84] : memref<8x32xf32, #tpu.memory_space<vmem>>, vector<1x16xf32>
    tpu.vector_store %arg16[%c4_83, %c16_84], %173 {strides = array<i32>} : memref<8x32xf32, #tpu.memory_space<vmem>>, vector<1x16xf32>,
    %cst_85 = arith.constant dense<0.000000e+00> : vector<1x128xf32>
    %176 = tpu.matmul %164, %46, %cst_85 {dimension_numbers = #tpu.dot_dimension_numbers<[1], [0], [0], [1], [0, 0, 1, 1], [], []>} : vector<1x16xf32>, vector<16x128xf32>, vector<1x128xf32> -> vector<1x128xf32>
    %cst_86 = arith.constant dense<0.000000e+00> : vector<1x128xf32>
    %177 = tpu.matmul %173, %47, %cst_86 {dimension_numbers = #tpu.dot_dimension_numbers<[1], [0], [0], [1], [0, 0, 1, 1], [], []>} : vector<1x16xf32>, vector<16x128xf32>, vector<1x128xf32> -> vector<1x128xf32>
    %178 = arith.addf %176, %177 : vector<1x128xf32>
    %179 = vector.extract_strided_slice %45 {offsets = [4, 0], sizes = [1, 128], strides = [1, 1]} : vector<8x128xf32> to vector<1x128xf32>
    %180 = arith.addf %178, %179 : vector<1x128xf32>
    %181 = arith.negf %180 : vector<1x128xf32>
    %182 = math.exp %181 : vector<1x128xf32>
    %cst_87 = arith.constant 1.000000e+00 : f32
    %183 = vector.broadcast %cst_87 : f32 to vector<1x128xf32>
    %184 = arith.addf %183, %182 : vector<1x128xf32>
    %185 = arith.divf %183, %184 : vector<1x128xf32>
    %186 = math.tanh %180 : vector<1x128xf32>
    %187 = vector.extract_strided_slice %185 {offsets = [0, 16], sizes = [1, 16], strides = [1, 1]} : vector<1x128xf32> to vector<1x16xf32>
    %188 = arith.mulf %187, %161 : vector<1x16xf32>
    %189 = vector.extract_strided_slice %185 {offsets = [0, 0], sizes = [1, 16], strides = [1, 1]} : vector<1x128xf32> to vector<1x16xf32>
    %190 = vector.extract_strided_slice %186 {offsets = [0, 32], sizes = [1, 16], strides = [1, 1]} : vector<1x128xf32> to vector<1x16xf32>
    %191 = arith.mulf %189, %190 : vector<1x16xf32>
    %192 = arith.addf %188, %191 : vector<1x16xf32>
    %193 = vector.extract_strided_slice %185 {offsets = [0, 48], sizes = [1, 16], strides = [1, 1]} : vector<1x128xf32> to vector<1x16xf32>
    %194 = math.tanh %192 : vector<1x16xf32>
    %195 = arith.mulf %193, %194 : vector<1x16xf32>
    %196 = vector.extract_strided_slice %185 {offsets = [0, 80], sizes = [1, 16], strides = [1, 1]} : vector<1x128xf32> to vector<1x16xf32>
    %197 = arith.mulf %196, %170 : vector<1x16xf32>
    %198 = vector.extract_strided_slice %185 {offsets = [0, 64], sizes = [1, 16], strides = [1, 1]} : vector<1x128xf32> to vector<1x16xf32>
    %199 = vector.extract_strided_slice %186 {offsets = [0, 96], sizes = [1, 16], strides = [1, 1]} : vector<1x128xf32> to vector<1x16xf32>
    %200 = arith.mulf %198, %199 : vector<1x16xf32>
    %201 = arith.addf %197, %200 : vector<1x16xf32>
    %202 = vector.extract_strided_slice %185 {offsets = [0, 112], sizes = [1, 16], strides = [1, 1]} : vector<1x128xf32> to vector<1x16xf32>
    %203 = math.tanh %201 : vector<1x16xf32>
    %204 = arith.mulf %202, %203 : vector<1x16xf32>
    %c4_88 = arith.constant 4 : index
    %c0_89 = arith.constant 0 : index
    %205 = vector.load %arg16[%c4_88, %c0_89] : memref<8x32xf32, #tpu.memory_space<vmem>>, vector<1x16xf32>
    tpu.vector_store %arg16[%c4_88, %c0_89], %195 {strides = array<i32>} : memref<8x32xf32, #tpu.memory_space<vmem>>, vector<1x16xf32>,
    %c3_90 = arith.constant 3 : index
    %c16_91 = arith.constant 16 : index
    %206 = vector.load %arg16[%c3_90, %c16_91] : memref<8x32xf32, #tpu.memory_space<vmem>>, vector<1x16xf32>
    tpu.vector_store %arg16[%c3_90, %c16_91], %204 {strides = array<i32>} : memref<8x32xf32, #tpu.memory_space<vmem>>, vector<1x16xf32>,
    %cst_92 = arith.constant dense<0.000000e+00> : vector<1x128xf32>
    %207 = tpu.matmul %195, %46, %cst_92 {dimension_numbers = #tpu.dot_dimension_numbers<[1], [0], [0], [1], [0, 0, 1, 1], [], []>} : vector<1x16xf32>, vector<16x128xf32>, vector<1x128xf32> -> vector<1x128xf32>
    %cst_93 = arith.constant dense<0.000000e+00> : vector<1x128xf32>
    %208 = tpu.matmul %204, %47, %cst_93 {dimension_numbers = #tpu.dot_dimension_numbers<[1], [0], [0], [1], [0, 0, 1, 1], [], []>} : vector<1x16xf32>, vector<16x128xf32>, vector<1x128xf32> -> vector<1x128xf32>
    %209 = arith.addf %207, %208 : vector<1x128xf32>
    %210 = vector.extract_strided_slice %45 {offsets = [5, 0], sizes = [1, 128], strides = [1, 1]} : vector<8x128xf32> to vector<1x128xf32>
    %211 = arith.addf %209, %210 : vector<1x128xf32>
    %212 = arith.negf %211 : vector<1x128xf32>
    %213 = math.exp %212 : vector<1x128xf32>
    %cst_94 = arith.constant 1.000000e+00 : f32
    %214 = vector.broadcast %cst_94 : f32 to vector<1x128xf32>
    %215 = arith.addf %214, %213 : vector<1x128xf32>
    %216 = arith.divf %214, %215 : vector<1x128xf32>
    %217 = math.tanh %211 : vector<1x128xf32>
    %218 = vector.extract_strided_slice %216 {offsets = [0, 16], sizes = [1, 16], strides = [1, 1]} : vector<1x128xf32> to vector<1x16xf32>
    %219 = arith.mulf %218, %192 : vector<1x16xf32>
    %220 = vector.extract_strided_slice %216 {offsets = [0, 0], sizes = [1, 16], strides = [1, 1]} : vector<1x128xf32> to vector<1x16xf32>
    %221 = vector.extract_strided_slice %217 {offsets = [0, 32], sizes = [1, 16], strides = [1, 1]} : vector<1x128xf32> to vector<1x16xf32>
    %222 = arith.mulf %220, %221 : vector<1x16xf32>
    %223 = arith.addf %219, %222 : vector<1x16xf32>
    %224 = vector.extract_strided_slice %216 {offsets = [0, 48], sizes = [1, 16], strides = [1, 1]} : vector<1x128xf32> to vector<1x16xf32>
    %225 = math.tanh %223 : vector<1x16xf32>
    %226 = arith.mulf %224, %225 : vector<1x16xf32>
    %227 = vector.extract_strided_slice %216 {offsets = [0, 80], sizes = [1, 16], strides = [1, 1]} : vector<1x128xf32> to vector<1x16xf32>
    %228 = arith.mulf %227, %201 : vector<1x16xf32>
    %229 = vector.extract_strided_slice %216 {offsets = [0, 64], sizes = [1, 16], strides = [1, 1]} : vector<1x128xf32> to vector<1x16xf32>
    %230 = vector.extract_strided_slice %217 {offsets = [0, 96], sizes = [1, 16], strides = [1, 1]} : vector<1x128xf32> to vector<1x16xf32>
    %231 = arith.mulf %229, %230 : vector<1x16xf32>
    %232 = arith.addf %228, %231 : vector<1x16xf32>
    %233 = vector.extract_strided_slice %216 {offsets = [0, 112], sizes = [1, 16], strides = [1, 1]} : vector<1x128xf32> to vector<1x16xf32>
    %234 = math.tanh %232 : vector<1x16xf32>
    %235 = arith.mulf %233, %234 : vector<1x16xf32>
    %c5_95 = arith.constant 5 : index
    %c0_96 = arith.constant 0 : index
    %236 = vector.load %arg16[%c5_95, %c0_96] : memref<8x32xf32, #tpu.memory_space<vmem>>, vector<1x16xf32>
    tpu.vector_store %arg16[%c5_95, %c0_96], %226 {strides = array<i32>} : memref<8x32xf32, #tpu.memory_space<vmem>>, vector<1x16xf32>,
    %c2_97 = arith.constant 2 : index
    %c16_98 = arith.constant 16 : index
    %237 = vector.load %arg16[%c2_97, %c16_98] : memref<8x32xf32, #tpu.memory_space<vmem>>, vector<1x16xf32>
    tpu.vector_store %arg16[%c2_97, %c16_98], %235 {strides = array<i32>} : memref<8x32xf32, #tpu.memory_space<vmem>>, vector<1x16xf32>,
    %cst_99 = arith.constant dense<0.000000e+00> : vector<1x128xf32>
    %238 = tpu.matmul %226, %46, %cst_99 {dimension_numbers = #tpu.dot_dimension_numbers<[1], [0], [0], [1], [0, 0, 1, 1], [], []>} : vector<1x16xf32>, vector<16x128xf32>, vector<1x128xf32> -> vector<1x128xf32>
    %cst_100 = arith.constant dense<0.000000e+00> : vector<1x128xf32>
    %239 = tpu.matmul %235, %47, %cst_100 {dimension_numbers = #tpu.dot_dimension_numbers<[1], [0], [0], [1], [0, 0, 1, 1], [], []>} : vector<1x16xf32>, vector<16x128xf32>, vector<1x128xf32> -> vector<1x128xf32>
    %240 = arith.addf %238, %239 : vector<1x128xf32>
    %241 = vector.extract_strided_slice %45 {offsets = [6, 0], sizes = [1, 128], strides = [1, 1]} : vector<8x128xf32> to vector<1x128xf32>
    %242 = arith.addf %240, %241 : vector<1x128xf32>
    %243 = arith.negf %242 : vector<1x128xf32>
    %244 = math.exp %243 : vector<1x128xf32>
    %cst_101 = arith.constant 1.000000e+00 : f32
    %245 = vector.broadcast %cst_101 : f32 to vector<1x128xf32>
    %246 = arith.addf %245, %244 : vector<1x128xf32>
    %247 = arith.divf %245, %246 : vector<1x128xf32>
    %248 = math.tanh %242 : vector<1x128xf32>
    %249 = vector.extract_strided_slice %247 {offsets = [0, 16], sizes = [1, 16], strides = [1, 1]} : vector<1x128xf32> to vector<1x16xf32>
    %250 = arith.mulf %249, %223 : vector<1x16xf32>
    %251 = vector.extract_strided_slice %247 {offsets = [0, 0], sizes = [1, 16], strides = [1, 1]} : vector<1x128xf32> to vector<1x16xf32>
    %252 = vector.extract_strided_slice %248 {offsets = [0, 32], sizes = [1, 16], strides = [1, 1]} : vector<1x128xf32> to vector<1x16xf32>
    %253 = arith.mulf %251, %252 : vector<1x16xf32>
    %254 = arith.addf %250, %253 : vector<1x16xf32>
    %255 = vector.extract_strided_slice %247 {offsets = [0, 48], sizes = [1, 16], strides = [1, 1]} : vector<1x128xf32> to vector<1x16xf32>
    %256 = math.tanh %254 : vector<1x16xf32>
    %257 = arith.mulf %255, %256 : vector<1x16xf32>
    %258 = vector.extract_strided_slice %247 {offsets = [0, 80], sizes = [1, 16], strides = [1, 1]} : vector<1x128xf32> to vector<1x16xf32>
    %259 = arith.mulf %258, %232 : vector<1x16xf32>
    %260 = vector.extract_strided_slice %247 {offsets = [0, 64], sizes = [1, 16], strides = [1, 1]} : vector<1x128xf32> to vector<1x16xf32>
    %261 = vector.extract_strided_slice %248 {offsets = [0, 96], sizes = [1, 16], strides = [1, 1]} : vector<1x128xf32> to vector<1x16xf32>
    %262 = arith.mulf %260, %261 : vector<1x16xf32>
    %263 = arith.addf %259, %262 : vector<1x16xf32>
    %264 = vector.extract_strided_slice %247 {offsets = [0, 112], sizes = [1, 16], strides = [1, 1]} : vector<1x128xf32> to vector<1x16xf32>
    %265 = math.tanh %263 : vector<1x16xf32>
    %266 = arith.mulf %264, %265 : vector<1x16xf32>
    %c6_102 = arith.constant 6 : index
    %c0_103 = arith.constant 0 : index
    %267 = vector.load %arg16[%c6_102, %c0_103] : memref<8x32xf32, #tpu.memory_space<vmem>>, vector<1x16xf32>
    tpu.vector_store %arg16[%c6_102, %c0_103], %257 {strides = array<i32>} : memref<8x32xf32, #tpu.memory_space<vmem>>, vector<1x16xf32>,
    %c1_104 = arith.constant 1 : index
    %c16_105 = arith.constant 16 : index
    %268 = vector.load %arg16[%c1_104, %c16_105] : memref<8x32xf32, #tpu.memory_space<vmem>>, vector<1x16xf32>
    tpu.vector_store %arg16[%c1_104, %c16_105], %266 {strides = array<i32>} : memref<8x32xf32, #tpu.memory_space<vmem>>, vector<1x16xf32>,
    %cst_106 = arith.constant dense<0.000000e+00> : vector<1x128xf32>
    %269 = tpu.matmul %257, %46, %cst_106 {dimension_numbers = #tpu.dot_dimension_numbers<[1], [0], [0], [1], [0, 0, 1, 1], [], []>} : vector<1x16xf32>, vector<16x128xf32>, vector<1x128xf32> -> vector<1x128xf32>
    %cst_107 = arith.constant dense<0.000000e+00> : vector<1x128xf32>
    %270 = tpu.matmul %266, %47, %cst_107 {dimension_numbers = #tpu.dot_dimension_numbers<[1], [0], [0], [1], [0, 0, 1, 1], [], []>} : vector<1x16xf32>, vector<16x128xf32>, vector<1x128xf32> -> vector<1x128xf32>
    %271 = arith.addf %269, %270 : vector<1x128xf32>
    %272 = vector.extract_strided_slice %45 {offsets = [7, 0], sizes = [1, 128], strides = [1, 1]} : vector<8x128xf32> to vector<1x128xf32>
    %273 = arith.addf %271, %272 : vector<1x128xf32>
    %274 = arith.negf %273 : vector<1x128xf32>
    %275 = math.exp %274 : vector<1x128xf32>
    %cst_108 = arith.constant 1.000000e+00 : f32
    %276 = vector.broadcast %cst_108 : f32 to vector<1x128xf32>
    %277 = arith.addf %276, %275 : vector<1x128xf32>
    %278 = arith.divf %276, %277 : vector<1x128xf32>
    %279 = math.tanh %273 : vector<1x128xf32>
    %280 = vector.extract_strided_slice %278 {offsets = [0, 16], sizes = [1, 16], strides = [1, 1]} : vector<1x128xf32> to vector<1x16xf32>
    %281 = arith.mulf %280, %254 : vector<1x16xf32>
    %282 = vector.extract_strided_slice %278 {offsets = [0, 0], sizes = [1, 16], strides = [1, 1]} : vector<1x128xf32> to vector<1x16xf32>
    %283 = vector.extract_strided_slice %279 {offsets = [0, 32], sizes = [1, 16], strides = [1, 1]} : vector<1x128xf32> to vector<1x16xf32>
    %284 = arith.mulf %282, %283 : vector<1x16xf32>
    %285 = arith.addf %281, %284 : vector<1x16xf32>
    %286 = vector.extract_strided_slice %278 {offsets = [0, 48], sizes = [1, 16], strides = [1, 1]} : vector<1x128xf32> to vector<1x16xf32>
    %287 = math.tanh %285 : vector<1x16xf32>
    %288 = arith.mulf %286, %287 : vector<1x16xf32>
    %289 = vector.extract_strided_slice %278 {offsets = [0, 80], sizes = [1, 16], strides = [1, 1]} : vector<1x128xf32> to vector<1x16xf32>
    %290 = arith.mulf %289, %263 : vector<1x16xf32>
    %291 = vector.extract_strided_slice %278 {offsets = [0, 64], sizes = [1, 16], strides = [1, 1]} : vector<1x128xf32> to vector<1x16xf32>
    %292 = vector.extract_strided_slice %279 {offsets = [0, 96], sizes = [1, 16], strides = [1, 1]} : vector<1x128xf32> to vector<1x16xf32>
    %293 = arith.mulf %291, %292 : vector<1x16xf32>
    %294 = arith.addf %290, %293 : vector<1x16xf32>
    %295 = vector.extract_strided_slice %278 {offsets = [0, 112], sizes = [1, 16], strides = [1, 1]} : vector<1x128xf32> to vector<1x16xf32>
    %296 = math.tanh %294 : vector<1x16xf32>
    %297 = arith.mulf %295, %296 : vector<1x16xf32>
    %c7_109 = arith.constant 7 : index
    %c0_110 = arith.constant 0 : index
    %298 = vector.load %arg16[%c7_109, %c0_110] : memref<8x32xf32, #tpu.memory_space<vmem>>, vector<1x16xf32>
    tpu.vector_store %arg16[%c7_109, %c0_110], %288 {strides = array<i32>} : memref<8x32xf32, #tpu.memory_space<vmem>>, vector<1x16xf32>,
    %c0_111 = arith.constant 0 : index
    %c16_112 = arith.constant 16 : index
    %299 = vector.load %arg16[%c0_111, %c16_112] : memref<8x32xf32, #tpu.memory_space<vmem>>, vector<1x16xf32>
    tpu.vector_store %arg16[%c0_111, %c16_112], %297 {strides = array<i32>} : memref<8x32xf32, #tpu.memory_space<vmem>>, vector<1x16xf32>,
    %c0_113 = arith.constant 0 : index
    %c0_114 = arith.constant 0 : index
    %300 = vector.load %arg16[%c0_113, %c0_114] : memref<8x32xf32, #tpu.memory_space<vmem>>, vector<8x32xf32>
    %c0_115 = arith.constant 0 : index
    %c0_116 = arith.constant 0 : index
    %301 = vector.load %arg10[%c0_115, %c0_116] : memref<32x5xf32, #tpu.memory_space<vmem>>, vector<32x5xf32>
    %cst_117 = arith.constant dense<0.000000e+00> : vector<8x5xf32>
    %302 = tpu.matmul %300, %301, %cst_117 {dimension_numbers = #tpu.dot_dimension_numbers<[1], [0], [0], [1], [0, 0, 1, 1], [], []>} : vector<8x32xf32>, vector<32x5xf32>, vector<8x5xf32> -> vector<8x5xf32>
    %c0_118 = arith.constant 0 : index
    %c0_119 = arith.constant 0 : index
    %303 = vector.load %arg11[%c0_118, %c0_119] : memref<1x5xf32, #tpu.memory_space<vmem>>, vector<1x5xf32>
    %304 = vector.broadcast %303 : vector<1x5xf32> to vector<8x5xf32>
    %305 = arith.addf %302, %304 : vector<8x5xf32>
    %306 = tpu.iota {dimensions = array<i32: 1>} : vector<1x5xi32>
    %307 = tpu.iota {dimensions = array<i32: 1>} : vector<5x5xi32>
    %c0_120 = arith.constant 0 : index
    %c0_121 = arith.constant 0 : index
    %308 = vector.load %arg12[%c0_120, %c0_121] : memref<5x5xf32, #tpu.memory_space<vmem>>, vector<5x5xf32>
    %c3_i32 = arith.constant 3 : i32
    %309 = vector.broadcast %c3_i32 : i32 to vector<1x5xi32>
    %310 = arith.cmpi eq, %306, %309 : vector<1x5xi32>
    %cst_122 = arith.constant 0.000000e+00 : f32
    %cst_123 = arith.constant -1.000000e+04 : f32
    %311 = vector.broadcast %cst_122 : f32 to vector<1x5xf32>
    %312 = vector.broadcast %cst_123 : f32 to vector<1x5xf32>
    %313 = arith.select %310, %311, %312 : vector<1x5xi1>, vector<1x5xf32>
    %314 = vector.broadcast %313 : vector<1x5xf32> to vector<5x5xf32>
    %315 = arith.addf %314, %308 : vector<5x5xf32>
    %cst_124 = arith.constant dense<0xFF800000> : vector<5xf32>
    %316 = vector.multi_reduction <maximumf>, %315, %cst_124 [1] : vector<5x5xf32> to vector<5xf32>
    %317 = vector.shape_cast %316 : vector<5xf32> to vector<1x5xf32>
    %318 = vector.extract_strided_slice %305 {offsets = [0, 0], sizes = [1, 5], strides = [1, 1]} : vector<8x5xf32> to vector<1x5xf32>
    %319 = arith.addf %317, %318 : vector<1x5xf32>
    %320 = vector.broadcast %319 : vector<1x5xf32> to vector<5x5xf32>
    %321 = arith.addf %320, %308 : vector<5x5xf32>
    %cst_125 = arith.constant dense<0xFF800000> : vector<5xf32>
    %322 = vector.multi_reduction <maximumf>, %321, %cst_125 [1] : vector<5x5xf32> to vector<5xf32>
    %323 = vector.shape_cast %322 : vector<5xf32> to vector<5x1xf32>
    %324 = vector.broadcast %323 : vector<5x1xf32> to vector<5x5xf32>
    %325 = arith.cmpf oge, %321, %324 : vector<5x5xf32>
    %c5_i32 = arith.constant 5 : i32
    %326 = vector.broadcast %c5_i32 : i32 to vector<5x5xi32>
    %327 = arith.select %325, %307, %326 : vector<5x5xi1>, vector<5x5xi32>
    %cst_126 = arith.constant dense<2147483647> : vector<5xi32>
    %328 = vector.multi_reduction <minsi>, %327, %cst_126 [1] : vector<5x5xi32> to vector<5xi32>
    %329 = vector.shape_cast %328 : vector<5xi32> to vector<1x5xi32>
    %cst_127 = arith.constant dense<0xFF800000> : vector<5xf32>
    %330 = vector.multi_reduction <maximumf>, %321, %cst_127 [1] : vector<5x5xf32> to vector<5xf32>
    %331 = vector.shape_cast %330 : vector<5xf32> to vector<1x5xf32>
    %332 = vector.extract_strided_slice %305 {offsets = [1, 0], sizes = [1, 5], strides = [1, 1]} : vector<8x5xf32> to vector<1x5xf32>
    %333 = arith.addf %331, %332 : vector<1x5xf32>
    %334 = vector.broadcast %333 : vector<1x5xf32> to vector<5x5xf32>
    %335 = arith.addf %334, %308 : vector<5x5xf32>
    %cst_128 = arith.constant dense<0xFF800000> : vector<5xf32>
    %336 = vector.multi_reduction <maximumf>, %335, %cst_128 [1] : vector<5x5xf32> to vector<5xf32>
    %337 = vector.shape_cast %336 : vector<5xf32> to vector<5x1xf32>
    %338 = vector.broadcast %337 : vector<5x1xf32> to vector<5x5xf32>
    %339 = arith.cmpf oge, %335, %338 : vector<5x5xf32>
    %c5_i32_129 = arith.constant 5 : i32
    %340 = vector.broadcast %c5_i32_129 : i32 to vector<5x5xi32>
    %341 = arith.select %339, %307, %340 : vector<5x5xi1>, vector<5x5xi32>
    %cst_130 = arith.constant dense<2147483647> : vector<5xi32>
    %342 = vector.multi_reduction <minsi>, %341, %cst_130 [1] : vector<5x5xi32> to vector<5xi32>
    %343 = vector.shape_cast %342 : vector<5xi32> to vector<1x5xi32>
    %cst_131 = arith.constant dense<0xFF800000> : vector<5xf32>
    %344 = vector.multi_reduction <maximumf>, %335, %cst_131 [1] : vector<5x5xf32> to vector<5xf32>
    %345 = vector.shape_cast %344 : vector<5xf32> to vector<1x5xf32>
    %346 = vector.extract_strided_slice %305 {offsets = [2, 0], sizes = [1, 5], strides = [1, 1]} : vector<8x5xf32> to vector<1x5xf32>
    %347 = arith.addf %345, %346 : vector<1x5xf32>
    %348 = vector.broadcast %347 : vector<1x5xf32> to vector<5x5xf32>
    %349 = arith.addf %348, %308 : vector<5x5xf32>
    %cst_132 = arith.constant dense<0xFF800000> : vector<5xf32>
    %350 = vector.multi_reduction <maximumf>, %349, %cst_132 [1] : vector<5x5xf32> to vector<5xf32>
    %351 = vector.shape_cast %350 : vector<5xf32> to vector<5x1xf32>
    %352 = vector.broadcast %351 : vector<5x1xf32> to vector<5x5xf32>
    %353 = arith.cmpf oge, %349, %352 : vector<5x5xf32>
    %c5_i32_133 = arith.constant 5 : i32
    %354 = vector.broadcast %c5_i32_133 : i32 to vector<5x5xi32>
    %355 = arith.select %353, %307, %354 : vector<5x5xi1>, vector<5x5xi32>
    %cst_134 = arith.constant dense<2147483647> : vector<5xi32>
    %356 = vector.multi_reduction <minsi>, %355, %cst_134 [1] : vector<5x5xi32> to vector<5xi32>
    %357 = vector.shape_cast %356 : vector<5xi32> to vector<1x5xi32>
    %cst_135 = arith.constant dense<0xFF800000> : vector<5xf32>
    %358 = vector.multi_reduction <maximumf>, %349, %cst_135 [1] : vector<5x5xf32> to vector<5xf32>
    %359 = vector.shape_cast %358 : vector<5xf32> to vector<1x5xf32>
    %360 = vector.extract_strided_slice %305 {offsets = [3, 0], sizes = [1, 5], strides = [1, 1]} : vector<8x5xf32> to vector<1x5xf32>
    %361 = arith.addf %359, %360 : vector<1x5xf32>
    %362 = vector.broadcast %361 : vector<1x5xf32> to vector<5x5xf32>
    %363 = arith.addf %362, %308 : vector<5x5xf32>
    %cst_136 = arith.constant dense<0xFF800000> : vector<5xf32>
    %364 = vector.multi_reduction <maximumf>, %363, %cst_136 [1] : vector<5x5xf32> to vector<5xf32>
    %365 = vector.shape_cast %364 : vector<5xf32> to vector<5x1xf32>
    %366 = vector.broadcast %365 : vector<5x1xf32> to vector<5x5xf32>
    %367 = arith.cmpf oge, %363, %366 : vector<5x5xf32>
    %c5_i32_137 = arith.constant 5 : i32
    %368 = vector.broadcast %c5_i32_137 : i32 to vector<5x5xi32>
    %369 = arith.select %367, %307, %368 : vector<5x5xi1>, vector<5x5xi32>
    %cst_138 = arith.constant dense<2147483647> : vector<5xi32>
    %370 = vector.multi_reduction <minsi>, %369, %cst_138 [1] : vector<5x5xi32> to vector<5xi32>
    %371 = vector.shape_cast %370 : vector<5xi32> to vector<1x5xi32>
    %cst_139 = arith.constant dense<0xFF800000> : vector<5xf32>
    %372 = vector.multi_reduction <maximumf>, %363, %cst_139 [1] : vector<5x5xf32> to vector<5xf32>
    %373 = vector.shape_cast %372 : vector<5xf32> to vector<1x5xf32>
    %374 = vector.extract_strided_slice %305 {offsets = [4, 0], sizes = [1, 5], strides = [1, 1]} : vector<8x5xf32> to vector<1x5xf32>
    %375 = arith.addf %373, %374 : vector<1x5xf32>
    %376 = vector.broadcast %375 : vector<1x5xf32> to vector<5x5xf32>
    %377 = arith.addf %376, %308 : vector<5x5xf32>
    %cst_140 = arith.constant dense<0xFF800000> : vector<5xf32>
    %378 = vector.multi_reduction <maximumf>, %377, %cst_140 [1] : vector<5x5xf32> to vector<5xf32>
    %379 = vector.shape_cast %378 : vector<5xf32> to vector<5x1xf32>
    %380 = vector.broadcast %379 : vector<5x1xf32> to vector<5x5xf32>
    %381 = arith.cmpf oge, %377, %380 : vector<5x5xf32>
    %c5_i32_141 = arith.constant 5 : i32
    %382 = vector.broadcast %c5_i32_141 : i32 to vector<5x5xi32>
    %383 = arith.select %381, %307, %382 : vector<5x5xi1>, vector<5x5xi32>
    %cst_142 = arith.constant dense<2147483647> : vector<5xi32>
    %384 = vector.multi_reduction <minsi>, %383, %cst_142 [1] : vector<5x5xi32> to vector<5xi32>
    %385 = vector.shape_cast %384 : vector<5xi32> to vector<1x5xi32>
    %cst_143 = arith.constant dense<0xFF800000> : vector<5xf32>
    %386 = vector.multi_reduction <maximumf>, %377, %cst_143 [1] : vector<5x5xf32> to vector<5xf32>
    %387 = vector.shape_cast %386 : vector<5xf32> to vector<1x5xf32>
    %388 = vector.extract_strided_slice %305 {offsets = [5, 0], sizes = [1, 5], strides = [1, 1]} : vector<8x5xf32> to vector<1x5xf32>
    %389 = arith.addf %387, %388 : vector<1x5xf32>
    %390 = vector.broadcast %389 : vector<1x5xf32> to vector<5x5xf32>
    %391 = arith.addf %390, %308 : vector<5x5xf32>
    %cst_144 = arith.constant dense<0xFF800000> : vector<5xf32>
    %392 = vector.multi_reduction <maximumf>, %391, %cst_144 [1] : vector<5x5xf32> to vector<5xf32>
    %393 = vector.shape_cast %392 : vector<5xf32> to vector<5x1xf32>
    %394 = vector.broadcast %393 : vector<5x1xf32> to vector<5x5xf32>
    %395 = arith.cmpf oge, %391, %394 : vector<5x5xf32>
    %c5_i32_145 = arith.constant 5 : i32
    %396 = vector.broadcast %c5_i32_145 : i32 to vector<5x5xi32>
    %397 = arith.select %395, %307, %396 : vector<5x5xi1>, vector<5x5xi32>
    %cst_146 = arith.constant dense<2147483647> : vector<5xi32>
    %398 = vector.multi_reduction <minsi>, %397, %cst_146 [1] : vector<5x5xi32> to vector<5xi32>
    %399 = vector.shape_cast %398 : vector<5xi32> to vector<1x5xi32>
    %cst_147 = arith.constant dense<0xFF800000> : vector<5xf32>
    %400 = vector.multi_reduction <maximumf>, %391, %cst_147 [1] : vector<5x5xf32> to vector<5xf32>
    %401 = vector.shape_cast %400 : vector<5xf32> to vector<1x5xf32>
    %402 = vector.extract_strided_slice %305 {offsets = [6, 0], sizes = [1, 5], strides = [1, 1]} : vector<8x5xf32> to vector<1x5xf32>
    %403 = arith.addf %401, %402 : vector<1x5xf32>
    %404 = vector.broadcast %403 : vector<1x5xf32> to vector<5x5xf32>
    %405 = arith.addf %404, %308 : vector<5x5xf32>
    %cst_148 = arith.constant dense<0xFF800000> : vector<5xf32>
    %406 = vector.multi_reduction <maximumf>, %405, %cst_148 [1] : vector<5x5xf32> to vector<5xf32>
    %407 = vector.shape_cast %406 : vector<5xf32> to vector<5x1xf32>
    %408 = vector.broadcast %407 : vector<5x1xf32> to vector<5x5xf32>
    %409 = arith.cmpf oge, %405, %408 : vector<5x5xf32>
    %c5_i32_149 = arith.constant 5 : i32
    %410 = vector.broadcast %c5_i32_149 : i32 to vector<5x5xi32>
    %411 = arith.select %409, %307, %410 : vector<5x5xi1>, vector<5x5xi32>
    %cst_150 = arith.constant dense<2147483647> : vector<5xi32>
    %412 = vector.multi_reduction <minsi>, %411, %cst_150 [1] : vector<5x5xi32> to vector<5xi32>
    %413 = vector.shape_cast %412 : vector<5xi32> to vector<1x5xi32>
    %cst_151 = arith.constant dense<0xFF800000> : vector<5xf32>
    %414 = vector.multi_reduction <maximumf>, %405, %cst_151 [1] : vector<5x5xf32> to vector<5xf32>
    %415 = vector.shape_cast %414 : vector<5xf32> to vector<1x5xf32>
    %416 = vector.extract_strided_slice %305 {offsets = [7, 0], sizes = [1, 5], strides = [1, 1]} : vector<8x5xf32> to vector<1x5xf32>
    %417 = arith.addf %415, %416 : vector<1x5xf32>
    %418 = vector.extract_strided_slice %308 {offsets = [4, 0], sizes = [1, 5], strides = [1, 1]} : vector<5x5xf32> to vector<1x5xf32>
    %419 = arith.addf %417, %418 : vector<1x5xf32>
    %cst_152 = arith.constant dense<0xFF800000> : vector<1xf32>
    %420 = vector.multi_reduction <maximumf>, %419, %cst_152 [1] : vector<1x5xf32> to vector<1xf32>
    %421 = vector.shape_cast %420 : vector<1xf32> to vector<1x1xf32>
    %422 = vector.broadcast %421 : vector<1x1xf32> to vector<1x5xf32>
    %423 = arith.cmpf oge, %419, %422 : vector<1x5xf32>
    %c5_i32_153 = arith.constant 5 : i32
    %424 = vector.broadcast %c5_i32_153 : i32 to vector<1x5xi32>
    %425 = arith.select %423, %306, %424 : vector<1x5xi1>, vector<1x5xi32>
    %cst_154 = arith.constant dense<2147483647> : vector<1xi32>
    %426 = vector.multi_reduction <minsi>, %425, %cst_154 [1] : vector<1x5xi32> to vector<1xi32>
    %427 = vector.shape_cast %426 : vector<1xi32> to vector<1x1xi32>
    %c0_155 = arith.constant 0 : index
    %c0_156 = arith.constant 0 : index
    %428 = vector.load %arg13[%c0_155, %c0_156] : memref<1x1xf32, #tpu.memory_space<vmem>>, vector<1x1xf32>
    tpu.vector_store %arg13[%c0_155, %c0_156], %421 {strides = array<i32>} : memref<1x1xf32, #tpu.memory_space<vmem>>, vector<1x1xf32>,
    %429 = tpu.iota {dimensions = array<i32: 1>} : vector<1x8xi32>
    %c0_i32 = arith.constant 0 : i32
    %430 = vector.broadcast %c0_i32 : i32 to vector<1x8xi32>
    %c7_i32 = arith.constant 7 : i32
    %431 = vector.broadcast %c7_i32 : i32 to vector<1x8xi32>
    %432 = arith.cmpi eq, %429, %431 : vector<1x8xi32>
    %433 = vector.shape_cast %427 : vector<1x1xi32> to vector<1x1xi32>
    %434 = vector.broadcast %433 : vector<1x1xi32> to vector<1x8xi32>
    %435 = arith.select %432, %434, %430 : vector<1x8xi1>, vector<1x8xi32>
    %436 = vector.broadcast %427 : vector<1x1xi32> to vector<1x5xi32>
    %437 = arith.cmpi eq, %306, %436 : vector<1x5xi32>
    %c0_i32_157 = arith.constant 0 : i32
    %438 = vector.broadcast %c0_i32_157 : i32 to vector<1x5xi32>
    %439 = arith.select %437, %413, %438 : vector<1x5xi1>, vector<1x5xi32>
    %cst_158 = arith.constant dense<0> : vector<1xi32>
    %440 = vector.multi_reduction <add>, %439, %cst_158 [1] : vector<1x5xi32> to vector<1xi32>
    %441 = vector.shape_cast %440 : vector<1xi32> to vector<1x1xi32>
    %c6_i32 = arith.constant 6 : i32
    %442 = vector.broadcast %c6_i32 : i32 to vector<1x8xi32>
    %443 = arith.cmpi eq, %429, %442 : vector<1x8xi32>
    %444 = vector.shape_cast %441 : vector<1x1xi32> to vector<1x1xi32>
    %445 = vector.broadcast %444 : vector<1x1xi32> to vector<1x8xi32>
    %446 = arith.select %443, %445, %435 : vector<1x8xi1>, vector<1x8xi32>
    %447 = vector.broadcast %441 : vector<1x1xi32> to vector<1x5xi32>
    %448 = arith.cmpi eq, %306, %447 : vector<1x5xi32>
    %c0_i32_159 = arith.constant 0 : i32
    %449 = vector.broadcast %c0_i32_159 : i32 to vector<1x5xi32>
    %450 = arith.select %448, %399, %449 : vector<1x5xi1>, vector<1x5xi32>
    %cst_160 = arith.constant dense<0> : vector<1xi32>
    %451 = vector.multi_reduction <add>, %450, %cst_160 [1] : vector<1x5xi32> to vector<1xi32>
    %452 = vector.shape_cast %451 : vector<1xi32> to vector<1x1xi32>
    %c5_i32_161 = arith.constant 5 : i32
    %453 = vector.broadcast %c5_i32_161 : i32 to vector<1x8xi32>
    %454 = arith.cmpi eq, %429, %453 : vector<1x8xi32>
    %455 = vector.shape_cast %452 : vector<1x1xi32> to vector<1x1xi32>
    %456 = vector.broadcast %455 : vector<1x1xi32> to vector<1x8xi32>
    %457 = arith.select %454, %456, %446 : vector<1x8xi1>, vector<1x8xi32>
    %458 = vector.broadcast %452 : vector<1x1xi32> to vector<1x5xi32>
    %459 = arith.cmpi eq, %306, %458 : vector<1x5xi32>
    %c0_i32_162 = arith.constant 0 : i32
    %460 = vector.broadcast %c0_i32_162 : i32 to vector<1x5xi32>
    %461 = arith.select %459, %385, %460 : vector<1x5xi1>, vector<1x5xi32>
    %cst_163 = arith.constant dense<0> : vector<1xi32>
    %462 = vector.multi_reduction <add>, %461, %cst_163 [1] : vector<1x5xi32> to vector<1xi32>
    %463 = vector.shape_cast %462 : vector<1xi32> to vector<1x1xi32>
    %c4_i32 = arith.constant 4 : i32
    %464 = vector.broadcast %c4_i32 : i32 to vector<1x8xi32>
    %465 = arith.cmpi eq, %429, %464 : vector<1x8xi32>
    %466 = vector.shape_cast %463 : vector<1x1xi32> to vector<1x1xi32>
    %467 = vector.broadcast %466 : vector<1x1xi32> to vector<1x8xi32>
    %468 = arith.select %465, %467, %457 : vector<1x8xi1>, vector<1x8xi32>
    %469 = vector.broadcast %463 : vector<1x1xi32> to vector<1x5xi32>
    %470 = arith.cmpi eq, %306, %469 : vector<1x5xi32>
    %c0_i32_164 = arith.constant 0 : i32
    %471 = vector.broadcast %c0_i32_164 : i32 to vector<1x5xi32>
    %472 = arith.select %470, %371, %471 : vector<1x5xi1>, vector<1x5xi32>
    %cst_165 = arith.constant dense<0> : vector<1xi32>
    %473 = vector.multi_reduction <add>, %472, %cst_165 [1] : vector<1x5xi32> to vector<1xi32>
    %474 = vector.shape_cast %473 : vector<1xi32> to vector<1x1xi32>
    %c3_i32_166 = arith.constant 3 : i32
    %475 = vector.broadcast %c3_i32_166 : i32 to vector<1x8xi32>
    %476 = arith.cmpi eq, %429, %475 : vector<1x8xi32>
    %477 = vector.shape_cast %474 : vector<1x1xi32> to vector<1x1xi32>
    %478 = vector.broadcast %477 : vector<1x1xi32> to vector<1x8xi32>
    %479 = arith.select %476, %478, %468 : vector<1x8xi1>, vector<1x8xi32>
    %480 = vector.broadcast %474 : vector<1x1xi32> to vector<1x5xi32>
    %481 = arith.cmpi eq, %306, %480 : vector<1x5xi32>
    %c0_i32_167 = arith.constant 0 : i32
    %482 = vector.broadcast %c0_i32_167 : i32 to vector<1x5xi32>
    %483 = arith.select %481, %357, %482 : vector<1x5xi1>, vector<1x5xi32>
    %cst_168 = arith.constant dense<0> : vector<1xi32>
    %484 = vector.multi_reduction <add>, %483, %cst_168 [1] : vector<1x5xi32> to vector<1xi32>
    %485 = vector.shape_cast %484 : vector<1xi32> to vector<1x1xi32>
    %c2_i32 = arith.constant 2 : i32
    %486 = vector.broadcast %c2_i32 : i32 to vector<1x8xi32>
    %487 = arith.cmpi eq, %429, %486 : vector<1x8xi32>
    %488 = vector.shape_cast %485 : vector<1x1xi32> to vector<1x1xi32>
    %489 = vector.broadcast %488 : vector<1x1xi32> to vector<1x8xi32>
    %490 = arith.select %487, %489, %479 : vector<1x8xi1>, vector<1x8xi32>
    %491 = vector.broadcast %485 : vector<1x1xi32> to vector<1x5xi32>
    %492 = arith.cmpi eq, %306, %491 : vector<1x5xi32>
    %c0_i32_169 = arith.constant 0 : i32
    %493 = vector.broadcast %c0_i32_169 : i32 to vector<1x5xi32>
    %494 = arith.select %492, %343, %493 : vector<1x5xi1>, vector<1x5xi32>
    %cst_170 = arith.constant dense<0> : vector<1xi32>
    %495 = vector.multi_reduction <add>, %494, %cst_170 [1] : vector<1x5xi32> to vector<1xi32>
    %496 = vector.shape_cast %495 : vector<1xi32> to vector<1x1xi32>
    %c1_i32 = arith.constant 1 : i32
    %497 = vector.broadcast %c1_i32 : i32 to vector<1x8xi32>
    %498 = arith.cmpi eq, %429, %497 : vector<1x8xi32>
    %499 = vector.shape_cast %496 : vector<1x1xi32> to vector<1x1xi32>
    %500 = vector.broadcast %499 : vector<1x1xi32> to vector<1x8xi32>
    %501 = arith.select %498, %500, %490 : vector<1x8xi1>, vector<1x8xi32>
    %502 = vector.broadcast %496 : vector<1x1xi32> to vector<1x5xi32>
    %503 = arith.cmpi eq, %306, %502 : vector<1x5xi32>
    %c0_i32_171 = arith.constant 0 : i32
    %504 = vector.broadcast %c0_i32_171 : i32 to vector<1x5xi32>
    %505 = arith.select %503, %329, %504 : vector<1x5xi1>, vector<1x5xi32>
    %cst_172 = arith.constant dense<0> : vector<1xi32>
    %506 = vector.multi_reduction <add>, %505, %cst_172 [1] : vector<1x5xi32> to vector<1xi32>
    %507 = vector.shape_cast %506 : vector<1xi32> to vector<1x1xi32>
    %c0_i32_173 = arith.constant 0 : i32
    %508 = vector.broadcast %c0_i32_173 : i32 to vector<1x8xi32>
    %509 = arith.cmpi eq, %429, %508 : vector<1x8xi32>
    %510 = vector.shape_cast %507 : vector<1x1xi32> to vector<1x1xi32>
    %511 = vector.broadcast %510 : vector<1x1xi32> to vector<1x8xi32>
    %512 = arith.select %509, %511, %501 : vector<1x8xi1>, vector<1x8xi32>
    %c0_174 = arith.constant 0 : index
    %c0_175 = arith.constant 0 : index
    %513 = vector.load %arg14[%c0_174, %c0_175] : memref<1x8xi32, #tpu.memory_space<vmem>>, vector<1x8xi32>
    tpu.vector_store %arg14[%c0_174, %c0_175], %512 {strides = array<i32>} : memref<1x8xi32, #tpu.memory_space<vmem>>, vector<1x8xi32>,
    return
  }
}

</mosaic_0001>

<bundles_post_ra>
// kernel: tpu_custom_call.1
= control target key start
LH: loop header
LB: loop body
LE: loop exit
PB: predicated region body
PF: predicated region fallthrough
CT: control target
= control target key end

     0   :  { %20 = vsyncpa [#allocation6], 0  ;;  %s4593_s0 = inlined_call_operand.hbm [shape: s32[8], index: 0, kind: input, shape index: {}]   ;;  %s4594_s1 = inlined_call_operand.vmem [shape: f32[20,16], index: 1, kind: input, shape index: {}]   ;;  %s4595_s2 = inlined_call_operand.vmem [shape: f32[32,128], index: 2, kind: input, shape index: {}]   ;;  %s4596_s3 = inlined_call_operand.vmem [shape: f32[1,128], index: 3, kind: input, shape index: {}]   ;;  %s4597_s4 = inlined_call_operand.vmem [shape: f32[16,128], index: 4, kind: input, shape index: {}]   ;;  %s4598_s5 = inlined_call_operand.vmem [shape: f32[16,128], index: 5, kind: input, shape index: {}]   ;;  %s4599_s6 = inlined_call_operand.vmem [shape: f32[1,16], index: 6, kind: input, shape index: {}]   ;;  %s4600_s7 = inlined_call_operand.vmem [shape: f32[1,16], index: 7, kind: input, shape index: {}]   ;;  %s4601_s8 = inlined_call_operand.vmem [shape: f32[1,16], index: 8, kind: input, shape index: {}]   ;;  %s4602_s9 = inlined_call_operand.vmem [shape: f32[1,16], index: 9, kind: input, shape index: {}]   ;;  %s4603_s10 = inlined_call_operand.vmem [shape: f32[32,5], index: 10, kind: input, shape index: {}]   ;;  %s4604_s11 = inlined_call_operand.vmem [shape: f32[1,5], index: 11, kind: input, shape index: {}]   ;;  %s4605_s12 = inlined_call_operand.vmem [shape: f32[5,5], index: 12, kind: input, shape index: {}]   ;;  %s4606_s13 = inlined_call_operand.hbm [shape: f32[1,1], index: 13, kind: output, shape index: {0}]   ;;  %s4607_s14 = inlined_call_operand.hbm [shape: s32[1,8], index: 14, kind: output, shape index: {1}]  }
   0x1   :  { %21 = vsyncpa [#allocation5], 0 }
   0x2   :  { %22 = vsyncpa [#allocation9], 0  ;;  %s3583_s29 = smov [#allocation4]  }
   0x3   :  { %30 = dma.hbm_to_smem %s4593_s0, 16, %s3583_s29, [#allocation6]  }
   0x4   :  { %3577 = dma.done.wait [#allocation6], 16  }
   0x5   :  { %3578 = vsyncadd [#allocation6], 4294967280 }
   0x6   :  { %58 = sfence }
   0x7   :  { %s3208_s16 = sld [smem:[#allocation4 + $0x2]]  ;;  %v3584_v0 = vmov 0.0   ;;  %v3682_v1 = vld [vmem:[%s4598_s5 + $0x8] sm:$0xff]  ;;  %v3687_v2 = vld [vmem:[%s4598_s5] sm:$0xff]  ;;  %vm62_vm0 = vcmask 122880   ;;  %vm3585_vm1 = vmmov 0  }
   0x8   :  { %s59_s17 = sld [smem:[#allocation4]]  ;;  %3313 = vmatprep.subr.mxu1 %v3584_v0  ;;  %3302 = vmatprep.subr.mxu0 %v3584_v0  ;;  %v225_v4 = vld [vmem:[%s4601_s8] sm:$0x1]  ;;  %vm227_vm2 = vcmask 130048   ;;  %v137_v6 = vld [vmem:[%s4595_s2 + $0x18] sm:$0xff]  ;;  %v3725_v7 = vld [vmem:[%s4597_s4 + $0x8] sm:$0xff] }
   0x9   :  { %s3672_s18 = sld [smem:[#allocation4 + $0x3]]  ;;  %3314 = vmatpush3.msra.mxu1 %v3682_v1  ;;  %3317 = vmatprep.mubr.msk.f32.mxu1 %vm3585_vm1, %v3584_v0  ;;  %v136_v9 = vld [vmem:[%s4595_s2 + $0x10] sm:$0xff]  ;;  %v3746_v11 = vld [vmem:[%s4597_s4] sm:$0xff]  ;;  %v135_v13 = vld [vmem:[%s4595_s2 + $0x8] sm:$0xff]  ;;  %vm68_vm3 = vcmask 254080   ;;  %vm145_vm4 = vcmask 261120  }
   0xa   :  { %s3674_s19 = sld [smem:[#allocation4 + $0x1]]  ;;  %3315 = vmatprep.subr.mxu1 %v3584_v0  ;;  %3310 = vmatprep.mubr.msk.f32.mxu0 %vm3585_vm1, %v3584_v0  ;;  %v223_v12 = vld [vmem:[%s4599_s6] sm:$0x1]  ;;  %vm1862_vm6 = vcmask 36864   ;;  %vm1962_vm7 = vcmask 1041409   ;;  %vm1964_vm8 = vcmask 1042434  }
   0xb   :  { %s3676_s20 = sld [smem:[#allocation4 + $0x5]]  ;;  %3316 = vmatpush3.msra.mxu1 %v3687_v2  ;;  %3303 = vmatpush3.msra.mxu0 %v137_v6  ;;  %v134_v16 = vld [vmem:[%s4595_s2] sm:$0xff]  ;;  %vm1966_vm9 = vcmask 1043459   ;;  %vm1968_vm10 = vcmask 1044484  }
   0xc   :  { %s3690_s24 = sld [smem:[#allocation4 + $0x4]]  ;;  %3320 = vmatprep.subr.mxu1 %v3584_v0  ;;  %3318 = vmatmul.mubr.msk.f32.vlgmr.msra.gmra.mxu1 %vm227_vm2, %v225_v4  ;;  %v3220_v19 = vld [vmem:[%s4602_s9] ss:$0 sm:$0xff] }
   0xd   :  { %s80_s27 = scalar_lea.vmem %s4594_s1, %s3208_s16  ;;  %s3698_s28 = sld [smem:[#allocation4 + $0x7]]  ;;  %3321 = vmatpush3.msra.mxu1 %v3725_v7  ;;  %3304 = vmatprep.subr.mxu0 %v3584_v0  ;;  %v3219_v20 = vld [vmem:[%s4600_s7] ss:$0 sm:$0xff] }
   0xe   :  { %v81_v3 = vld [vmem:[%s80_s27] sm:$0x1]  ;;  %s60_s30 = scalar_lea.vmem %s4594_s1, %s59_s17  ;;  %s3706_s15 = sld [smem:[#allocation4 + $0x6]]  ;;  %3322 = vmatprep.subr.mxu1 %v3584_v0  ;;  %3305 = vmatpush3.msra.mxu0 %v136_v9 }
   0xf   :  { %s3586_s16 = smov 16   ;;  %82 = vst.msk [vmem:[#allocation2 + $0x2] sm:$0x1] %vm62_vm0, %v81_v3  ;;  %v61_v5 = vld [vmem:[%s60_s30] sm:$0x1]  ;;  %s89_s17 = scalar_lea.vmem %s4594_s1, %s3672_s18  ;;  %3323 = vmatpush3.msra.mxu1 %v3746_v11  ;;  %3324 = vmatprep.mubr.msk.f32.mxu1 %vm3585_vm1, %v3584_v0 }
  0x10   :  { %84 = vrot.lane.b32.xlu1 %v81_v3, %s3586_s16  ;;  %65 = vrot.lane.b32.xlu0 %v61_v5, %s3586_s16  ;;  %63 = vst.msk [vmem:[#allocation2] sm:$0x1] %vm62_vm0, %v61_v5  ;;  %v90_v8 = vld [vmem:[%s89_s17] sm:$0x1]  ;;  %s71_s29 = scalar_lea.vmem %s4594_s1, %s3674_s19  ;;  %s3588_s17 = smov 96  }
  0x11   :  { %91 = vst.msk [vmem:[#allocation2 + $0x3] sm:$0x1] %vm62_vm0, %v90_v8  ;;  %v72_v10 = vld [vmem:[%s71_s29] sm:$0x1]  ;;  %s107_s23 = scalar_lea.vmem %s4594_s1, %s3676_s20  ;;  %3306 = vmatprep.subr.mxu0 %v3584_v0  ;;  %3325 = vmatmul.mubr.msk.f32.vlgmr.msra.gmra.mxu1 %vm227_vm2, %v223_v12 }
  0x12   :  { %73 = vst.msk [vmem:[#allocation2 + $0x1] sm:$0x1] %vm62_vm0, %v72_v10  ;;  %s98_s8 = scalar_lea.vmem %s4594_s1, %s3690_s24  ;;  %v108_v14 = vld [vmem:[%s107_s23] sm:$0x1]  ;;  %3307 = vmatpush3.msra.mxu0 %v135_v13  ;;  %3327 = vmatprep.subr.mxu1 %v3584_v0 }
  0x13   :  { %v99_v15 = vld [vmem:[%s98_s8] sm:$0x1]  ;;  %s125_s29 = scalar_lea.vmem %s4594_s1, %s3698_s28  ;;  %3308 = vmatprep.subr.mxu0 %v3584_v0  ;;  %3331 = vmatprep.mubr.msk.f32.mxu1 %vm3585_vm1, %v3584_v0  ;;  %s3587_s28 = smov 80  }
  0x14   :  { %93 = vrot.lane.b32.xlu1 %v90_v8, %s3586_s16  ;;  %75 = vrot.lane.b32.xlu0 %v72_v10, %s3586_s16  ;;  %s116_s0 = scalar_lea.vmem %s4594_s1, %s3706_s15  ;;  %v126_v17 = vld [vmem:[%s125_s29] sm:$0x1] }
  0x15   :  { %3309 = vmatpush3.msra.mxu0 %v134_v16  ;;  %v117_v18 = vld [vmem:[%s116_s0] sm:$0x1]  ;;  %3328 = vmatpush3.msra.mxu1 %v3682_v1 }
  0x16   :  { %3341 = vmatprep.subr.mxu0 %v3584_v0  ;;  %3329 = vmatprep.subr.mxu1 %v3584_v0  ;;  %v3214_v35 = vld [vmem:[%s4596_s3] ss:$0 sm:$0xff]  ;;  %s3589_s3 = smov 32  }
  0x17   :  { %3330 = vmatpush3.msra.mxu1 %v3687_v2 }
  0x18   :  { %111 = vrot.lane.b32.xlu1 %v108_v14, %s3586_s16  ;;  %102 = vrot.lane.b32.xlu0 %v99_v15, %s3586_s16 }
  0x19   :  { %3334 = vmatprep.subr.mxu1 %v3584_v0 }
  0x1c   :  { %129 = vrot.lane.b32.xlu1 %v126_v17, %s3586_s16  ;;  %120 = vrot.lane.b32.xlu0 %v117_v18, %s3586_s16 }
  0x20   :  { %412 = vrot.lane.b32.xlu1 %v3220_v19, %s3587_s28 }
  0x24   :  { %387 = vrot.lane.b32.xlu1 %v3219_v20, %s3586_s16 }
  0x82   :  { %v85_v21 = vpop.permute.xlu1 %84  ;;  %v66_v22 = vpop.permute.xlu0 %65 }
  0x83   :  { %87 = vst.msk [vmem:[#allocation2 + $0x5] sm:$0x1] %vm68_vm3, %v85_v21  ;;  %69 = vst.msk [vmem:[#allocation2 + $0x7] sm:$0x1] %vm68_vm3, %v66_v22 }
  0x84   :  { %109 = vst.msk [vmem:[#allocation2 + $0x5] sm:$0x1] %vm62_vm0, %v108_v14  ;;  %127 = vst.msk [vmem:[#allocation2 + $0x7] sm:$0x1] %vm62_vm0, %v126_v17 }
  0x86   :  { %v94_v23 = vpop.permute.xlu1 %93  ;;  %v76_v24 = vpop.permute.xlu0 %75 }
  0x87   :  { %96 = vst.msk [vmem:[#allocation2 + $0x4] sm:$0x1] %vm68_vm3, %v94_v23  ;;  %78 = vst.msk [vmem:[#allocation2 + $0x6] sm:$0x1] %vm68_vm3, %v76_v24 }
  0x88   :  { %100 = vst.msk [vmem:[#allocation2 + $0x4] sm:$0x1] %vm62_vm0, %v99_v15  ;;  %118 = vst.msk [vmem:[#allocation2 + $0x6] sm:$0x1] %vm62_vm0, %v117_v18 }
  0x8a   :  { %v112_v25 = vpop.permute.xlu1 %111  ;;  %v103_v26 = vpop.permute.xlu0 %102 }
  0x8b   :  { %114 = vst.msk [vmem:[#allocation2 + $0x2] sm:$0x1] %vm68_vm3, %v112_v25  ;;  %105 = vst.msk [vmem:[#allocation2 + $0x3] sm:$0x1] %vm68_vm3, %v103_v26 }
  0x8e   :  { %v130_v27 = vpop.permute.xlu1 %129  ;;  %v121_v28 = vpop.permute.xlu0 %120 }
  0x8f   :  { %132 = vst.msk [vmem:[#allocation2] sm:$0x1] %vm68_vm3, %v130_v27  ;;  %123 = vst.msk [vmem:[#allocation2 + $0x1] sm:$0x1] %vm68_vm3, %v121_v28 }
  0x92   :  { %v413_v47 = vpop.permute.xlu1 %412 }
  0x96   :  { %v133_v29 = vld [vmem:[#allocation2] sm:$0xff]  ;;  %v388_v48 = vpop.permute.xlu1 %387 }
  0x97   :  { %3311 = vmatmul.mubr.msk.f32.vlgmr.msra.gmra.mxu0 %vm145_vm4, %v133_v29 }
  0x98   :  { %3342 = vmatpush3.msra.mxu0 %v3682_v1  ;;  %3345 = vmatprep.mubr.msk.f32.mxu0 %vm3585_vm1, %v3584_v0 }
  0x99   :  { %3343 = vmatprep.subr.mxu0 %v3584_v0 }
  0x9a   :  { %3344 = vmatpush3.msra.mxu0 %v3687_v2 }
  0x9b   :  { %3355 = vmatprep.subr.mxu0 %v3584_v0 }
  0xcc   :  { %v297_v30 = vpop.f32.mrf.mxu1 }
  0xce   :  { %v3319_v31 = vpop.f32.mrf.mxu1 }
  0xd1   :  { %v370_v32 = vpop.f32.mrf.mxu1 }
  0xd2   :  { %v371_v33 = vadd.f32 %v370_v32, %v297_v30 }
  0xd3   :  { %v3326_v34 = vpop.f32.mrf.mxu1 }
 0x157   :  { %v215_v36 = vpop.f32.mrf.mxu0 }
 0x158   :  { %v3822_v37 = vadd.f32 %v3214_v35, %v215_v36 }
 0x159   :  { %v3312_v38 = vpop.f32.mrf.mxu0 }
 0x15a   :  { %v374_v39 = vadd.f32 %v371_v33, %v3822_v37  ;;  %v580_v5 = vrot.slane %v3822_v37, 1  ;;  %v771_v33 = vrot.slane %v3822_v37, 2 }
 0x15c   :  { %3449 = vtanh.f32 %v374_v39  ;;  %v3218_v41 = vmul.f32 -1.442695, %v374_v39 }
 0x15e   :  { %3451 = vpow2.f32 %v3218_v41 }
 0x169   :  { %v3450_v40 = vpop.eup %3449 }
 0x16a   :  { %392 = vrot.lane.b32.xlu0 %v3450_v40, %s3588_s17 }
 0x16b   :  { %v3452_v42 = vpop.eup %3451 }
 0x16c   :  { %v378_v43 = vadd.f32 1.0, %v3452_v42 }
 0x16e   :  { %3453 = vrcp.f32 %v378_v43 }
 0x17b   :  { %v3454_v44 = vpop.eup %3453 }
 0x17c   :  { %v415_v49 = vmul.f32 %v3454_v44, %v413_v47  ;;  %v390_v50 = vmul.f32 %v3454_v44, %v388_v48 }
 0x1dc   :  { %v393_v45 = vpop.permute.xlu0 %392 }
 0x1dd   :  { %v395_v46 = vmul.f32 %v3454_v44, %v393_v45 }
 0x1df   :  { %397 = vrot.lane.b32.xlu0 %v395_v46, %s3586_s16 }
 0x251   :  { %v398_v51 = vpop.permute.xlu0 %397 }
 0x252   :  { %v400_v52 = vadd.f32 %v398_v51, %v390_v50  ;;  %v416_v53 = vadd.f32 %v415_v49, %v398_v51 }
 0x254   :  { %3455 = vtanh.f32 %v400_v52 }
 0x255   :  { %3457 = vtanh.f32 %v416_v53 }
 0x261   :  { %v3456_v54 = vpop.eup %3455 }
 0x262   :  { %v3458_v55 = vpop.eup %3457  ;;  %403 = vrot.lane.b32.xlu1 %v3456_v54, %s3589_s3 }
 0x263   :  { %419 = vrot.lane.b32.xlu0 %v3458_v55, %s3589_s3 }
 0x2d4   :  { %v404_v56 = vpop.permute.xlu1 %403 }
 0x2d5   :  { %v420_v57 = vpop.permute.xlu0 %419  ;;  %v406_v58 = vmul.f32 %v3454_v44, %v404_v56 }
 0x2d6   :  { %v3829_v59 = vmul.f32 %v3454_v44, %v420_v57 }
 0x2d7   :  { %424 = vrot.lane.b32.xlu1 %v406_v58, %s3587_s28 }
 0x2d8   :  { %433 = vrot.lane.b32.xlu0 %v3829_v59, %s3586_s16 }
 0x349   :  { %v425_v60 = vpop.permute.xlu1 %424 }
 0x34a   :  { %v434_v61 = vpop.permute.xlu0 %433  ;;  %427 = vst.msk [vmem:[#allocation3] sm:$0x1] %vm62_vm0, %v425_v60 }
 0x34b   :  { %3332 = vmatmul.mubr.msk.f32.vlgmr.msra.gmra.mxu1 %vm227_vm2, %v434_v61 }
 0x34c   :  { %3335 = vmatpush3.msra.mxu1 %v3725_v7  ;;  %3338 = vmatprep.mubr.msk.f32.mxu1 %vm3585_vm1, %v3584_v0 }
 0x34d   :  { %3336 = vmatprep.subr.mxu1 %v3584_v0 }
 0x34e   :  { %3337 = vmatpush3.msra.mxu1 %v3746_v11 }
 0x34f   :  { %3339 = vmatmul.mubr.msk.f32.vlgmr.msra.gmra.mxu1 %vm227_vm2, %v425_v60  ;;  %3348 = vmatprep.subr.mxu1 %v3584_v0 }
 0x350   :  { %3349 = vmatpush3.msra.mxu1 %v3725_v7  ;;  %3352 = vmatprep.mubr.msk.f32.mxu1 %vm3585_vm1, %v3584_v0 }
 0x351   :  { %3350 = vmatprep.subr.mxu1 %v3584_v0 }
 0x352   :  { %3351 = vmatpush3.msra.mxu1 %v3746_v11 }
 0x353   :  { %3362 = vmatprep.subr.mxu1 %v3584_v0 }
 0x40b   :  { %v503_v62 = vpop.f32.mrf.mxu1 }
 0x40d   :  { %v3333_v63 = vpop.f32.mrf.mxu1 }
 0x40f   :  { %v575_v3 = vpop.f32.mrf.mxu1 }
 0x410   :  { %v576_v4 = vadd.f32 %v575_v3, %v503_v62  ;;  %v962_v62 = vrot.slane %v3822_v37, 3 }
 0x411   :  { %v3340_v6 = vpop.f32.mrf.mxu1 }
 0x412   :  { %v582_v8 = vadd.f32 %v580_v5, %v576_v4 }
 0x414   :  { %3459 = vtanh.f32 %v582_v8  ;;  %v3223_v10 = vmul.f32 -1.442695, %v582_v8 }
 0x416   :  { %3461 = vpow2.f32 %v3223_v10 }
 0x421   :  { %v3460_v9 = vpop.eup %3459 }
 0x422   :  { %592 = vrot.lane.b32.xlu0 %v3460_v9, %s3588_s17 }
 0x423   :  { %v3462_v12 = vpop.eup %3461 }
 0x424   :  { %v586_v13 = vadd.f32 1.0, %v3462_v12 }
 0x426   :  { %3463 = vrcp.f32 %v586_v13 }
 0x433   :  { %v3464_v14 = vpop.eup %3463 }
 0x434   :  { %v607_v17 = vmul.f32 %v3464_v14, %v416_v53  ;;  %v590_v18 = vmul.f32 %v3464_v14, %v400_v52 }
 0x494   :  { %v593_v15 = vpop.permute.xlu0 %592 }
 0x495   :  { %v595_v16 = vmul.f32 %v3464_v14, %v593_v15 }
 0x497   :  { %597 = vrot.lane.b32.xlu1 %v595_v16, %s3586_s16 }
 0x509   :  { %v598_v19 = vpop.permute.xlu1 %597 }
 0x50a   :  { %v600_v20 = vadd.f32 %v598_v19, %v590_v18  ;;  %v608_v21 = vadd.f32 %v607_v17, %v598_v19 }
 0x50c   :  { %3465 = vtanh.f32 %v600_v20 }
 0x50d   :  { %3467 = vtanh.f32 %v608_v21 }
 0x519   :  { %v3466_v22 = vpop.eup %3465 }
 0x51a   :  { %v3468_v23 = vpop.eup %3467  ;;  %603 = vrot.lane.b32.xlu0 %v3466_v22, %s3589_s3 }
 0x51b   :  { %611 = vrot.lane.b32.xlu1 %v3468_v23, %s3589_s3 }
 0x58c   :  { %v604_v24 = vpop.permute.xlu0 %603 }
 0x58d   :  { %v612_v25 = vpop.permute.xlu1 %611  ;;  %v606_v26 = vmul.f32 %v3464_v14, %v604_v24 }
 0x58e   :  { %v3854_v27 = vmul.f32 %v3464_v14, %v612_v25 }
 0x58f   :  { %616 = vrot.lane.b32.xlu0 %v606_v26, %s3587_s28 }
 0x590   :  { %625 = vrot.lane.b32.xlu1 %v3854_v27, %s3586_s16 }
 0x601   :  { %v617_v28 = vpop.permute.xlu0 %616 }
 0x602   :  { %v626_v29 = vpop.permute.xlu1 %625  ;;  %619 = vst.msk [vmem:[#allocation3 + $0x1] sm:$0x1] %vm62_vm0, %v617_v28  ;;  %3353 = vmatmul.mubr.msk.f32.vlgmr.msra.gmra.mxu1 %vm227_vm2, %v617_v28 }
 0x603   :  { %3346 = vmatmul.mubr.msk.f32.vlgmr.msra.gmra.mxu0 %vm227_vm2, %v626_v29  ;;  %3363 = vmatpush3.msra.mxu1 %v3725_v7 }
 0x604   :  { %3356 = vmatpush3.msra.mxu0 %v3682_v1  ;;  %3364 = vmatprep.subr.mxu1 %v3584_v0 }
 0x605   :  { %3357 = vmatprep.subr.mxu0 %v3584_v0  ;;  %3365 = vmatpush3.msra.mxu1 %v3746_v11 }
 0x606   :  { %3358 = vmatpush3.msra.mxu0 %v3687_v2  ;;  %3359 = vmatprep.mubr.msk.f32.mxu0 %vm3585_vm1, %v3584_v0 }
 0x607   :  { %3366 = vmatprep.mubr.msk.f32.mxu1 %vm3585_vm1, %v3584_v0  ;;  %3369 = vmatprep.subr.mxu0 %v3584_v0 }
 0x608   :  { %3376 = vmatprep.subr.mxu1 %v3584_v0 }
 0x6c2   :  { %v767_v30 = vpop.f32.mrf.mxu1 }
 0x6c3   :  { %v695_v31 = vpop.f32.mrf.mxu0 }
 0x6c4   :  { %v768_v32 = vadd.f32 %v767_v30, %v695_v31  ;;  %v3354_v34 = vpop.f32.mrf.mxu1  ;;  %v1153_v31 = vrot.slane %v3822_v37, 4 }
 0x6c5   :  { %v3347_v35 = vpop.f32.mrf.mxu0 }
 0x6c6   :  { %v773_v36 = vadd.f32 %v771_v33, %v768_v32 }
 0x6c8   :  { %3469 = vtanh.f32 %v773_v36  ;;  %v3226_v39 = vmul.f32 -1.442695, %v773_v36 }
 0x6ca   :  { %3471 = vpow2.f32 %v3226_v39 }
 0x6d5   :  { %v3470_v38 = vpop.eup %3469 }
 0x6d6   :  { %783 = vrot.lane.b32.xlu0 %v3470_v38, %s3588_s17 }
 0x6d7   :  { %v3472_v40 = vpop.eup %3471 }
 0x6d8   :  { %v777_v41 = vadd.f32 1.0, %v3472_v40 }
 0x6da   :  { %3473 = vrcp.f32 %v777_v41 }
 0x6e7   :  { %v3474_v42 = vpop.eup %3473 }
 0x6e8   :  { %v798_v45 = vmul.f32 %v3474_v42, %v608_v21  ;;  %v781_v46 = vmul.f32 %v3474_v42, %v600_v20 }
 0x748   :  { %v784_v43 = vpop.permute.xlu0 %783 }
 0x749   :  { %v786_v44 = vmul.f32 %v3474_v42, %v784_v43 }
 0x74b   :  { %788 = vrot.lane.b32.xlu1 %v786_v44, %s3586_s16 }
 0x7bd   :  { %v789_v47 = vpop.permute.xlu1 %788 }
 0x7be   :  { %v791_v48 = vadd.f32 %v789_v47, %v781_v46  ;;  %v799_v49 = vadd.f32 %v798_v45, %v789_v47 }
 0x7c0   :  { %3475 = vtanh.f32 %v791_v48 }
 0x7c1   :  { %3477 = vtanh.f32 %v799_v49 }
 0x7cd   :  { %v3476_v50 = vpop.eup %3475 }
 0x7ce   :  { %v3478_v51 = vpop.eup %3477  ;;  %794 = vrot.lane.b32.xlu0 %v3476_v50, %s3589_s3 }
 0x7cf   :  { %802 = vrot.lane.b32.xlu1 %v3478_v51, %s3589_s3 }
 0x840   :  { %v795_v52 = vpop.permute.xlu0 %794 }
 0x841   :  { %v803_v53 = vpop.permute.xlu1 %802  ;;  %v797_v54 = vmul.f32 %v3474_v42, %v795_v52 }
 0x842   :  { %v3879_v55 = vmul.f32 %v3474_v42, %v803_v53 }
 0x843   :  { %807 = vrot.lane.b32.xlu0 %v797_v54, %s3587_s28 }
 0x844   :  { %816 = vrot.lane.b32.xlu1 %v3879_v55, %s3586_s16 }
 0x8b5   :  { %v808_v56 = vpop.permute.xlu0 %807 }
 0x8b6   :  { %v817_v57 = vpop.permute.xlu1 %816  ;;  %810 = vst.msk [vmem:[#allocation3 + $0x2] sm:$0x1] %vm62_vm0, %v808_v56  ;;  %3367 = vmatmul.mubr.msk.f32.vlgmr.msra.gmra.mxu1 %vm227_vm2, %v808_v56 }
 0x8b7   :  { %3360 = vmatmul.mubr.msk.f32.vlgmr.msra.gmra.mxu0 %vm227_vm2, %v817_v57  ;;  %3377 = vmatpush3.msra.mxu1 %v3725_v7 }
 0x8b8   :  { %3370 = vmatpush3.msra.mxu0 %v3682_v1  ;;  %3378 = vmatprep.subr.mxu1 %v3584_v0 }
 0x8b9   :  { %3371 = vmatprep.subr.mxu0 %v3584_v0  ;;  %3379 = vmatpush3.msra.mxu1 %v3746_v11 }
 0x8ba   :  { %3372 = vmatpush3.msra.mxu0 %v3687_v2  ;;  %3373 = vmatprep.mubr.msk.f32.mxu0 %vm3585_vm1, %v3584_v0 }
 0x8bb   :  { %3380 = vmatprep.mubr.msk.f32.mxu1 %vm3585_vm1, %v3584_v0  ;;  %3383 = vmatprep.subr.mxu0 %v3584_v0 }
 0x8bc   :  { %3390 = vmatprep.subr.mxu1 %v3584_v0 }
 0x976   :  { %v958_v58 = vpop.f32.mrf.mxu1 }
 0x977   :  { %v886_v60 = vpop.f32.mrf.mxu0 }
 0x978   :  { %v959_v61 = vadd.f32 %v958_v58, %v886_v60  ;;  %v3368_v63 = vpop.f32.mrf.mxu1 }
 0x979   :  { %v3361_v3 = vpop.f32.mrf.mxu0 }
 0x97a   :  { %v964_v4 = vadd.f32 %v962_v62, %v959_v61  ;;  %v1344_v61 = vrot.slane %v3822_v37, 5 }
 0x97c   :  { %3479 = vtanh.f32 %v964_v4  ;;  %v3229_v6 = vmul.f32 -1.442695, %v964_v4 }
 0x97e   :  { %3481 = vpow2.f32 %v3229_v6 }
 0x989   :  { %v3480_v5 = vpop.eup %3479 }
 0x98a   :  { %974 = vrot.lane.b32.xlu0 %v3480_v5, %s3588_s17 }
 0x98b   :  { %v3482_v8 = vpop.eup %3481 }
 0x98c   :  { %v968_v9 = vadd.f32 1.0, %v3482_v8 }
 0x98e   :  { %3483 = vrcp.f32 %v968_v9 }
 0x99b   :  { %v3484_v10 = vpop.eup %3483 }
 0x99c   :  { %v989_v14 = vmul.f32 %v3484_v10, %v799_v49  ;;  %v972_v15 = vmul.f32 %v3484_v10, %v791_v48 }
 0x9fc   :  { %v975_v12 = vpop.permute.xlu0 %974 }
 0x9fd   :  { %v977_v13 = vmul.f32 %v3484_v10, %v975_v12 }
 0x9ff   :  { %979 = vrot.lane.b32.xlu1 %v977_v13, %s3586_s16 }
 0xa71   :  { %v980_v16 = vpop.permute.xlu1 %979 }
 0xa72   :  { %v982_v17 = vadd.f32 %v980_v16, %v972_v15  ;;  %v990_v18 = vadd.f32 %v989_v14, %v980_v16 }
 0xa74   :  { %3485 = vtanh.f32 %v982_v17 }
 0xa75   :  { %3487 = vtanh.f32 %v990_v18 }
 0xa81   :  { %v3486_v19 = vpop.eup %3485 }
 0xa82   :  { %v3488_v20 = vpop.eup %3487  ;;  %985 = vrot.lane.b32.xlu0 %v3486_v19, %s3589_s3 }
 0xa83   :  { %993 = vrot.lane.b32.xlu1 %v3488_v20, %s3589_s3 }
 0xaf4   :  { %v986_v21 = vpop.permute.xlu0 %985 }
 0xaf5   :  { %v994_v22 = vpop.permute.xlu1 %993  ;;  %v988_v23 = vmul.f32 %v3484_v10, %v986_v21 }
 0xaf6   :  { %v3904_v24 = vmul.f32 %v3484_v10, %v994_v22 }
 0xaf7   :  { %998 = vrot.lane.b32.xlu0 %v988_v23, %s3587_s28 }
 0xaf8   :  { %1007 = vrot.lane.b32.xlu1 %v3904_v24, %s3586_s16 }
 0xb69   :  { %v999_v25 = vpop.permute.xlu0 %998 }
 0xb6a   :  { %v1008_v26 = vpop.permute.xlu1 %1007  ;;  %1001 = vst.msk [vmem:[#allocation3 + $0x3] sm:$0x1] %vm62_vm0, %v999_v25  ;;  %3381 = vmatmul.mubr.msk.f32.vlgmr.msra.gmra.mxu1 %vm227_vm2, %v999_v25 }
 0xb6b   :  { %3374 = vmatmul.mubr.msk.f32.vlgmr.msra.gmra.mxu0 %vm227_vm2, %v1008_v26  ;;  %3391 = vmatpush3.msra.mxu1 %v3725_v7 }
 0xb6c   :  { %3384 = vmatpush3.msra.mxu0 %v3682_v1  ;;  %3392 = vmatprep.subr.mxu1 %v3584_v0 }
 0xb6d   :  { %3385 = vmatprep.subr.mxu0 %v3584_v0  ;;  %3393 = vmatpush3.msra.mxu1 %v3746_v11 }
 0xb6e   :  { %3386 = vmatpush3.msra.mxu0 %v3687_v2  ;;  %3387 = vmatprep.mubr.msk.f32.mxu0 %vm3585_vm1, %v3584_v0 }
 0xb6f   :  { %3394 = vmatprep.mubr.msk.f32.mxu1 %vm3585_vm1, %v3584_v0  ;;  %3397 = vmatprep.subr.mxu0 %v3584_v0 }
 0xb70   :  { %3404 = vmatprep.subr.mxu1 %v3584_v0 }
 0xc2a   :  { %v1149_v28 = vpop.f32.mrf.mxu1 }
 0xc2b   :  { %v1077_v29 = vpop.f32.mrf.mxu0 }
 0xc2c   :  { %v1150_v30 = vadd.f32 %v1149_v28, %v1077_v29  ;;  %v3382_v32 = vpop.f32.mrf.mxu1 }
 0xc2d   :  { %v3375_v33 = vpop.f32.mrf.mxu0 }
 0xc2e   :  { %v1155_v34 = vadd.f32 %v1153_v31, %v1150_v30 }
 0xc30   :  { %3489 = vtanh.f32 %v1155_v34  ;;  %v3232_v36 = vmul.f32 -1.442695, %v1155_v34 }
 0xc32   :  { %3491 = vpow2.f32 %v3232_v36 }
 0xc3d   :  { %v3490_v35 = vpop.eup %3489 }
 0xc3e   :  { %1165 = vrot.lane.b32.xlu0 %v3490_v35, %s3588_s17 }
 0xc3f   :  { %v3492_v38 = vpop.eup %3491 }
 0xc40   :  { %v1159_v39 = vadd.f32 1.0, %v3492_v38 }
 0xc42   :  { %3493 = vrcp.f32 %v1159_v39 }
 0xc4f   :  { %v3494_v40 = vpop.eup %3493 }
 0xc50   :  { %v1180_v43 = vmul.f32 %v3494_v40, %v990_v18  ;;  %v1163_v44 = vmul.f32 %v3494_v40, %v982_v17 }
 0xcb0   :  { %v1166_v41 = vpop.permute.xlu0 %1165 }
 0xcb1   :  { %v1168_v42 = vmul.f32 %v3494_v40, %v1166_v41 }
 0xcb3   :  { %1170 = vrot.lane.b32.xlu1 %v1168_v42, %s3586_s16 }
 0xd25   :  { %v1171_v45 = vpop.permute.xlu1 %1170 }
 0xd26   :  { %v1173_v46 = vadd.f32 %v1171_v45, %v1163_v44  ;;  %v1181_v47 = vadd.f32 %v1180_v43, %v1171_v45 }
 0xd28   :  { %3495 = vtanh.f32 %v1173_v46 }
 0xd29   :  { %3497 = vtanh.f32 %v1181_v47 }
 0xd35   :  { %v3496_v48 = vpop.eup %3495 }
 0xd36   :  { %v3498_v49 = vpop.eup %3497  ;;  %1176 = vrot.lane.b32.xlu0 %v3496_v48, %s3589_s3 }
 0xd37   :  { %1184 = vrot.lane.b32.xlu1 %v3498_v49, %s3589_s3 }
 0xda8   :  { %v1177_v50 = vpop.permute.xlu0 %1176 }
 0xda9   :  { %v1185_v51 = vpop.permute.xlu1 %1184  ;;  %v1179_v52 = vmul.f32 %v3494_v40, %v1177_v50 }
 0xdaa   :  { %v3929_v53 = vmul.f32 %v3494_v40, %v1185_v51 }
 0xdab   :  { %1189 = vrot.lane.b32.xlu0 %v1179_v52, %s3587_s28 }
 0xdac   :  { %1198 = vrot.lane.b32.xlu1 %v3929_v53, %s3586_s16 }
 0xe1d   :  { %v3934_v54 = vpop.permute.xlu0 %1189 }
 0xe1e   :  { %v1199_v56 = vpop.permute.xlu1 %1198  ;;  %3395 = vmatmul.mubr.msk.f32.vlgmr.msra.gmra.mxu1 %vm227_vm2, %v3934_v54 }
 0xe1f   :  { %3388 = vmatmul.mubr.msk.f32.vlgmr.msra.gmra.mxu0 %vm227_vm2, %v1199_v56  ;;  %3405 = vmatpush3.msra.mxu1 %v3725_v7 }
 0xe20   :  { %3398 = vmatpush3.msra.mxu0 %v3682_v1  ;;  %3406 = vmatprep.subr.mxu1 %v3584_v0 }
 0xe21   :  { %3399 = vmatprep.subr.mxu0 %v3584_v0  ;;  %3407 = vmatpush3.msra.mxu1 %v3746_v11 }
 0xe22   :  { %3400 = vmatpush3.msra.mxu0 %v3687_v2  ;;  %3401 = vmatprep.mubr.msk.f32.mxu0 %vm3585_vm1, %v3584_v0 }
 0xe23   :  { %3408 = vmatprep.mubr.msk.f32.mxu1 %vm3585_vm1, %v3584_v0  ;;  %3411 = vmatprep.subr.mxu0 %v3584_v0 }
 0xe24   :  { %3418 = vmatprep.subr.mxu1 %v3584_v0 }
 0xede   :  { %v1340_v57 = vpop.f32.mrf.mxu1 }
 0xedf   :  { %v1268_v58 = vpop.f32.mrf.mxu0 }
 0xee0   :  { %v1341_v60 = vadd.f32 %v1340_v57, %v1268_v58  ;;  %v3396_v62 = vpop.f32.mrf.mxu1  ;;  %v1726_v58 = vrot.slane %v3822_v37, 7 }
 0xee1   :  { %v3389_v63 = vpop.f32.mrf.mxu0 }
 0xee2   :  { %v1346_v3 = vadd.f32 %v1344_v61, %v1341_v60 }
 0xee4   :  { %3499 = vtanh.f32 %v1346_v3  ;;  %v3235_v5 = vmul.f32 -1.442695, %v1346_v3 }
 0xee6   :  { %3501 = vpow2.f32 %v3235_v5 }
 0xef1   :  { %v3500_v4 = vpop.eup %3499 }
 0xef2   :  { %1356 = vrot.lane.b32.xlu0 %v3500_v4, %s3588_s17 }
 0xef3   :  { %v3502_v6 = vpop.eup %3501 }
 0xef4   :  { %v1350_v8 = vadd.f32 1.0, %v3502_v6 }
 0xef6   :  { %3503 = vrcp.f32 %v1350_v8 }
 0xf03   :  { %v3504_v9 = vpop.eup %3503 }
 0xf04   :  { %v1371_v13 = vmul.f32 %v3504_v9, %v1181_v47  ;;  %v1354_v14 = vmul.f32 %v3504_v9, %v1173_v46 }
 0xf64   :  { %v1357_v10 = vpop.permute.xlu0 %1356 }
 0xf65   :  { %v1359_v12 = vmul.f32 %v3504_v9, %v1357_v10 }
 0xf67   :  { %1361 = vrot.lane.b32.xlu1 %v1359_v12, %s3586_s16 }
 0xfd9   :  { %v1362_v15 = vpop.permute.xlu1 %1361 }
 0xfda   :  { %v1364_v16 = vadd.f32 %v1362_v15, %v1354_v14  ;;  %v1372_v17 = vadd.f32 %v1371_v13, %v1362_v15 }
 0xfdc   :  { %3505 = vtanh.f32 %v1364_v16 }
 0xfdd   :  { %3507 = vtanh.f32 %v1372_v17 }
 0xfe9   :  { %v3506_v18 = vpop.eup %3505 }
 0xfea   :  { %v3508_v19 = vpop.eup %3507  ;;  %1367 = vrot.lane.b32.xlu0 %v3506_v18, %s3589_s3 }
 0xfeb   :  { %1375 = vrot.lane.b32.xlu1 %v3508_v19, %s3589_s3 }
0x105c   :  { %v1368_v20 = vpop.permute.xlu0 %1367 }
0x105d   :  { %v1376_v21 = vpop.permute.xlu1 %1375  ;;  %v1370_v22 = vmul.f32 %v3504_v9, %v1368_v20 }
0x105e   :  { %v3956_v23 = vmul.f32 %v3504_v9, %v1376_v21 }
0x105f   :  { %1380 = vrot.lane.b32.xlu0 %v1370_v22, %s3587_s28 }
0x1060   :  { %1389 = vrot.lane.b32.xlu1 %v3956_v23, %s3586_s16 }
0x10d1   :  { %v3961_v25 = vpop.permute.xlu0 %1380 }
0x10d2   :  { %v1390_v26 = vpop.permute.xlu1 %1389  ;;  %3409 = vmatmul.mubr.msk.f32.vlgmr.msra.gmra.mxu1 %vm227_vm2, %v3961_v25 }
0x10d3   :  { %3402 = vmatmul.mubr.msk.f32.vlgmr.msra.gmra.mxu0 %vm227_vm2, %v1390_v26  ;;  %3419 = vmatpush3.msra.mxu1 %v3725_v7 }
0x10d4   :  { %3412 = vmatpush3.msra.mxu0 %v3682_v1  ;;  %3420 = vmatprep.subr.mxu1 %v3584_v0  ;;  %v1535_v1 = vrot.slane %v3822_v37, 6 }
0x10d5   :  { %3413 = vmatprep.subr.mxu0 %v3584_v0  ;;  %3421 = vmatpush3.msra.mxu1 %v3746_v11 }
0x10d6   :  { %3414 = vmatpush3.msra.mxu0 %v3687_v2  ;;  %3415 = vmatprep.mubr.msk.f32.mxu0 %vm3585_vm1, %v3584_v0 }
0x10d7   :  { %3422 = vmatprep.mubr.msk.f32.mxu1 %vm3585_vm1, %v3584_v0  ;;  %3425 = vmatprep.subr.mxu0 %v3584_v0 }
0x1192   :  { %v1531_v28 = vpop.f32.mrf.mxu1 }
0x1193   :  { %v1459_v7 = vpop.f32.mrf.mxu0 }
0x1194   :  { %v1532_v29 = vadd.f32 %v1531_v28, %v1459_v7  ;;  %v3410_v30 = vpop.f32.mrf.mxu1 }
0x1195   :  { %v3403_v31 = vpop.f32.mrf.mxu0 }
0x1196   :  { %v1537_v32 = vadd.f32 %v1535_v1, %v1532_v29 }
0x1198   :  { %3509 = vtanh.f32 %v1537_v32  ;;  %v3238_v2 = vmul.f32 -1.442695, %v1537_v32 }
0x119a   :  { %3511 = vpow2.f32 %v3238_v2 }
0x11a5   :  { %v3510_v11 = vpop.eup %3509 }
0x11a6   :  { %1547 = vrot.lane.b32.xlu0 %v3510_v11, %s3588_s17 }
0x11a7   :  { %v3512_v33 = vpop.eup %3511 }
0x11a8   :  { %v1541_v34 = vadd.f32 1.0, %v3512_v33  ;;  %v3590_v33 = vmov -10000.0  }
0x11aa   :  { %3513 = vrcp.f32 %v1541_v34 }
0x11b7   :  { %v3514_v35 = vpop.eup %3513 }
0x11b8   :  { %v1562_v39 = vmul.f32 %v3514_v35, %v1372_v17  ;;  %v1545_v40 = vmul.f32 %v3514_v35, %v1364_v16 }
0x1218   :  { %v1548_v36 = vpop.permute.xlu0 %1547 }
0x1219   :  { %v1550_v38 = vmul.f32 %v3514_v35, %v1548_v36 }
0x121b   :  { %1552 = vrot.lane.b32.xlu1 %v1550_v38, %s3586_s16 }
0x128d   :  { %v1553_v41 = vpop.permute.xlu1 %1552 }
0x128e   :  { %v1555_v42 = vadd.f32 %v1553_v41, %v1545_v40  ;;  %v1563_v43 = vadd.f32 %v1562_v39, %v1553_v41  ;;  %v3591_v41 = vmov 0  }
0x128f   :  { %3448 = vset.pattern.permute.xlu1 %v3591_v41  ;;  %3447 = vset.pattern.permute.xlu0 %v3591_v41 }
0x1290   :  { %3515 = vtanh.f32 %v1555_v42 }
0x1291   :  { %3517 = vtanh.f32 %v1563_v43 }
0x129d   :  { %v3516_v44 = vpop.eup %3515 }
0x129e   :  { %v3518_v45 = vpop.eup %3517  ;;  %1558 = vrot.lane.b32.xlu0 %v3516_v44, %s3589_s3 }
0x129f   :  { %1566 = vrot.lane.b32.xlu1 %v3518_v45, %s3589_s3 }
0x1310   :  { %v1559_v46 = vpop.permute.xlu0 %1558 }
0x1311   :  { %v1567_v47 = vpop.permute.xlu1 %1566  ;;  %v1561_v48 = vmul.f32 %v3514_v35, %v1559_v46 }
0x1312   :  { %v1569_v49 = vmul.f32 %v3514_v35, %v1567_v47 }
0x1313   :  { %1571 = vrot.lane.b32.xlu0 %v1561_v48, %s3587_s28 }
0x1314   :  { %1580 = vrot.lane.b32.xlu1 %v1569_v49, %s3586_s16 }
0x1385   :  { %v3984_v50 = vpop.permute.xlu0 %1571 }
0x1386   :  { %v1581_v51 = vpop.permute.xlu1 %1580  ;;  %3423 = vmatmul.mubr.msk.f32.vlgmr.msra.gmra.mxu1 %vm227_vm2, %v3984_v50 }
0x1387   :  { %3416 = vmatmul.mubr.msk.f32.vlgmr.msra.gmra.mxu0 %vm227_vm2, %v1581_v51 }
0x1388   :  { %3433 = vmatprep.mubr.msk.f32.mxu0 %vm3585_vm1, %v3584_v0 }
0x1446   :  { %v1722_v52 = vpop.f32.mrf.mxu1 }
0x1447   :  { %v1650_v56 = vpop.f32.mrf.mxu0 }
0x1448   :  { %v1723_v57 = vadd.f32 %v1722_v52, %v1650_v56  ;;  %v3424_v60 = vpop.f32.mrf.mxu1 }
0x1449   :  { %v3417_v61 = vpop.f32.mrf.mxu0 }
0x144a   :  { %v1728_v62 = vadd.f32 %v1726_v58, %v1723_v57 }
0x144c   :  { %3519 = vtanh.f32 %v1728_v62  ;;  %v3241_v3 = vmul.f32 -1.442695, %v1728_v62 }
0x144e   :  { %3521 = vpow2.f32 %v3241_v3 }
0x1459   :  { %v3520_v63 = vpop.eup %3519 }
0x145a   :  { %1738 = vrot.lane.b32.xlu0 %v3520_v63, %s3588_s17 }
0x145b   :  { %v3522_v4 = vpop.eup %3521 }
0x145c   :  { %v1732_v5 = vadd.f32 1.0, %v3522_v4 }
0x145e   :  { %3523 = vrcp.f32 %v1732_v5 }
0x146b   :  { %v3524_v6 = vpop.eup %3523 }
0x146c   :  { %v1753_v10 = vmul.f32 %v3524_v6, %v1563_v43  ;;  %v1736_v12 = vmul.f32 %v3524_v6, %v1555_v42  ;;  %v3242_v42 = vld [vmem:[%s4604_s11] ss:$0 sm:$0xff]  ;;  %s3592_s11 = smov [#allocation7]  }
0x146d   :  { %s3176_s18 = sshll.u32 %s3592_s11, 4  ;;  %s3177_s18 = int_to_ptr.vmem [resolvable:$true] %s3176_s18 }
0x146e   :  { %s3537_s29 = scalar_lea.vmem %s3177_s18, 16  ;;  %s3541_s6 = scalar_lea.vmem %s3177_s18, 32 }
0x146f   :  { %p3538_p0 = scmp.ne.s32.totalorder %s3177_s18, %s3537_s29  ;;  %p3542_p1 = scmp.lt.s32.totalorder %s3177_s18, %s3177_s18 }
0x1470   :  { %p3543_p2 = scmp.lt.s32.totalorder %s3541_s6, %s3537_s29 }
0x1472   :  { %p3544_p3 = por %p3543_p2, %p3542_p1 }
0x1474   :  { %p3545_p4 = pnand %p3544_p3, %p3538_p0 }
0x14cc   :  { %v1739_v8 = vpop.permute.xlu0 %1738 }
0x14cd   :  { %v1741_v9 = vmul.f32 %v3524_v6, %v1739_v8 }
0x14cf   :  { %1743 = vrot.lane.b32.xlu1 %v1741_v9, %s3586_s16 }
0x1541   :  { %v1744_v37 = vpop.permute.xlu1 %1743 }
0x1542   :  { %v1746_v13 = vadd.f32 %v1744_v37, %v1736_v12  ;;  %v1754_v14 = vadd.f32 %v1753_v10, %v1744_v37 }
0x1544   :  { %3525 = vtanh.f32 %v1746_v13 }
0x1545   :  { %3527 = vtanh.f32 %v1754_v14 }
0x1551   :  { %v3526_v15 = vpop.eup %3525 }
0x1552   :  { %v3528_v16 = vpop.eup %3527  ;;  %1749 = vrot.lane.b32.xlu0 %v3526_v15, %s3589_s3 }
0x1553   :  { %1757 = vrot.lane.b32.xlu1 %v3528_v16, %s3589_s3 }
0x1556   :  { %429 = vrot.lane.b32.xlu0 %v3829_v59, %s3589_s3  ;;  %v1775_v59 = vld [vmem:[%s4603_s10 + $0x18] sm:$0xff] }
0x1557   :  { %621 = vrot.lane.b32.xlu1 %v3854_v27, %s3589_s3  ;;  %v1774_v27 = vld [vmem:[%s4603_s10 + $0x10] sm:$0xff]  ;;  %3426 = vmatpush3.msra.mxu0 %v1775_v59 }
0x1558   :  { %3427 = vmatprep.subr.mxu0 %v3584_v0 }
0x1559   :  { %3428 = vmatpush3.msra.mxu0 %v1774_v27 }
0x155a   :  { %812 = vrot.lane.b32.xlu0 %v3879_v55, %s3589_s3  ;;  %v1773_v55 = vld [vmem:[%s4603_s10 + $0x8] sm:$0xff]  ;;  %3429 = vmatprep.subr.mxu0 %v3584_v0 }
0x155b   :  { %1003 = vrot.lane.b32.xlu1 %v3904_v24, %s3589_s3  ;;  %v1772_v24 = vld [vmem:[%s4603_s10] sm:$0xff]  ;;  %3430 = vmatpush3.msra.mxu0 %v1773_v55 }
0x155c   :  { %3431 = vmatprep.subr.mxu0 %v3584_v0  ;;  %v1858_v0 = vld [vmem:[%s4605_s12] sm:$0x1f] }
0x155d   :  { %3432 = vmatpush3.msra.mxu0 %v1772_v24 }
0x155e   :  { %1194 = vrot.lane.b32.xlu0 %v3929_v53, %s3589_s3  ;;  %v1856_v53 = vlaneseq }
0x155f   :  { %1385 = vrot.lane.b32.xlu1 %v3956_v23, %s3589_s3 }
0x1560   :  { %v4024_v20 = vshrl.u32 %v1856_v53, 7  ;;  %v4052_v2 = vand.u32 127, %v1856_v53 }
0x1562   :  { %1576 = vrot.lane.b32.xlu0 %v1569_v49, %s3589_s3  ;;  %v4028_v22 = vsub.s32 0, %v4024_v20  ;;  %v4035_v26 = vsub.s32 1, %v4024_v20  ;;  %vm1859_vm5 = vcmp.eq.s32.totalorder %v4052_v2, 3  ;;  %v4062_v39 = vsub.s32 2, %v4024_v20 }
0x1563   :  { %v4073_v47 = vsub.s32 3, %v4024_v20  ;;  %v4077_v49 = vsub.s32 4, %v4024_v20  ;;  %v4114_v10 = vsub.s32 %v4052_v2, %v4024_v20 }
0x1564   :  { %v1880_v7 = vrot.slane %v1858_v0, %v4028_v22  ;;  %v1887_v1 = vrot.slane %v1858_v0, %v4035_v26  ;;  %v1894_v40 = vrot.slane %v1858_v0, %v4062_v39 }
0x1565   :  { %v1901_v48 = vrot.slane %v1858_v0, %v4073_v47 }
0x15c4   :  { %v1750_v17 = vpop.permute.xlu0 %1749 }
0x15c5   :  { %v1758_v18 = vpop.permute.xlu1 %1757  ;;  %v1752_v19 = vmul.f32 %v3524_v6, %v1750_v17 }
0x15c6   :  { %v1760_v21 = vmul.f32 %v3524_v6, %v1758_v18 }
0x15c7   :  { %1762 = vrot.lane.b32.xlu1 %v1752_v19, %s3587_s28 }
0x15c8   :  { %1767 = vrot.lane.b32.xlu0 %v1760_v21, %s3589_s3  ;;  %v430_v23 = vpop.permute.xlu0 %429 }
0x15c9   :  { %v622_v28 = vpop.permute.xlu1 %621  ;;  %432 = vst.msk [vmem:[#allocation3 + $0x7] sm:$0x1] %vm68_vm3, %v430_v23 }
0x15ca   :  { %624 = vst.msk [vmem:[#allocation3 + $0x6] sm:$0x1] %vm68_vm3, %v622_v28 }
0x15cb   :  { %1574 = vst.msk [vmem:[#allocation3 + $0x6] sm:$0x1] %vm62_vm0, %v3984_v50  ;;  %v1908_v50 = vrot.slane %v1858_v0, %v4077_v49 }
0x15cc   :  { %v813_v29 = vpop.permute.xlu0 %812  ;;  %1882 = vbcast.lane.b32.xlu0 %v1880_v7, 256 }
0x15cd   :  { %v1004_v30 = vpop.permute.xlu1 %1003  ;;  %815 = vst.msk [vmem:[#allocation3 + $0x5] sm:$0x1] %vm68_vm3, %v813_v29 }
0x15ce   :  { %1006 = vst.msk [vmem:[#allocation3 + $0x4] sm:$0x1] %vm68_vm3, %v1004_v30 }
0x15cf   :  { %1383 = vst.msk [vmem:[#allocation3 + $0x5] sm:$0x1] %vm62_vm0, %v3961_v25  ;;  %1192 = vst.msk [vmem:[#allocation3 + $0x4] sm:$0x1] %vm62_vm0, %v3934_v54  ;;  %v1860_v25 = vsel %vm1859_vm5, 0.0, %v3590_v33 }
0x15d0   :  { %v1195_v31 = vpop.permute.xlu0 %1194  ;;  %1889 = vbcast.lane.b32.xlu0 %v1887_v1, 256  ;;  %v1861_v34 = vadd.f32 %v1860_v25, %v1858_v0 }
0x15d1   :  { %v1386_v32 = vpop.permute.xlu1 %1385  ;;  %1197 = vst.msk [vmem:[#allocation3 + $0x3] sm:$0x1] %vm68_vm3, %v1195_v31 }
0x15d2   :  { %1388 = vst.msk [vmem:[#allocation3 + $0x2] sm:$0x1] %vm68_vm3, %v1386_v32  ;;  %v1863_v54 = vsel %vm1862_vm6, %v1861_v34, -inf }
0x15d4   :  { %v1577_v11 = vpop.permute.xlu0 %1576  ;;  %1896 = vbcast.lane.b32.xlu0 %v1894_v40, 256 }
0x15d5   :  { %1579 = vst.msk [vmem:[#allocation3 + $0x1] sm:$0x1] %vm68_vm3, %v1577_v11 }
0x15eb   :  { %1864 = vmax.xlane.f32.xlu1 %v1863_v54 }
0x1639   :  { %v1763_v35 = vpop.permute.xlu1 %1762 }
0x163a   :  { %1765 = vst.msk [vmem:[#allocation3 + $0x7] sm:$0x1] %vm62_vm0, %v1763_v35  ;;  %v1768_v36 = vpop.permute.xlu0 %1767 }
0x163b   :  { %1770 = vst.msk [vmem:[#allocation3] sm:$0x1] %vm68_vm3, %v1768_v36 }
0x163e   :  { %v4080_v51 = vpop.permute.xlu0 %1882 }
0x1642   :  { %v1771_v38 = vld [vmem:[#allocation3] sm:$0xff]  ;;  %v4082_v52 = vpop.permute.xlu0 %1889 }
0x1643   :  { %3434 = vmatmul.mubr.msk.f32.vlgmr.msra.gmra.mxu0 %vm145_vm4, %v1771_v38 }
0x1646   :  { %v4084_v56 = vpop.permute.xlu0 %1896 }
0x1674   :  { %v1865_v57 = vpop.xlane.xlu1 %1864 }
0x1703   :  { %v1852_v43 = vpop.f32.mrf.mxu0 }
0x1704   :  { %v4068_v44 = vadd.f32 %v3242_v42, %v1852_v43 }
0x1705   :  { %v3435_v45 = vpop.f32.mrf.mxu0 }
0x1706   :  { %v1870_v46 = vrot.slane %v4068_v44, %v4028_v22  ;;  %v2070_v3 = vrot.slane %v4068_v44, %v4035_v26  ;;  %v2222_v21 = vrot.slane %v4068_v44, %v4062_v39 }
0x1708   :  { %1872 = vbcast.lane.b32.xlu0 %v1870_v46, 256 }
0x170c   :  { %1903 = vbcast.lane.b32.xlu0 %v1901_v48, 256 }
0x1710   :  { %1910 = vbcast.lane.b32.xlu0 %v1908_v50, 256 }
0x177a   :  { %v1873_v58 = vpop.permute.xlu0 %1872 }
0x177b   :  { %v1875_v60 = vadd.f32 %v1873_v58, %v1865_v57 }
0x177d   :  { %v4087_v61 = vadd.f32 %v4084_v56, %v1875_v60  ;;  %v4090_v62 = vadd.f32 %v4080_v51, %v1875_v60  ;;  %v4099_v4 = vadd.f32 %v4082_v52, %v1875_v60 }
0x177e   :  { %v4094_v63 = vpop.permute.xlu0 %1903 }
0x177f   :  { %1934 = vperm.xlu1 %3448, %v4087_v61   ;;  %1928 = vperm.xlu0 %3447, %v4090_v62   ;;  %v4103_v5 = vadd.f32 %v4094_v63, %v1875_v60 }
0x1782   :  { %v4105_v6 = vpop.permute.xlu0 %1910 }
0x1783   :  { %2072 = vbcast.lane.b32.xlu1 %v2070_v3, 256  ;;  %1931 = vperm.xlu0 %3447, %v4099_v4   ;;  %v4109_v8 = vadd.f32 %v4105_v6, %v1875_v60  ;;  %v2374_v3 = vrot.slane %v4068_v44, %v4073_v47 }
0x1785   :  { %4609 = vst [vmem:[#allocation13_spill] sm:$0xff] %v4109_v8 }
0x1787   :  { %1937 = vperm.xlu0 %3447, %v4103_v5  }
0x178b   :  { %1940 = vperm.xlu0 %3447, %v4109_v8  }
0x17fa   :  { %v1929_v9 = vpop.permute.xlu0 %1928  ;;  %v1935_v13 = vpop.permute.xlu1 %1934 }
0x17fb   :  { %v1945_v14 = vrot.slane %v1929_v9, %v4114_v10  ;;  %v1953_v27 = vrot.slane %v1935_v13, %v4114_v10 }
0x17fe   :  { %v1932_v12 = vpop.permute.xlu0 %1931  ;;  %v2073_v23 = vpop.permute.xlu1 %2072 }
0x17ff   :  { %v1949_v37 = vrot.slane %v1932_v12, %v4114_v10 }
0x1801   :  { %v1963_v16 = vsel %vm1962_vm7, %v1949_v37, %v1945_v14 }
0x1802   :  { %v1938_v15 = vpop.permute.xlu0 %1937  ;;  %v1965_v53 = vsel %vm1964_vm8, %v1953_v27, %v1963_v16 }
0x1803   :  { %v1957_v59 = vrot.slane %v1938_v15, %v4114_v10 }
0x1805   :  { %v1967_v17 = vsel %vm1966_vm9, %v1957_v59, %v1965_v53 }
0x1806   :  { %v1941_v55 = vpop.permute.xlu0 %1940 }
0x1807   :  { %v1961_v24 = vrot.slane %v1941_v55, %v4114_v10 }
0x1809   :  { %v1969_v18 = vsel %vm1968_vm10, %v1961_v24, %v1967_v17 }
0x180a   :  { %v1971_v19 = vsel %vm1862_vm6, %v1969_v18, -inf }
0x180b   :  { %1972 = vmax.xlane.f32.xlu0 %v1971_v19 }
0x1821   :  { %2224 = vbcast.lane.b32.xlu0 %v2222_v21, 256 }
0x1894   :  { %v4128_v0 = vpop.xlane.xlu0 %1972 }
0x1895   :  { %v2075_v28 = vadd.f32 %v2073_v23, %v4128_v0 }
0x1897   :  { %v4132_v7 = vadd.f32 %v2075_v28, %v4080_v51  ;;  %v4136_v29 = vadd.f32 %v2075_v28, %v4082_v52  ;;  %v4140_v1 = vadd.f32 %v2075_v28, %v4084_v56  ;;  %v4144_v30 = vadd.f32 %v2075_v28, %v4094_v63 }
0x1898   :  { %v4148_v31 = vadd.f32 %v2075_v28, %v4105_v6  ;;  %v2225_v48 = vpop.permute.xlu0 %2224 }
0x1899   :  { %2087 = vperm.xlu1 %3448, %v4132_v7  }
0x189d   :  { %2090 = vperm.xlu1 %3448, %v4136_v29  }
0x18a1   :  { %2093 = vperm.xlu1 %3448, %v4140_v1  }
0x18a5   :  { %2096 = vperm.xlu1 %3448, %v4144_v30  }
0x18a9   :  { %2099 = vperm.xlu1 %3448, %v4148_v31  }
0x1914   :  { %v2088_v32 = vpop.permute.xlu1 %2087 }
0x1915   :  { %v2104_v35 = vrot.slane %v2088_v32, %v4114_v10 }
0x1918   :  { %v2091_v11 = vpop.permute.xlu1 %2090 }
0x1919   :  { %v2108_v25 = vrot.slane %v2091_v11, %v4114_v10 }
0x191b   :  { %v2121_v38 = vsel %vm1962_vm7, %v2108_v25, %v2104_v35 }
0x191c   :  { %v2094_v33 = vpop.permute.xlu1 %2093 }
0x191d   :  { %v2112_v54 = vrot.slane %v2094_v33, %v4114_v10 }
0x191f   :  { %v2122_v42 = vsel %vm1964_vm8, %v2112_v54, %v2121_v38  ;;  %v2526_v54 = vrot.slane %v4068_v44, %v4077_v49 }
0x1920   :  { %v2097_v34 = vpop.permute.xlu1 %2096 }
0x1921   :  { %v2116_v36 = vrot.slane %v2097_v34, %v4114_v10 }
0x1923   :  { %v2123_v43 = vsel %vm1966_vm9, %v2116_v36, %v2122_v42 }
0x1924   :  { %v2100_v40 = vpop.permute.xlu1 %2099 }
0x1925   :  { %v2120_v41 = vrot.slane %v2100_v40, %v4114_v10 }
0x1927   :  { %v2124_v45 = vsel %vm1968_vm10, %v2120_v41, %v2123_v43 }
0x1928   :  { %v2126_v46 = vsel %vm1862_vm6, %v2124_v45, -inf }
0x1929   :  { %2127 = vmax.xlane.f32.xlu1 %v2126_v46 }
0x19b2   :  { %v4161_v50 = vpop.xlane.xlu1 %2127 }
0x19b3   :  { %v2227_v57 = vadd.f32 %v2225_v48, %v4161_v50 }
0x19b5   :  { %v4165_v58 = vadd.f32 %v2227_v57, %v4105_v6  ;;  %v4168_v60 = vadd.f32 %v2227_v57, %v4080_v51  ;;  %v4175_v9 = vadd.f32 %v2227_v57, %v4082_v52  ;;  %v4179_v12 = vadd.f32 %v2227_v57, %v4084_v56 }
0x19b6   :  { %v4183_v37 = vadd.f32 %v2227_v57, %v4094_v63 }
0x19b7   :  { %2251 = vperm.xlu1 %3448, %v4165_v58   ;;  %2239 = vperm.xlu0 %3447, %v4168_v60  }
0x19bb   :  { %2376 = vbcast.lane.b32.xlu1 %v2374_v3, 256  ;;  %2242 = vperm.xlu0 %3447, %v4175_v9  }
0x19bf   :  { %2245 = vperm.xlu0 %3447, %v4179_v12  }
0x19c3   :  { %2248 = vperm.xlu0 %3447, %v4183_v37  }
0x1a32   :  { %v2240_v13 = vpop.permute.xlu0 %2239  ;;  %v2252_v27 = vpop.permute.xlu1 %2251 }
0x1a33   :  { %v2256_v55 = vrot.slane %v2240_v13, %v4114_v10  ;;  %v2272_v18 = vrot.slane %v2252_v27, %v4114_v10 }
0x1a36   :  { %v2243_v14 = vpop.permute.xlu0 %2242  ;;  %v2377_v32 = vpop.permute.xlu1 %2376 }
0x1a37   :  { %v2260_v16 = vrot.slane %v2243_v14, %v4114_v10 }
0x1a39   :  { %v2273_v53 = vsel %vm1962_vm7, %v2260_v16, %v2256_v55 }
0x1a3a   :  { %v2246_v15 = vpop.permute.xlu0 %2245 }
0x1a3b   :  { %v2264_v59 = vrot.slane %v2246_v15, %v4114_v10 }
0x1a3d   :  { %v2274_v19 = vsel %vm1964_vm8, %v2264_v59, %v2273_v53 }
0x1a3e   :  { %v2249_v24 = vpop.permute.xlu0 %2248 }
0x1a3f   :  { %v2268_v17 = vrot.slane %v2249_v24, %v4114_v10 }
0x1a41   :  { %v2275_v21 = vsel %vm1966_vm9, %v2268_v17, %v2274_v19  ;;  %v2677_v19 = vsub.s32 5, %v4024_v20 }
0x1a42   :  { %v2276_v23 = vsel %vm1968_vm10, %v2272_v18, %v2275_v21 }
0x1a43   :  { %v2278_v28 = vsel %vm1862_vm6, %v2276_v23, -inf  ;;  %v2678_v21 = vrot.slane %v4068_v44, %v2677_v19 }
0x1a44   :  { %2279 = vmax.xlane.f32.xlu0 %v2278_v28 }
0x1acd   :  { %v4196_v11 = vpop.xlane.xlu0 %2279 }
0x1ace   :  { %v2379_v33 = vadd.f32 %v2377_v32, %v4196_v11 }
0x1ad0   :  { %v4200_v25 = vadd.f32 %v2379_v33, %v4105_v6  ;;  %v4203_v34 = vadd.f32 %v2379_v33, %v4080_v51  ;;  %v4210_v35 = vadd.f32 %v2379_v33, %v4082_v52  ;;  %v4214_v36 = vadd.f32 %v2379_v33, %v4084_v56 }
0x1ad1   :  { %v4218_v38 = vadd.f32 %v2379_v33, %v4094_v63 }
0x1ad2   :  { %2403 = vperm.xlu0 %3447, %v4200_v25   ;;  %2391 = vperm.xlu1 %3448, %v4203_v34  }
0x1ad6   :  { %2528 = vbcast.lane.b32.xlu0 %v2526_v54, 256  ;;  %2394 = vperm.xlu1 %3448, %v4210_v35  }
0x1ada   :  { %2397 = vperm.xlu1 %3448, %v4214_v36  }
0x1ade   :  { %2400 = vperm.xlu1 %3448, %v4218_v38  }
0x1b4d   :  { %v2392_v40 = vpop.permute.xlu1 %2391  ;;  %v2404_v46 = vpop.permute.xlu0 %2403 }
0x1b4e   :  { %v2408_v48 = vrot.slane %v2392_v40, %v4114_v10  ;;  %v2424_v14 = vrot.slane %v2404_v46, %v4114_v10 }
0x1b51   :  { %v2395_v41 = vpop.permute.xlu1 %2394  ;;  %v2529_v55 = vpop.permute.xlu0 %2528 }
0x1b52   :  { %v2412_v43 = vrot.slane %v2395_v41, %v4114_v10 }
0x1b54   :  { %v2425_v3 = vsel %vm1962_vm7, %v2412_v43, %v2408_v48 }
0x1b55   :  { %v2398_v42 = vpop.permute.xlu1 %2397 }
0x1b56   :  { %v2416_v45 = vrot.slane %v2398_v42, %v4114_v10 }
0x1b58   :  { %v2426_v15 = vsel %vm1964_vm8, %v2416_v45, %v2425_v3 }
0x1b59   :  { %v2401_v57 = vpop.permute.xlu1 %2400 }
0x1b5a   :  { %v2420_v13 = vrot.slane %v2401_v57, %v4114_v10 }
0x1b5c   :  { %v2427_v16 = vsel %vm1966_vm9, %v2420_v13, %v2426_v15 }
0x1b5d   :  { %v2428_v59 = vsel %vm1968_vm10, %v2424_v14, %v2427_v16 }
0x1b5e   :  { %v2430_v27 = vsel %vm1862_vm6, %v2428_v59, -inf }
0x1b5f   :  { %2431 = vmax.xlane.f32.xlu1 %v2430_v27 }
0x1be8   :  { %v4231_v24 = vpop.xlane.xlu1 %2431 }
0x1be9   :  { %v2531_v53 = vadd.f32 %v2529_v55, %v4231_v24 }
0x1beb   :  { %v4235_v17 = vadd.f32 %v2531_v53, %v4105_v6  ;;  %v4238_v18 = vadd.f32 %v2531_v53, %v4080_v51  ;;  %v4245_v23 = vadd.f32 %v2531_v53, %v4082_v52  ;;  %v4249_v28 = vadd.f32 %v2531_v53, %v4084_v56 }
0x1bec   :  { %v4253_v32 = vadd.f32 %v2531_v53, %v4094_v63 }
0x1bed   :  { %2555 = vperm.xlu1 %3448, %v4235_v17   ;;  %2543 = vperm.xlu0 %3447, %v4238_v18  }
0x1bf1   :  { %2680 = vbcast.lane.b32.xlu1 %v2678_v21, 256  ;;  %2546 = vperm.xlu0 %3447, %v4245_v23   ;;  %v2829_v21 = vsub.s32 6, %v4024_v20 }
0x1bf5   :  { %2549 = vperm.xlu0 %3447, %v4249_v28  }
0x1bf9   :  { %2552 = vperm.xlu0 %3447, %v4253_v32  }
0x1c68   :  { %v2544_v33 = vpop.permute.xlu0 %2543  ;;  %v2556_v43 = vpop.permute.xlu1 %2555 }
0x1c69   :  { %v2560_v45 = vrot.slane %v2544_v33, %v4114_v10  ;;  %v2576_v3 = vrot.slane %v2556_v43, %v4114_v10  ;;  %v2830_v33 = vrot.slane %v4068_v44, %v2829_v21 }
0x1c6c   :  { %v2547_v54 = vpop.permute.xlu0 %2546  ;;  %v2681_v59 = vpop.permute.xlu1 %2680 }
0x1c6d   :  { %v2564_v41 = vrot.slane %v2547_v54, %v4114_v10 }
0x1c6f   :  { %v2577_v48 = vsel %vm1962_vm7, %v2564_v41, %v2560_v45 }
0x1c70   :  { %v2550_v40 = vpop.permute.xlu0 %2549 }
0x1c71   :  { %v2568_v42 = vrot.slane %v2550_v40, %v4114_v10 }
0x1c73   :  { %v2578_v13 = vsel %vm1964_vm8, %v2568_v42, %v2577_v48 }
0x1c74   :  { %v2553_v46 = vpop.permute.xlu0 %2552 }
0x1c75   :  { %v2572_v57 = vrot.slane %v2553_v46, %v4114_v10 }
0x1c77   :  { %v2579_v14 = vsel %vm1966_vm9, %v2572_v57, %v2578_v13 }
0x1c78   :  { %v2580_v15 = vsel %vm1968_vm10, %v2576_v3, %v2579_v14 }
0x1c79   :  { %v2582_v16 = vsel %vm1862_vm6, %v2580_v15, -inf }
0x1c7a   :  { %2583 = vmax.xlane.f32.xlu0 %v2582_v16 }
0x1d03   :  { %v4266_v27 = vpop.xlane.xlu0 %2583 }
0x1d04   :  { %v2683_v55 = vadd.f32 %v2681_v59, %v4266_v27 }
0x1d06   :  { %v4270_v53 = vadd.f32 %v2683_v55, %v4105_v6  ;;  %v4273_v19 = vadd.f32 %v2683_v55, %v4080_v51  ;;  %v4280_v54 = vadd.f32 %v2683_v55, %v4082_v52  ;;  %v4284_v40 = vadd.f32 %v2683_v55, %v4084_v56 }
0x1d07   :  { %v4288_v41 = vadd.f32 %v2683_v55, %v4094_v63 }
0x1d08   :  { %2707 = vperm.xlu0 %3447, %v4270_v53   ;;  %2695 = vperm.xlu1 %3448, %v4273_v19  }
0x1d0c   :  { %2832 = vbcast.lane.b32.xlu0 %v2830_v33, 256  ;;  %2698 = vperm.xlu1 %3448, %v4280_v54  }
0x1d10   :  { %2701 = vperm.xlu1 %3448, %v4284_v40  }
0x1d14   :  { %2704 = vperm.xlu1 %3448, %v4288_v41  }
0x1d83   :  { %v2696_v42 = vpop.permute.xlu1 %2695  ;;  %v2708_v57 = vpop.permute.xlu0 %2707 }
0x1d84   :  { %v2712_v3 = vrot.slane %v2696_v42, %v4114_v10  ;;  %v2728_v16 = vrot.slane %v2708_v57, %v4114_v10 }
0x1d87   :  { %v2699_v43 = vpop.permute.xlu1 %2698 }
0x1d88   :  { %v2716_v46 = vrot.slane %v2699_v43, %v4114_v10  ;;  %v2833_v43 = vpop.permute.xlu0 %2832 }
0x1d8a   :  { %v2729_v14 = vsel %vm1962_vm7, %v2716_v46, %v2712_v3 }
0x1d8b   :  { %v2702_v45 = vpop.permute.xlu1 %2701 }
0x1d8c   :  { %v2720_v48 = vrot.slane %v2702_v45, %v4114_v10 }
0x1d8e   :  { %v2730_v59 = vsel %vm1964_vm8, %v2720_v48, %v2729_v14 }
0x1d8f   :  { %v2705_v13 = vpop.permute.xlu1 %2704 }
0x1d90   :  { %v2724_v15 = vrot.slane %v2705_v13, %v4114_v10 }
0x1d92   :  { %v2731_v55 = vsel %vm1966_vm9, %v2724_v15, %v2730_v59 }
0x1d93   :  { %v2732_v21 = vsel %vm1968_vm10, %v2728_v16, %v2731_v55 }
0x1d94   :  { %v2734_v33 = vsel %vm1862_vm6, %v2732_v21, -inf }
0x1d95   :  { %2735 = vmax.xlane.f32.xlu1 %v2734_v33 }
0x1e1e   :  { %v4301_v45 = vpop.xlane.xlu1 %2735 }
0x1e1f   :  { %v2835_v42 = vadd.f32 %v2833_v43, %v4301_v45 }
0x1e21   :  { %v2840_v46 = vadd.f32 %v2835_v42, %v4105_v6  ;;  %v2836_v3 = vadd.f32 %v2835_v42, %v4080_v51  ;;  %v2837_v48 = vadd.f32 %v2835_v42, %v4082_v52  ;;  %v2838_v57 = vadd.f32 %v2835_v42, %v4084_v56 }
0x1e22   :  { %v2839_v13 = vadd.f32 %v2835_v42, %v4094_v63 }
0x1e23   :  { %2859 = vperm.xlu1 %3448, %v2840_v46   ;;  %2847 = vperm.xlu0 %3447, %v2836_v3  }
0x1e27   :  { %2850 = vperm.xlu0 %3447, %v2837_v48   ;;  %2006 = vbcast.lane.b32.xlu1 %v4052_v2, 256 }
0x1e2b   :  { %2853 = vperm.xlu0 %3447, %v2838_v57  }
0x1e2f   :  { %2856 = vperm.xlu0 %3447, %v2839_v13  }
0x1e9e   :  { %v2848_v14 = vpop.permute.xlu0 %2847  ;;  %v2860_v55 = vpop.permute.xlu1 %2859 }
0x1e9f   :  { %v2864_v21 = vrot.slane %v2848_v14, %v4114_v10  ;;  %v2880_v56 = vrot.slane %v2860_v55, %v4114_v10 }
0x1ea2   :  { %v2851_v15 = vpop.permute.xlu0 %2850 }
0x1ea3   :  { %v2868_v59 = vrot.slane %v2851_v15, %v4114_v10 }
0x1ea5   :  { %v2881_v33 = vsel %vm1962_vm7, %v2868_v59, %v2864_v21  ;;  %v4328_v21 = vpop.permute.xlu1 %2006 }
0x1ea6   :  { %v2854_v16 = vpop.permute.xlu0 %2853 }
0x1ea7   :  { %v2872_v51 = vrot.slane %v2854_v16, %v4114_v10 }
0x1ea9   :  { %v2882_v63 = vsel %vm1964_vm8, %v2872_v51, %v2881_v33  ;;  %v2741_v51 = vrot.slane %v4301_v45, %v4028_v22 }
0x1eaa   :  { %v2857_v52 = vpop.permute.xlu0 %2856 }
0x1eab   :  { %v2876_v43 = vrot.slane %v2857_v52, %v4114_v10  ;;  %vm2763_vm14 = vcmp.ge.f32.partialorder %v4273_v19, %v2741_v51 }
0x1ead   :  { %v2883_v42 = vsel %vm1966_vm9, %v2876_v43, %v2882_v63  ;;  %v2745_v43 = vrot.slane %v4301_v45, %v4035_v26 }
0x1eae   :  { %v2884_v8 = vsel %vm1968_vm10, %v2880_v56, %v2883_v42  ;;  %v2981_v42 = vsub.s32 7, %v4024_v20  ;;  %v2597_v20 = vrot.slane %v4266_v27, %v4062_v39 }
0x1eaf   :  { %v2886_v15 = vsel %vm1862_vm6, %v2884_v8, -inf  ;;  %vm2764_vm0 = vcmp.ge.f32.partialorder %v4280_v54, %v2745_v43 }
0x1eb0   :  { %2887 = vmax.xlane.f32.xlu0 %v2886_v15  ;;  %v2769_v63 = vsel %vm2764_vm0, %v4328_v21, 5  ;;  %v2982_v54 = vrot.slane %v4068_v44, %v2981_v42 }
0x1f39   :  { %v4320_v16 = vpop.xlane.xlu0 %2887 }
0x1f3a   :  { %v2909_v14 = vrot.slane %v4320_v16, %v4077_v49  ;;  %v2893_v59 = vrot.slane %v4320_v16, %v4028_v22  ;;  %v2897_v55 = vrot.slane %v4320_v16, %v4035_v26  ;;  %v2901_v33 = vrot.slane %v4320_v16, %v4062_v39 }
0x1f3b   :  { %v2905_v56 = vrot.slane %v4320_v16, %v4073_v47 }
0x1f3c   :  { %vm2919_vm11 = vcmp.ge.f32.partialorder %v2840_v46, %v2909_v14  ;;  %vm2915_vm12 = vcmp.ge.f32.partialorder %v2836_v3, %v2893_v59  ;;  %vm2916_vm13 = vcmp.ge.f32.partialorder %v2837_v48, %v2897_v55  ;;  %v2768_v3 = vsel %vm2763_vm14, %v4328_v21, 5 }
0x1f3d   :  { %v2924_v8 = vsel %vm2919_vm11, %v4328_v21, 5  ;;  %v2920_v52 = vsel %vm2915_vm12, %v4328_v21, 5  ;;  %v2921_v46 = vsel %vm2916_vm13, %v4328_v21, 5  ;;  %vm2917_vm15 = vcmp.ge.f32.partialorder %v2838_v57, %v2901_v33 }
0x1f3e   :  { %2938 = vperm.xlu0 %3447, %v2924_v8   ;;  %2926 = vperm.xlu1 %3448, %v2920_v52   ;;  %v2749_v48 = vrot.slane %v4301_v45, %v4062_v39  ;;  %v2922_v19 = vsel %vm2917_vm15, %v4328_v21, 5  ;;  %vm2918_vm1 = vcmp.ge.f32.partialorder %v2839_v13, %v2905_v56  ;;  %v2589_v14 = vrot.slane %v4266_v27, %v4028_v22 }
0x1f3f   :  { %v2923_v57 = vsel %vm2918_vm1, %v4328_v21, 5  ;;  %v2593_v13 = vrot.slane %v4266_v27, %v4035_v26  ;;  %vm2613_vm11 = vcmp.ge.f32.partialorder %v4249_v28, %v2597_v20  ;;  %vm2989_vm12 = vcmask 4096  }
0x1f40   :  { %vm2765_vm2 = vcmp.ge.f32.partialorder %v4284_v40, %v2749_v48  ;;  %vm2611_vm3 = vcmp.ge.f32.partialorder %v4238_v18, %v2589_v14  ;;  %v2618_v44 = vsel %vm2613_vm11, %v4328_v21, 5  ;;  %vm3014_vm13 = vcmask 0  }
0x1f41   :  { %v2770_v15 = vsel %vm2765_vm2, %v4328_v21, 5  ;;  %v2616_v40 = vsel %vm2611_vm3, %v4328_v21, 5  ;;  %vm2612_vm4 = vcmp.ge.f32.partialorder %v4245_v23, %v2593_v13 }
0x1f42   :  { %2929 = vperm.xlu1 %3448, %v2921_v46   ;;  %2774 = vperm.xlu0 %3447, %v2768_v3   ;;  %v2617_v59 = vsel %vm2612_vm4, %v4328_v21, 5 }
0x1f46   :  { %2932 = vperm.xlu1 %3448, %v2922_v19   ;;  %2777 = vperm.xlu0 %3447, %v2769_v63  }
0x1f4a   :  { %2935 = vperm.xlu1 %3448, %v2923_v57   ;;  %2780 = vperm.xlu0 %3447, %v2770_v15  }
0x1f4e   :  { %2984 = vbcast.lane.b32.xlu1 %v2982_v54, 256 }
0x1f52   :  { %2622 = vperm.xlu1 %3448, %v2616_v40  }
0x1f56   :  { %2625 = vperm.xlu1 %3448, %v2617_v59  }
0x1f5a   :  { %2628 = vperm.xlu1 %3448, %v2618_v44  }
0x1fb9   :  { %v2927_v18 = vpop.permute.xlu1 %2926  ;;  %v2939_v33 = vpop.permute.xlu0 %2938 }
0x1fba   :  { %v2943_v23 = vrot.slane %v2927_v18, %v4114_v10  ;;  %v2959_v28 = vrot.slane %v2939_v33, %v4114_v10 }
0x1fbd   :  { %v2930_v55 = vpop.permute.xlu1 %2929 }
0x1fbe   :  { %v2947_v8 = vrot.slane %v2930_v55, %v4114_v10 }
0x1fc0   :  { %v2960_v46 = vsel %vm1962_vm7, %v2947_v8, %v2943_v23  ;;  %v2775_v23 = vpop.permute.xlu0 %2774 }
0x1fc1   :  { %v2933_v51 = vpop.permute.xlu1 %2932 }
0x1fc2   :  { %v2951_v52 = vrot.slane %v2933_v51, %v4114_v10  ;;  %v2601_v51 = vrot.slane %v4266_v27, %v4073_v47 }
0x1fc4   :  { %v2961_v56 = vsel %vm1964_vm8, %v2951_v52, %v2960_v46  ;;  %vm2614_vm15 = vcmp.ge.f32.partialorder %v4253_v32, %v2601_v51  ;;  %v2778_v46 = vpop.permute.xlu0 %2777  ;;  %v2605_v51 = vrot.slane %v4266_v27, %v4077_v49 }
0x1fc5   :  { %v2936_v43 = vpop.permute.xlu1 %2935  ;;  %v2619_v52 = vsel %vm2614_vm15, %v4328_v21, 5 }
0x1fc6   :  { %v2955_v3 = vrot.slane %v2936_v43, %v4114_v10  ;;  %vm2615_vm2 = vcmp.ge.f32.partialorder %v4235_v17, %v2605_v51  ;;  %v2445_v51 = vrot.slane %v4231_v24, %v4062_v39 }
0x1fc8   :  { %v2962_v48 = vsel %vm1966_vm9, %v2955_v3, %v2961_v56  ;;  %v2781_v3 = vpop.permute.xlu0 %2780 }
0x1fc9   :  { %v2985_v19 = vpop.permute.xlu1 %2984  ;;  %v2963_v63 = vsel %vm1968_vm10, %v2959_v28, %v2962_v48 }
0x1fca   :  { %v2987_v42 = vadd.f32 %v2985_v19, %v4320_v16  ;;  %v2964_v57 = vsel %vm1862_vm6, %v2963_v63, 2147483647  ;;  %v2753_v16 = vrot.slane %v4301_v45, %v4073_v47  ;;  %v2795_v19 = vrot.slane %v2778_v46, %v4114_v10 }
0x1fcb   :  { %v2966_v15 = vshra.s32 %v2964_v57, 16 }
0x1fcc   :  { %v2988_v54 = vadd.f32 %v2987_v42, %v4105_v6  ;;  %vm2766_vm14 = vcmp.ge.f32.partialorder %v4288_v41, %v2753_v16  ;;  %v2757_v6 = vrot.slane %v4301_v45, %v4077_v49  ;;  %v2965_v45 = vand.u32 65535, %v2964_v57 }
0x1fcd   :  { %v2968_v14 = vcvt.s32.f32 %v2966_v15  ;;  %v2771_v8 = vsel %vm2766_vm14, %v4328_v21, 5  ;;  %v2623_v43 = vpop.permute.xlu1 %2622  ;;  %v2799_v42 = vrot.slane %v2781_v3, %v4114_v10  ;;  %v2791_v15 = vrot.slane %v2775_v23, %v4114_v10 }
0x1fce   :  { %v2990_v13 = vsel %vm2989_vm12, %v2988_v54, -inf  ;;  %vm2767_vm0 = vcmp.ge.f32.partialorder %v4270_v53, %v2757_v6  ;;  %v2967_v32 = vcvt.s32.f32 %v2965_v45  ;;  %v2620_v6 = vsel %vm2615_vm2, %v4328_v21, 5 }
0x1fcf   :  { %v2991_v40 = vrot.slane %v2990_v13, 4  ;;  %2969 = vmin.xlane.f32.xlu1 %v2968_v14  ;;  %v2772_v33 = vsel %vm2767_vm0, %v4328_v21, 5  ;;  %v2639_v17 = vrot.slane %v2623_v43, %v4114_v10  ;;  %vm2461_vm0 = vcmp.ge.f32.partialorder %v4214_v36, %v2445_v51 }
0x1fd1   :  { %v2992_v20 = vmax.f32 %v2990_v13, %v2991_v40  ;;  %v2626_v41 = vpop.permute.xlu1 %2625  ;;  %v2808_v40 = vsel %vm1962_vm7, %v2795_v19, %v2791_v15 }
0x1fd2   :  { %v2809_v57 = vsel %vm1964_vm8, %v2799_v42, %v2808_v40 }
0x1fd3   :  { %v2993_v59 = vrot.slane %v2992_v20, 2 }
0x1fd5   :  { %v2994_v44 = vmax.f32 %v2992_v20, %v2993_v59  ;;  %v2629_v28 = vpop.permute.xlu1 %2628 }
0x1fd6   :  { %v2647_v27 = vrot.slane %v2629_v28, %v4114_v10 }
0x1fd7   :  { %v2995_v18 = vrot.slane %v2994_v44, 1 }
0x1fd9   :  { %v2996_v55 = vmax.f32 %v2994_v44, %v2995_v18 }
0x1fdb   :  { %2999 = vperm.xlu0 %3447, %v2996_v55   ;;  %3015 = vst.msk [vmem:[#allocation7] sm:$0x1] %vm3014_vm13, %v2996_v55 }
0x1fdf   :  { %2783 = vperm.xlu0 %3447, %v2771_v8  }
0x1fe0   :  { %2631 = vperm.xlu1 %3448, %v2619_v52  }
0x1fe3   :  { %2786 = vperm.xlu0 %3447, %v2772_v33  }
0x2056   :  { %v3000_v56 = vpop.permute.xlu0 %2999 }
0x2057   :  { %vm3002_vm3 = vcmp.ge.f32.partialorder %v2988_v54, %v3000_v56 }
0x2058   :  { %v4390_v48 = vpop.xlane.xlu1 %2969  ;;  %v3003_v52 = vsel %vm3002_vm3, %v4328_v21, 5  ;;  %vm3027_vm3 = vcmask 32768  }
0x2059   :  { %vm2971_vm1 = vcmp.eq.f32.partialorder %v2968_v14, %v4390_v48  ;;  %v3004_v3 = vsel %vm2989_vm12, %v3003_v52, 2147483647 }
0x205a   :  { %v2784_v63 = vpop.permute.xlu0 %2783  ;;  %v2972_v53 = vsel %vm2971_vm1, %v2967_v32, inf  ;;  %v2643_v32 = vrot.slane %v2626_v41, %v4114_v10  ;;  %v3005_v19 = vrot.slane %v3004_v3, 4 }
0x205b   :  { %v2803_v13 = vrot.slane %v2784_v63, %v4114_v10 }
0x205c   :  { %v2632_v45 = vpop.permute.xlu1 %2631  ;;  %v2656_v54 = vsel %vm1962_vm7, %v2643_v32, %v2639_v17  ;;  %vm3006_vm11 = vcmp.lt.s32.totalorder %v3004_v3, %v3005_v19 }
0x205d   :  { %v2810_v44 = vsel %vm1966_vm9, %v2803_v13, %v2809_v57  ;;  %v2651_v63 = vrot.slane %v2632_v45, %v4114_v10  ;;  %v2657_v42 = vsel %vm1964_vm8, %v2647_v27, %v2656_v54  ;;  %v3007_v28 = vsel %vm3006_vm11, %v3004_v3, %v3005_v19 }
0x205e   :  { %v2787_v20 = vpop.permute.xlu0 %2786  ;;  %v3008_v57 = vrot.slane %v3007_v28, 2  ;;  %v2976_v19 = vcvt.f32.s32 %v4390_v48  ;;  %v2453_v48 = vrot.slane %v4231_v24, %v4077_v49 }
0x205f   :  { %v2807_v59 = vrot.slane %v2787_v20, %v4114_v10  ;;  %v2658_v13 = vsel %vm1966_vm9, %v2651_v63, %v2657_v42 }
0x2060   :  { %vm3009_vm12 = vcmp.lt.s32.totalorder %v3007_v28, %v3008_v57  ;;  %v2977_v63 = vshll.u32 %v2976_v19, 16  ;;  %vm2463_vm11 = vcmp.ge.f32.partialorder %v4200_v25, %v2453_v48  ;;  %v2297_v25 = vrot.slane %v4196_v11, %v4073_v47 }
0x2061   :  { %v2811_v14 = vsel %vm1968_vm10, %v2807_v59, %v2810_v44  ;;  %v2441_v59 = vrot.slane %v4231_v24, %v4035_v26  ;;  %v3010_v44 = vsel %vm3009_vm12, %v3007_v28, %v3008_v57  ;;  %v2293_v57 = vrot.slane %v4196_v11, %v4062_v39 }
0x2062   :  { %v2812_v18 = vsel %vm1862_vm6, %v2811_v14, 2147483647 }
0x2063   :  { %v2814_v55 = vshra.s32 %v2812_v18, 16  ;;  %v2813_v8 = vand.u32 65535, %v2812_v18  ;;  %vm2460_vm13 = vcmp.ge.f32.partialorder %v4210_v35, %v2441_v59  ;;  %v3011_v18 = vrot.slane %v3010_v44, 1 }
0x2064   :  { %v2465_v14 = vsel %vm2460_vm13, %v4328_v21, 5  ;;  %v2449_v35 = vrot.slane %v4231_v24, %v4073_v47  ;;  %vm2309_vm13 = vcmp.ge.f32.partialorder %v4179_v12, %v2293_v57 }
0x2065   :  { %v2816_v16 = vcvt.s32.f32 %v2814_v55  ;;  %v2815_v23 = vcvt.s32.f32 %v2813_v8  ;;  %vm3012_vm14 = vcmp.lt.s32.totalorder %v3010_v44, %v3011_v18  ;;  %v2466_v8 = vsel %vm2461_vm0, %v4328_v21, 5 }
0x2066   :  { %v3013_v55 = vsel %vm3012_vm14, %v3010_v44, %v3011_v18  ;;  %vm2462_vm1 = vcmp.ge.f32.partialorder %v4218_v38, %v2449_v35  ;;  %vm2310_vm14 = vcmp.ge.f32.partialorder %v4183_v37, %v2297_v25  ;;  %vm3041_vm0 = vcmp.eq.s32.totalorder %v4052_v2, 6 }
0x2067   :  { %2817 = vmin.xlane.f32.xlu0 %v2816_v16  ;;  %v2315_v44 = vsel %vm2310_vm14, %v4328_v21, 5 }
0x207d   :  { %2634 = vperm.xlu0 %3447, %v2620_v6  }
0x20f0   :  { %v2818_v33 = vpop.xlane.xlu0 %2817 }
0x20f1   :  { %vm2819_vm4 = vcmp.eq.f32.partialorder %v2816_v16, %v2818_v33  ;;  %v2437_v16 = vrot.slane %v4231_v24, %v4028_v22  ;;  %v2314_v24 = vsel %vm2309_vm13, %v4328_v21, 5 }
0x20f2   :  { %v2820_v46 = vsel %vm2819_vm4, %v2815_v23, inf }
0x20f3   :  { %2821 = vmin.xlane.f32.xlu0 %v2820_v46  ;;  %vm2459_vm15 = vcmp.ge.f32.partialorder %v4203_v34, %v2437_v16  ;;  %v2824_v34 = vcvt.f32.s32 %v2818_v33 }
0x20f4   :  { %v2464_v6 = vsel %vm2459_vm15, %v4328_v21, 5  ;;  %vm3016_vm15 = vcmp.eq.s32.totalorder %v4052_v2, 7 }
0x20f5   :  { %v2825_v23 = vshll.u32 %v2824_v34, 16 }
0x20f8   :  { %v2635_v56 = vpop.permute.xlu0 %2634 }
0x20f9   :  { %v2655_v15 = vrot.slane %v2635_v56, %v4114_v10 }
0x20fb   :  { %v2659_v40 = vsel %vm1968_vm10, %v2655_v15, %v2658_v13 }
0x20fc   :  { %v2660_v41 = vsel %vm1862_vm6, %v2659_v40, 2147483647 }
0x20fd   :  { %v2662_v20 = vshra.s32 %v2660_v41, 16  ;;  %v2661_v45 = vand.u32 65535, %v2660_v41 }
0x20ff   :  { %v2664_v43 = vcvt.s32.f32 %v2662_v20  ;;  %v2663_v36 = vcvt.s32.f32 %v2661_v45  ;;  %v2468_v20 = vsel %vm2463_vm11, %v4328_v21, 5 }
0x2101   :  { %2665 = vmin.xlane.f32.xlu1 %v2664_v43 }
0x2109   :  { %2473 = vperm.xlu0 %3447, %v2465_v14  }
0x2112   :  { %3018 = vperm.xlu1 %3448, %v3013_v55  }
0x2136   :  { %2973 = vmin.xlane.f32.xlu1 %v2972_v53  ;;  %v2467_v53 = vsel %vm2462_vm1, %v4328_v21, 5 }
0x2147   :  { %2470 = vperm.xlu1 %3448, %v2464_v6  }
0x214b   :  { %2476 = vperm.xlu1 %3448, %v2466_v8  }
0x214f   :  { %2479 = vperm.xlu1 %3448, %v2467_v53  }
0x217c   :  { %v2822_v52 = vpop.xlane.xlu0 %2821 }
0x217d   :  { %v2823_v46 = vcvt.f32.s32 %v2822_v52 }
0x217f   :  { %v4435_v3 = vadd.s32 %v2825_v23, %v2823_v46 }
0x2181   :  { %v3047_v23 = vrot.slane %v4435_v3, %v4114_v10 }
0x2184   :  { %v2474_v51 = vpop.permute.xlu0 %2473 }
0x2185   :  { %v2491_v37 = vrot.slane %v2474_v51, %v4114_v10 }
0x218a   :  { %v4437_v32 = vpop.xlane.xlu1 %2665 }
0x218b   :  { %vm2667_vm2 = vcmp.eq.f32.partialorder %v2664_v43, %v4437_v32  ;;  %v2285_v43 = vrot.slane %v4196_v11, %v4028_v22 }
0x218c   :  { %v2668_v27 = vsel %vm2667_vm2, %v2663_v36, inf }
0x218d   :  { %vm2307_vm12 = vcmp.ge.f32.partialorder %v4168_v60, %v2285_v43 }
0x218e   :  { %v3019_v17 = vpop.permute.xlu1 %3018  ;;  %v2312_v59 = vsel %vm2307_vm12, %v4328_v21, 5 }
0x218f   :  { %vm3021_vm4 = vcmp.eq.s32.totalorder %v4052_v2, %v3019_v17  ;;  %v3020_v46 = vsel %vm3016_vm15, %v3019_v17, 0  ;;  %vm3062_vm15 = vcmp.eq.s32.totalorder %v4052_v2, 5 }
0x21bf   :  { %v2974_v38 = vpop.xlane.xlu1 %2973 }
0x21c0   :  { %v2975_v54 = vcvt.f32.s32 %v2974_v38 }
0x21c2   :  { %v2978_v56 = vadd.s32 %v2977_v63, %v2975_v54 }
0x21c3   :  { %v2471_v60 = vpop.permute.xlu1 %2470 }
0x21c4   :  { %v3025_v33 = vrot.slane %v2978_v56, %v4114_v10  ;;  %v2487_v6 = vrot.slane %v2471_v60, %v4114_v10 }
0x21c6   :  { %v3026_v42 = vsel %vm3021_vm4, %v3025_v33, 0  ;;  %v2504_v45 = vsel %vm1962_vm7, %v2491_v37, %v2487_v6 }
0x21c7   :  { %v3028_v15 = vsel %vm3027_vm3, %v3026_v42, 0  ;;  %v2477_v14 = vpop.permute.xlu1 %2476  ;;  %v2289_v42 = vrot.slane %v4196_v11, %v4035_v26 }
0x21c8   :  { %v3030_v13 = vshrl.u32 %v3028_v15, 16  ;;  %v3029_v41 = vand.u32 65535, %v3028_v15  ;;  %v2495_v35 = vrot.slane %v2477_v14, %v4114_v10  ;;  %v2301_v15 = vrot.slane %v4196_v11, %v4077_v49 }
0x21c9   :  { %vm2308_vm2 = vcmp.ge.f32.partialorder %v4175_v9, %v2289_v42 }
0x21ca   :  { %v3032_v40 = vcvt.s32.f32 %v3030_v13  ;;  %v3031_v28 = vcvt.s32.f32 %v3029_v41  ;;  %v2313_v13 = vsel %vm2308_vm2, %v4328_v21, 5  ;;  %vm2311_vm4 = vcmp.ge.f32.partialorder %v4165_v58, %v2301_v15 }
0x21cb   :  { %v2480_v18 = vpop.permute.xlu1 %2479  ;;  %v2672_v41 = vcvt.f32.s32 %v4437_v32 }
0x21cc   :  { %3035 = vadd.xlane.f32.xlu1 %v3032_v40  ;;  %v2499_v34 = vrot.slane %v2480_v18, %v4114_v10  ;;  %v2316_v40 = vsel %vm2311_vm4, %v4328_v21, 5 }
0x21cd   :  { %v2673_v48 = vshll.u32 %v2672_v41, 16 }
0x21d0   :  { %3033 = vadd.xlane.f32.xlu1 %v3031_v28 }
0x21e1   :  { %2482 = vperm.xlu1 %3448, %v2468_v20  }
0x2205   :  { %2669 = vmin.xlane.f32.xlu1 %v2668_v27  ;;  %v2505_v27 = vsel %vm1964_vm8, %v2495_v35, %v2504_v45 }
0x2206   :  { %v2506_v63 = vsel %vm1966_vm9, %v2499_v34, %v2505_v27 }
0x2216   :  { %2318 = vperm.xlu1 %3448, %v2312_v59  }
0x221a   :  { %2324 = vperm.xlu1 %3448, %v2314_v24  }
0x221e   :  { %2327 = vperm.xlu1 %3448, %v2315_v44  }
0x2255   :  { %v3036_v55 = vpop.xlane.xlu1 %3035 }
0x2256   :  { %v3038_v16 = vcvt.f32.s32 %v3036_v55 }
0x2258   :  { %v3039_v8 = vshll.u32 %v3038_v16, 16 }
0x2259   :  { %v3034_v12 = vpop.xlane.xlu1 %3033 }
0x225a   :  { %v3037_v53 = vcvt.f32.s32 %v3034_v12 }
0x225c   :  { %v3040_v52 = vadd.s32 %v3039_v8, %v3037_v53 }
0x225d   :  { %v2483_v36 = vpop.permute.xlu1 %2482 }
0x225e   :  { %v4470_v19 = vsel %vm3041_vm0, %v3040_v52, %v3020_v46  ;;  %vm3043_vm1 = vcmp.eq.s32.totalorder %v4052_v2, %v3040_v52  ;;  %v2503_v38 = vrot.slane %v2483_v36, %v4114_v10  ;;  %v2133_v36 = vrot.slane %v4161_v50, %v4028_v22 }
0x225f   :  { %v3048_v54 = vsel %vm3043_vm1, %v3047_v23, 0 }
0x2260   :  { %v2507_v56 = vsel %vm1968_vm10, %v2503_v38, %v2506_v63  ;;  %v3049_v9 = vsel %vm3027_vm3, %v3048_v54, 0  ;;  %vm2155_vm12 = vcmp.ge.f32.partialorder %v4132_v7, %v2133_v36  ;;  %v2137_v38 = vrot.slane %v4161_v50, %v4035_v26 }
0x2261   :  { %v2508_v33 = vsel %vm1862_vm6, %v2507_v56, 2147483647  ;;  %v3051_v24 = vshrl.u32 %v3049_v9, 16  ;;  %v3050_v14 = vand.u32 65535, %v3049_v9  ;;  %v2160_v27 = vsel %vm2155_vm12, %v4328_v21, 5 }
0x2262   :  { %v2510_v3 = vshra.s32 %v2508_v33, 16  ;;  %v2509_v59 = vand.u32 65535, %v2508_v33  ;;  %vm2156_vm13 = vcmp.ge.f32.partialorder %v4136_v29, %v2137_v38  ;;  %v2141_v63 = vrot.slane %v4161_v50, %v4062_v39 }
0x2263   :  { %v3053_v58 = vcvt.s32.f32 %v3051_v24  ;;  %v3052_v51 = vcvt.s32.f32 %v3050_v14  ;;  %v2161_v54 = vsel %vm2156_vm13, %v4328_v21, 5  ;;  %v2149_v24 = vrot.slane %v4161_v50, %v4077_v49 }
0x2264   :  { %v2512_v17 = vcvt.s32.f32 %v2510_v3  ;;  %v2511_v11 = vcvt.s32.f32 %v2509_v59  ;;  %vm2157_vm14 = vcmp.ge.f32.partialorder %v4140_v1, %v2141_v63 }
0x2265   :  { %v2162_v56 = vsel %vm2157_vm14, %v4328_v21, 5  ;;  %vm2159_vm1 = vcmp.ge.f32.partialorder %v4148_v31, %v2149_v24  ;;  %v1978_v31 = vrot.slane %v4128_v0, %v4028_v22  ;;  %vm3083_vm14 = vcmp.eq.s32.totalorder %v4052_v2, 4 }
0x2266   :  { %2513 = vmin.xlane.f32.xlu0 %v2512_v17 }
0x227c   :  { %2321 = vperm.xlu0 %3447, %v2313_v13  }
0x2280   :  { %2330 = vperm.xlu0 %3447, %v2316_v40  }
0x228e   :  { %v2670_v28 = vpop.xlane.xlu1 %2669 }
0x228f   :  { %v2671_v20 = vcvt.f32.s32 %v2670_v28 }
0x2291   :  { %v2674_v43 = vadd.s32 %v2673_v48, %v2671_v20 }
0x2292   :  { %v2319_v57 = vpop.permute.xlu1 %2318 }
0x2293   :  { %v2335_v55 = vrot.slane %v2319_v57, %v4114_v10  ;;  %v3068_v48 = vrot.slane %v2674_v43, %v4114_v10  ;;  %v2164_v43 = vsel %vm2159_vm1, %v4328_v21, 5 }
0x2296   :  { %v2325_v44 = vpop.permute.xlu1 %2324 }
0x2297   :  { %v2343_v6 = vrot.slane %v2325_v44, %v4114_v10 }
0x229a   :  { %v2328_v18 = vpop.permute.xlu1 %2327 }
0x229b   :  { %v2347_v12 = vrot.slane %v2328_v18, %v4114_v10 }
0x22ef   :  { %v2514_v25 = vpop.xlane.xlu0 %2513 }
0x22f0   :  { %vm2515_vm11 = vcmp.eq.f32.partialorder %v2512_v17, %v2514_v25  ;;  %v2520_v7 = vcvt.f32.s32 %v2514_v25 }
0x22f1   :  { %v2516_v60 = vsel %vm2515_vm11, %v2511_v11, inf  ;;  %vm2000_vm11 = vcmp.ge.f32.partialorder %v4090_v62, %v1978_v31 }
0x22f2   :  { %2517 = vmin.xlane.f32.xlu0 %v2516_v60  ;;  %v2521_v3 = vshll.u32 %v2520_v7, 16  ;;  %v1982_v7 = vrot.slane %v4128_v0, %v4035_v26  ;;  %v1994_v26 = vrot.slane %v4128_v0, %v4077_v49 }
0x22f6   :  { %3056 = vadd.xlane.f32.xlu0 %v3053_v58 }
0x22f7   :  { %v2322_v32 = vpop.permute.xlu0 %2321 }
0x22f8   :  { %v2339_v16 = vrot.slane %v2322_v32, %v4114_v10  ;;  %v1990_v32 = vrot.slane %v4128_v0, %v4073_v47 }
0x22fa   :  { %v2352_v35 = vsel %vm1962_vm7, %v2339_v16, %v2335_v55  ;;  %3054 = vadd.xlane.f32.xlu0 %v3052_v51  ;;  %vm2003_vm13 = vcmp.ge.f32.partialorder %v4103_v5, %v1990_v32 }
0x22fb   :  { %v2353_v8 = vsel %vm1964_vm8, %v2343_v6, %v2352_v35  ;;  %v2331_v53 = vpop.permute.xlu0 %2330  ;;  %v2011_v22 = vsel %vm2003_vm13, %v4328_v21, 5 }
0x22fc   :  { %v2351_v37 = vrot.slane %v2331_v53, %v4114_v10  ;;  %v2354_v34 = vsel %vm1966_vm9, %v2347_v12, %v2353_v8 }
0x22fe   :  { %v2355_v52 = vsel %vm1968_vm10, %v2351_v37, %v2354_v34 }
0x22ff   :  { %v2356_v23 = vsel %vm1862_vm6, %v2355_v52, 2147483647 }
0x2300   :  { %v2358_v46 = vshra.s32 %v2356_v23, 16  ;;  %v2357_v58 = vand.u32 65535, %v2356_v23 }
0x2302   :  { %v2360_v45 = vcvt.s32.f32 %v2358_v46  ;;  %v2359_v14 = vcvt.s32.f32 %v2357_v58 }
0x2304   :  { %2361 = vmin.xlane.f32.xlu1 %v2360_v45 }
0x2310   :  { %2166 = vperm.xlu0 %3447, %v2160_v27  }
0x2315   :  { %2169 = vperm.xlu1 %3448, %v2161_v54  }
0x2319   :  { %2172 = vperm.xlu1 %3448, %v2162_v56  }
0x237b   :  { %v2518_v33 = vpop.xlane.xlu0 %2517 }
0x237c   :  { %v2519_v17 = vcvt.f32.s32 %v2518_v33 }
0x237e   :  { %v4509_v42 = vadd.s32 %v2521_v3, %v2519_v17 }
0x237f   :  { %v3057_v15 = vpop.xlane.xlu0 %3056 }
0x2380   :  { %v3059_v13 = vcvt.f32.s32 %v3057_v15  ;;  %v3089_v3 = vrot.slane %v4509_v42, %v4114_v10 }
0x2382   :  { %v3060_v40 = vshll.u32 %v3059_v13, 16 }
0x2383   :  { %v3055_v29 = vpop.xlane.xlu0 %3054 }
0x2384   :  { %v3058_v41 = vcvt.f32.s32 %v3055_v29 }
0x2386   :  { %v3061_v28 = vadd.s32 %v3060_v40, %v3058_v41 }
0x2388   :  { %v3063_v1 = vsel %vm3062_vm15, %v3061_v28, %v4470_v19  ;;  %vm3064_vm0 = vcmp.eq.s32.totalorder %v4052_v2, %v3061_v28  ;;  %v2145_v19 = vrot.slane %v4161_v50, %v4073_v47  ;;  %v1986_v50 = vrot.slane %v4128_v0, %v4062_v39 }
0x2389   :  { %v3069_v20 = vsel %vm3064_vm0, %v3068_v48, 0  ;;  %vm2001_vm15 = vcmp.ge.f32.partialorder %v4099_v4, %v1982_v7  ;;  %v4610_v4 = vld [vmem:[#allocation13_spill] sm:$0xff] }
0x238a   :  { %v3070_v57 = vsel %vm3027_vm3, %v3069_v20, 0  ;;  %vm2158_vm2 = vcmp.ge.f32.partialorder %v4144_v30, %v2145_v19  ;;  %v2008_v30 = vsel %vm2000_vm11, %v4328_v21, 5  ;;  %vm2002_vm12 = vcmp.ge.f32.partialorder %v4087_v61, %v1986_v50 }
0x238b   :  { %v3071_v59 = vand.u32 65535, %v3070_v57  ;;  %v3072_v9 = vshrl.u32 %v3070_v57, 16  ;;  %v2163_v44 = vsel %vm2158_vm2, %v4328_v21, 5  ;;  %v2010_v55 = vsel %vm2002_vm12, %v4328_v21, 5  ;;  %v2167_v16 = vpop.permute.xlu0 %2166 }
0x238c   :  { %v2183_v5 = vrot.slane %v2167_v16, %v4114_v10  ;;  %v2009_v33 = vsel %vm2001_vm15, %v4328_v21, 5  ;;  %vm2004_vm1 = vcmp.ge.f32.partialorder %v4610_v4, %v1994_v26 }
0x238d   :  { %v3073_v25 = vcvt.s32.f32 %v3071_v59  ;;  %v3074_v11 = vcvt.s32.f32 %v3072_v9  ;;  %v4524_v60 = vpop.xlane.xlu1 %2361  ;;  %v2012_v28 = vsel %vm2004_vm1, %v4328_v21, 5 }
0x238e   :  { %vm2363_vm4 = vcmp.eq.f32.partialorder %v2360_v45, %v4524_v60 }
0x238f   :  { %3075 = vadd.xlane.f32.xlu0 %v3073_v25  ;;  %3077 = vadd.xlane.f32.xlu1 %v3074_v11  ;;  %v2364_v18 = vsel %vm2363_vm4, %v2359_v14, inf  ;;  %v2368_v25 = vcvt.f32.s32 %v4524_v60 }
0x2391   :  { %v2170_v62 = vpop.permute.xlu1 %2169  ;;  %v2369_v49 = vshll.u32 %v2368_v25, 16 }
0x2392   :  { %v2187_v47 = vrot.slane %v2170_v62, %v4114_v10 }
0x2394   :  { %v2200_v23 = vsel %vm1962_vm7, %v2187_v47, %v2183_v5 }
0x2395   :  { %v2173_v51 = vpop.permute.xlu1 %2172 }
0x2396   :  { %v2191_v53 = vrot.slane %v2173_v51, %v4114_v10 }
0x2398   :  { %v2201_v45 = vsel %vm1964_vm8, %v2191_v53, %v2200_v23 }
0x23a0   :  { %2178 = vperm.xlu1 %3448, %v2164_v43  }
0x23a5   :  { %2175 = vperm.xlu0 %3447, %v2163_v44  }
0x23c4   :  { %2365 = vmin.xlane.f32.xlu1 %v2364_v18 }
0x23d5   :  { %2014 = vperm.xlu1 %3448, %v2008_v30  }
0x23d9   :  { %2020 = vperm.xlu1 %3448, %v2010_v55  }
0x23dd   :  { %2023 = vperm.xlu1 %3448, %v2011_v22  }
0x2418   :  { %v3076_v39 = vpop.xlane.xlu0 %3075  ;;  %v3078_v6 = vpop.xlane.xlu1 %3077 }
0x2419   :  { %v3080_v12 = vcvt.f32.s32 %v3078_v6  ;;  %v3079_v35 = vcvt.f32.s32 %v3076_v39 }
0x241b   :  { %v3081_v8 = vshll.u32 %v3080_v12, 16 }
0x241c   :  { %v2179_v34 = vpop.permute.xlu1 %2178 }
0x241d   :  { %v3082_v61 = vadd.s32 %v3081_v8, %v3079_v35  ;;  %v2199_v36 = vrot.slane %v2179_v34, %v4114_v10 }
0x241f   :  { %v3084_v37 = vsel %vm3083_vm14, %v3082_v61, %v3063_v1  ;;  %vm3085_vm0 = vcmp.eq.s32.totalorder %v4052_v2, %v3082_v61 }
0x2420   :  { %v2176_v52 = vpop.permute.xlu0 %2175  ;;  %v3090_v17 = vsel %vm3085_vm0, %v3089_v3, 0 }
0x2421   :  { %v2195_v46 = vrot.slane %v2176_v52, %v4114_v10  ;;  %v3091_v15 = vsel %vm3027_vm3, %v3090_v17, 0 }
0x2422   :  { %v3093_v13 = vshrl.u32 %v3091_v15, 16  ;;  %v3092_v40 = vand.u32 65535, %v3091_v15 }
0x2423   :  { %v2202_v27 = vsel %vm1966_vm9, %v2195_v46, %v2201_v45 }
0x2424   :  { %v2203_v38 = vsel %vm1968_vm10, %v2199_v36, %v2202_v27  ;;  %v3095_v29 = vcvt.s32.f32 %v3093_v13  ;;  %v3094_v41 = vcvt.s32.f32 %v3092_v40 }
0x2425   :  { %v2204_v63 = vsel %vm1862_vm6, %v2203_v38, 2147483647 }
0x2426   :  { %v2206_v54 = vshra.s32 %v2204_v63, 16  ;;  %v2205_v48 = vand.u32 65535, %v2204_v63 }
0x2428   :  { %v2208_v56 = vcvt.s32.f32 %v2206_v54  ;;  %v2207_v42 = vcvt.s32.f32 %v2205_v48 }
0x242a   :  { %2209 = vmin.xlane.f32.xlu0 %v2208_v56 }
0x2440   :  { %2017 = vperm.xlu0 %3447, %v2009_v33  }
0x244d   :  { %v2366_v57 = vpop.xlane.xlu1 %2365 }
0x244e   :  { %v2367_v11 = vcvt.f32.s32 %v2366_v57 }
0x2450   :  { %v2370_v19 = vadd.s32 %v2369_v49, %v2367_v11 }
0x2451   :  { %v2015_v9 = vpop.permute.xlu1 %2014 }
0x2452   :  { %v2031_v18 = vrot.slane %v2015_v9, %v4114_v10  ;;  %v3109_v50 = vrot.slane %v2370_v19, %v4114_v10 }
0x2455   :  { %v2021_v0 = vpop.permute.xlu1 %2020 }
0x2456   :  { %v2039_v60 = vrot.slane %v2021_v0, %v4114_v10 }
0x2459   :  { %v2024_v32 = vpop.permute.xlu1 %2023 }
0x245a   :  { %v2043_v51 = vrot.slane %v2024_v32, %v4114_v10 }
0x245f   :  { %3098 = vadd.xlane.f32.xlu0 %v3095_v29 }
0x2463   :  { %3096 = vadd.xlane.f32.xlu0 %v3094_v41 }
0x2479   :  { %2026 = vperm.xlu0 %3447, %v2012_v28  }
0x24b3   :  { %v2210_v1 = vpop.xlane.xlu0 %2209 }
0x24b4   :  { %vm2211_vm2 = vcmp.eq.f32.partialorder %v2208_v56, %v2210_v1  ;;  %v2216_v23 = vcvt.f32.s32 %v2210_v1 }
0x24b5   :  { %v2212_v20 = vsel %vm2211_vm2, %v2207_v42, inf }
0x24b6   :  { %2213 = vmin.xlane.f32.xlu0 %v2212_v20  ;;  %v2217_v45 = vshll.u32 %v2216_v23, 16 }
0x24bb   :  { %v2018_v59 = vpop.permute.xlu0 %2017 }
0x24bc   :  { %v2035_v21 = vrot.slane %v2018_v59, %v4114_v10 }
0x24be   :  { %v2048_v30 = vsel %vm1962_vm7, %v2035_v21, %v2031_v18 }
0x24bf   :  { %v2049_v62 = vsel %vm1964_vm8, %v2039_v60, %v2048_v30  ;;  %vm3145_vm8 = vcmp.eq.s32.totalorder %v4052_v2, 1 }
0x24c0   :  { %v2050_v8 = vsel %vm1966_vm9, %v2043_v51, %v2049_v62 }
0x24e8   :  { %v3099_v24 = vpop.xlane.xlu0 %3098 }
0x24e9   :  { %v3101_v43 = vcvt.f32.s32 %v3099_v24 }
0x24eb   :  { %v3102_v58 = vshll.u32 %v3101_v43, 16 }
0x24ec   :  { %v3097_v44 = vpop.xlane.xlu0 %3096 }
0x24ed   :  { %v3100_v14 = vcvt.f32.s32 %v3097_v44 }
0x24ef   :  { %v3103_v31 = vadd.s32 %v3102_v58, %v3100_v14 }
0x24f1   :  { %v3104_v55 = vsel %vm1859_vm5, %v3103_v31, %v3084_v37  ;;  %vm3105_vm4 = vcmp.eq.s32.totalorder %v4052_v2, %v3103_v31  ;;  %vm3124_vm5 = vcmp.eq.s32.totalorder %v4052_v2, 2 }
0x24f2   :  { %v3110_v22 = vsel %vm3105_vm4, %v3109_v50, 0 }
0x24f3   :  { %v3111_v16 = vsel %vm3027_vm3, %v3110_v22, 0 }
0x24f4   :  { %v2027_v39 = vpop.permute.xlu0 %2026  ;;  %v3113_v6 = vshrl.u32 %v3111_v16, 16  ;;  %v3112_v12 = vand.u32 65535, %v3111_v16 }
0x24f5   :  { %v2047_v35 = vrot.slane %v2027_v39, %v4114_v10 }
0x24f6   :  { %v3115_v47 = vcvt.s32.f32 %v3113_v6  ;;  %v3114_v61 = vcvt.s32.f32 %v3112_v12 }
0x24f7   :  { %v2051_v53 = vsel %vm1968_vm10, %v2047_v35, %v2050_v8 }
0x24f8   :  { %3118 = vadd.xlane.f32.xlu1 %v3115_v47  ;;  %3116 = vadd.xlane.f32.xlu0 %v3114_v61  ;;  %v2052_v5 = vsel %vm1862_vm6, %v2051_v53, 2147483647 }
0x24f9   :  { %v2054_v37 = vshra.s32 %v2052_v5, 16  ;;  %v2053_v63 = vand.u32 65535, %v2052_v5 }
0x24fb   :  { %v2056_v34 = vcvt.s32.f32 %v2054_v37  ;;  %v2055_v17 = vcvt.s32.f32 %v2053_v63 }
0x24fd   :  { %2057 = vmin.xlane.f32.xlu1 %v2056_v34 }
0x253f   :  { %v2214_v52 = vpop.xlane.xlu0 %2213 }
0x2540   :  { %v2215_v46 = vcvt.f32.s32 %v2214_v52 }
0x2542   :  { %v2218_v54 = vadd.s32 %v2217_v45, %v2215_v46 }
0x2544   :  { %v3130_v15 = vrot.slane %v2218_v54, %v4114_v10 }
0x2581   :  { %v3117_v36 = vpop.xlane.xlu0 %3116  ;;  %v3119_v27 = vpop.xlane.xlu1 %3118 }
0x2582   :  { %v3121_v38 = vcvt.f32.s32 %v3119_v27  ;;  %v3120_v56 = vcvt.f32.s32 %v3117_v36 }
0x2584   :  { %v3122_v7 = vshll.u32 %v3121_v38, 16 }
0x2586   :  { %v3123_v33 = vadd.s32 %v3122_v7, %v3120_v56  ;;  %v2058_v3 = vpop.xlane.xlu1 %2057 }
0x2587   :  { %vm2059_vm6 = vcmp.eq.f32.partialorder %v2056_v34, %v2058_v3  ;;  %v2064_v42 = vcvt.f32.s32 %v2058_v3 }
0x2588   :  { %vm3126_vm7 = vcmp.eq.s32.totalorder %v4052_v2, %v3123_v33  ;;  %v2060_v13 = vsel %vm2059_vm6, %v2055_v17, inf  ;;  %v3125_v29 = vsel %vm3124_vm5, %v3123_v33, %v3104_v55 }
0x2589   :  { %v3131_v40 = vsel %vm3126_vm7, %v3130_v15, 0  ;;  %2061 = vmin.xlane.f32.xlu1 %v2060_v13  ;;  %v2065_v9 = vshll.u32 %v2064_v42, 16 }
0x258a   :  { %v3132_v41 = vsel %vm3027_vm3, %v3131_v40, 0 }
0x258b   :  { %v3134_v26 = vshrl.u32 %v3132_v41, 16  ;;  %v3133_v28 = vand.u32 65535, %v3132_v41 }
0x258d   :  { %v3136_v4 = vcvt.s32.f32 %v3134_v26  ;;  %v3135_v48 = vcvt.s32.f32 %v3133_v28 }
0x258f   :  { %3139 = vadd.xlane.f32.xlu0 %v3136_v4 }
0x2593   :  { %3137 = vadd.xlane.f32.xlu0 %v3135_v48 }
0x2612   :  { %v2062_v1 = vpop.xlane.xlu1 %2061 }
0x2613   :  { %v2063_v20 = vcvt.f32.s32 %v2062_v1 }
0x2615   :  { %v2066_v25 = vadd.s32 %v2065_v9, %v2063_v20 }
0x2617   :  { %v3151_v0 = vrot.slane %v2066_v25, %v4114_v10 }
0x2618   :  { %v3140_v57 = vpop.xlane.xlu0 %3139 }
0x2619   :  { %v3142_v59 = vcvt.f32.s32 %v3140_v57 }
0x261b   :  { %v3143_v24 = vshll.u32 %v3142_v59, 16 }
0x261c   :  { %v3138_v11 = vpop.xlane.xlu0 %3137 }
0x261d   :  { %v3141_v43 = vcvt.f32.s32 %v3138_v11 }
0x261f   :  { %v3144_v49 = vadd.s32 %v3143_v24, %v3141_v43 }
0x2621   :  { %vm3147_vm9 = vcmp.eq.s32.totalorder %v4052_v2, %v3144_v49  ;;  %v3146_v19 = vsel %vm3145_vm8, %v3144_v49, %v3125_v29 }
0x2622   :  { %v3152_v21 = vsel %vm3147_vm9, %v3151_v0, 0 }
0x2623   :  { %v3153_v44 = vsel %vm3027_vm3, %v3152_v21, 0 }
0x2624   :  { %v3155_v58 = vshrl.u32 %v3153_v44, 16  ;;  %v3154_v14 = vand.u32 65535, %v3153_v44 }
0x2626   :  { %v3157_v18 = vcvt.s32.f32 %v3155_v58  ;;  %v3156_v31 = vcvt.s32.f32 %v3154_v14 }
0x2628   :  { %3160 = vadd.xlane.f32.xlu1 %v3157_v18  ;;  %3158 = vadd.xlane.f32.xlu0 %v3156_v31 }
0x2629   :  { %3548 = shalt.err (!%p3545_p4)
}
0x262a   :  { %3179 = dma.vmem_to_hbm [thread:$0]  %s3177_s18, 16, %s4606_s13, [#allocation5]   ;;  %vm3166_vm10 = vcmp.eq.s32.totalorder %v4052_v2, 0  ;;  %vm3168_vm3 = vcmask 57344  }
0x262b   :  { %s3593_s22 = smov [#allocation8]  }
0x262c   :  { %s3186_s0 = sshll.u32 %s3593_s22, 4  ;;  %s3187_s0 = int_to_ptr.vmem [resolvable:$true] %s3186_s0 }
0x262d   :  { %s3557_s1 = scalar_lea.vmem %s3187_s0, 16  ;;  %s3561_s2 = scalar_lea.vmem %s3187_s0, 32 }
0x262e   :  { %p3558_p5 = scmp.ne.s32.totalorder %s3187_s0, %s3557_s1  ;;  %p3562_p6 = scmp.lt.s32.totalorder %s3187_s0, %s3187_s0 }
0x262f   :  { %p3563_p7 = scmp.lt.s32.totalorder %s3561_s2, %s3557_s1 }
0x2631   :  { %p3564_p8 = por %p3563_p7, %p3562_p6 }
0x2633   :  { %p3565_p9 = pnand %p3564_p8, %p3558_p5 }
0x26b1   :  { %v3161_v10 = vpop.xlane.xlu1 %3160  ;;  %v3159_v50 = vpop.xlane.xlu0 %3158 }
0x26b2   :  { %v3163_v30 = vcvt.f32.s32 %v3161_v10  ;;  %v3162_v32 = vcvt.f32.s32 %v3159_v50 }
0x26b4   :  { %v3164_v60 = vshll.u32 %v3163_v30, 16 }
0x26b6   :  { %v3165_v55 = vadd.s32 %v3164_v60, %v3162_v32 }
0x26b8   :  { %v3167_v22 = vsel %vm3166_vm10, %v3165_v55, %v3146_v19 }
0x26b9   :  { %3169 = vst.msk [vmem:[#allocation8] sm:$0x1] %vm3168_vm3, %v3167_v22 }
0x26ba   :  { %3568 = shalt.err (!%p3565_p9)
}
0x26bb   :  { %3189 = dma.vmem_to_hbm [thread:$0]  %s3187_s0, 16, %s4607_s14, [#allocation9]  }
0x26bc   :  { %3579 = dma.done.wait [#allocation5], 16  }
0x26bd   :  { %3580 = vsyncadd [#allocation5], 4294967280 }
0x26be   :  { %3581 = dma.done.wait [#allocation9], 16  }
0x26bf   :  { %3582 = vsyncadd [#allocation9], 4294967280 }
0x26c0   :  { %3196 = vsyncpa [#allocation5], 1 }
0x26c1   :  { %3197 = vsyncpa [#allocation9], 1 }
0x26c2   :  { %3198 = vsyncpa [#allocation6], 1 }

</bundles_post_ra>
